<compile_context>
chip_gen: v5e
topology: v5e:2x2
jax: 0.10.0
libtpu: 0.0.40
codegen_flags: <defaults>
</compile_context>

<pallas_src>
import jax
import jax.numpy as jnp
import numpy as np
from jax.experimental import pallas as pl
from jax.experimental.pallas import tpu as pltpu

ALPHA = 0.2              # LeakyReLU negative slope
K = 4                    # conv kernel size (all layers)
BF16 = jnp.bfloat16
F32 = jnp.float32


def _out_hw(h, w, k, stride, pad):
    return (h + 2 * pad - k) // stride + 1, (w + 2 * pad - k) // stride + 1


# ----------------------------------------------------------------------------
# Fused Pallas kernel: whole discriminator forward, one grid step per sample.
# ----------------------------------------------------------------------------
def _disc_fused_kernel(p1_ref, w1_ref, g2_ref, w2_ref, g3_ref, w3_ref,
                       g4_ref, w4_ref, bias_ref, o_ref,
                       patch2_ref, patch3_ref):
    def lrelu(v):
        return jnp.where(v >= 0.0, v, ALPHA * v)

    def gather(g_t, h):
        # G_t is 0/1 (one-hot rows; all-zero rows encode zero padding), so the
        # bf16 result is exact.  f32 accumulate + one small pack keeps the
        # matmul on the universally supported MXU lowering path.
        return jnp.dot(g_t, h, preferred_element_type=F32).astype(BF16)

    # ---- Layer 1: Conv(in,64,4,2,1) + bias + LeakyReLU (no BN) -------------
    c1 = w1_ref.shape[1]                                          # 64
    z1 = jnp.dot(p1_ref[...], w1_ref[...], preferred_element_type=F32)
    h1 = lrelu(z1 + bias_ref[0:1, 0:c1]).astype(BF16)             # (M1, 64)

    # ---- Layer 2: Conv(64,128,4,2,1) + BN (scale folded into W) + LReLU ----
    # Gather every tap into the VMEM patch buffer (tap pairs -> 128-lane-wide
    # aligned stores), then ONE wide matmul (M2, T*64) @ (T*64, 128).
    t2n = g2_ref.shape[0]
    cin2 = c1                                                     # 64
    for j in range(t2n // 2):
        t = 2 * j
        pair = jnp.concatenate(
            [gather(g2_ref[t], h1), gather(g2_ref[t + 1], h1)], axis=-1)
        patch2_ref[:, t * cin2:(t + 2) * cin2] = pair
    if t2n % 2:                                                   # odd tap count
        t = t2n - 1
        patch2_ref[:, t * cin2:(t + 1) * cin2] = gather(g2_ref[t], h1)
    c2 = w2_ref.shape[1]                                          # 128
    z2 = jnp.dot(patch2_ref[...], w2_ref[...], preferred_element_type=F32)
    h2 = lrelu(z2 + bias_ref[1:2, 0:c2]).astype(BF16)             # (M2, 128)

    # ---- Layer 3: Conv(128,256,4,2,1) + BN (folded) + LReLU ----------------
    # Cin=128 lands exactly on lane-tile boundaries -> direct aligned stores.
    t3n = g3_ref.shape[0]
    cin3 = c2                                                     # 128
    for t in range(t3n):
        patch3_ref[:, t * cin3:(t + 1) * cin3] = gather(g3_ref[t], h2)
    c3 = w3_ref.shape[1]                                          # 256
    z3 = jnp.dot(patch3_ref[...], w3_ref[...], preferred_element_type=F32)
    h3 = lrelu(z3 + bias_ref[2:3, 0:c3]).astype(BF16)             # (M3, 256)

    # ---- Layer 4: Conv(256,1,4,1,1) ------------------------------------------
    # Cout=1 -> lane-dense VPU multiply against the pre-concatenated weight
    # row + a single lane reduction (avoids an N=1 MXU matmul and per-tap
    # broadcasts).  Padding-only taps were dropped statically on the host.
    t4n = g4_ref.shape[0]
    patch4 = jnp.concatenate(
        [jnp.dot(g4_ref[t], h3, preferred_element_type=F32) for t in range(t4n)],
        axis=-1)                                                  # (M4, T4*256) f32
    out = jnp.sum(patch4 * w4_ref[...], axis=-1, keepdims=True)   # (M4, 1)
    out = out + bias_ref[3:4, 0:1]
    o_ref[...] = out.reshape(o_ref.shape).astype(o_ref.dtype)


# ----------------------------------------------------------------------------
# Host-side (one-time) layout plumbing: gather matrices, BN folding, weights.
# ----------------------------------------------------------------------------
def _im2col_first_layer(x_nhwc, k, stride, pad):
    """NHWC -> (N*Ho*Wo, k*k*C); rows ordered (n,oh,ow), cols ordered (kh,kw,c)."""
    x = jnp.pad(x_nhwc, ((0, 0), (pad, pad), (pad, pad), (0, 0)))
    n, hp, wp, c = x.shape
    ho = (hp - k) // stride + 1
    wo = (wp - k) // stride + 1
    cols = []
    for i in range(k):
        for j in range(k):
            cols.append(x[:, i:i + (ho - 1) * stride + 1:stride,
                            j:j + (wo - 1) * stride + 1:stride, :])
    p = jnp.stack(cols, axis=3)                      # (n, ho, wo, k*k, c)
    return p.reshape(n * ho * wo, k * k * c)


def _gather_mats(h_in, w_in, k, stride, pad):
    """Per-sample 0/1 gather matrices G[t]: (M_out, M_in), tap t = kh*k+kw.

    Activation rows within a sample are ordered (row, col).  An all-zero row
    encodes zero padding.  Taps entirely inside the padding are dropped."""
    h_out = (h_in + 2 * pad - k) // stride + 1
    w_out = (w_in + 2 * pad - k) // stride + 1
    g = np.zeros((k * k, h_out * w_out, h_in * w_in), np.float32)
    for kh in range(k):
        for kw in range(k):
            t = kh * k + kw
            for oh in range(h_out):
                ih = oh * stride + kh - pad
                if not (0 <= ih < h_in):
                    continue
                for ow in range(w_out):
                    iw = ow * stride + kw - pad
                    if not (0 <= iw < w_in):
                        continue
                    g[t, oh * w_out + ow, ih * w_in + iw] = 1.0
    active = [t for t in range(k * k) if g[t].any()]
    return g[np.asarray(active)], active, (h_out, w_out)


def _folded_weight(w_oihw, active, scale=None):
    """(Cout,Cin,kh,kw) -> (T_active*Cin, Cout), rows ordered (tap, cin) to
    match the patch-buffer column order; optional BN scale folded per Cout."""
    cout, cin, kh, kw = w_oihw.shape
    w = jnp.transpose(w_oihw, (2, 3, 1, 0)).reshape(kh * kw, cin, cout)
    w = w[np.asarray(active)]                          # (T, cin, cout)
    if scale is not None:
        w = w * scale.reshape(1, 1, cout)
    return w.reshape(len(active) * cin, cout)


def _fold_bn(conv_bias, bn):
    gamma, beta, mean, var, eps = bn
    s = gamma / jnp.sqrt(var + eps)
    return s, beta + (conv_bias - mean) * s


def make_discriminator(params, input_shape):
    """Precompute all kernel-ready operands once; return a jitted forward fn."""
    n, cin, h0, w0 = input_shape
    c1o = params["w1"].shape[0]                        # 64
    c2o = params["w2"].shape[0]                        # 128
    c3o = params["w3"].shape[0]                        # 256

    h1s, w1s = _out_hw(h0, w0, K, 2, 1)
    g2np, a2, (h2s, w2s) = _gather_mats(h1s, w1s, K, 2, 1)
    g3np, a3, (h3s, w3s) = _gather_mats(h2s, w2s, K, 2, 1)
    g4np, a4, (h4s, w4s) = _gather_mats(h3s, w3s, K, 1, 1)
    m1s, m2s, m3s, m4s = h1s * w1s, h2s * w2s, h3s * w3s, h4s * w4s
    k1 = K * K * cin

    # Layer 1 weight: (16*cin, 64), rows ordered (kh, kw, cin) to match im2col.
    w1m = jnp.transpose(params["w1"], (2, 3, 1, 0)).reshape(k1, c1o).astype(BF16)

    # Layers 2/3: fold the BN scale into the wide weight matrix; bias only.
    s2, t2 = _fold_bn(params["b2"], params["bn2"])
    s3, t3 = _fold_bn(params["b3"], params["bn3"])
    w2big = _folded_weight(params["w2"], a2, s2).astype(BF16)   # (T2*64, 128)
    w3big = _folded_weight(params["w3"], a3, s3).astype(BF16)   # (T3*128, 256)

    # Layer 4: pre-concatenated (1, T4*256) f32 row for the VPU multiply path.
    w4flat = _folded_weight(params["w4"], a4).reshape(1, -1).astype(F32)

    # Pack all small per-channel vectors into ONE f32 operand (one DMA).
    nbias = max(c1o, c2o, c3o)
    biases = jnp.zeros((4, nbias), F32)
    biases = biases.at[0, :c1o].set(params["b1"].astype(F32))
    biases = biases.at[1, :c2o].set(t2.astype(F32))
    biases = biases.at[2, :c3o].set(t3.astype(F32))
    biases = biases.at[3, 0].set(params["b4"].astype(F32)[0])

    g2 = jnp.asarray(g2np, BF16)
    g3 = jnp.asarray(g3np, BF16)
    g4 = jnp.asarray(g4np, BF16)

    # VMEM footprint sanity check (per-sample gathers keep this independent of
    # batch size).  Conservative bound for v7x's 32 MiB scoped default with
    # BlockSpec double-buffering.
    op_bytes = sum(int(np.prod(a.shape)) * a.dtype.itemsize
                   for a in (w1m, g2, w2big, g3, w3big, g4, w4flat, biases))
    op_bytes += n * m1s * k1 * 2                                   # p1 (bf16)
    op_bytes += (m2s * len(a2) * c1o + m3s * len(a3) * c2o) * 2    # scratch
    if op_bytes > 24 * 1024 * 1024:
        raise ValueError(
            "operands too large for a VMEM-resident kernel at this input size; "
            "tile the per-sample spatial dim / use strided in-kernel gathers")
    # TODO(synk): for realistic velocityGAN sizes, add a spatial grid axis per
    # sample (tiled M) instead of whole-sample gather matrices, and set
    # CompilerParams(vmem_limit_bytes=...) sized against v7x's 64 MiB VMEM.

    kernel = pl.pallas_call(
        _disc_fused_kernel,
        out_shape=jax.ShapeDtypeStruct((n, 1, m4s), F32),
        grid_spec=pltpu.PrefetchScalarGridSpec(
            num_scalar_prefetch=0,
            grid=(n,),
            in_specs=[
                pl.BlockSpec((m1s, k1), lambda b: (b, 0)),      # layer-1 patches (per sample)
                pl.BlockSpec(w1m.shape, lambda b: (0, 0)),      # shared weights below
                pl.BlockSpec(g2.shape, lambda b: (0, 0, 0)),
                pl.BlockSpec(w2big.shape, lambda b: (0, 0)),
                pl.BlockSpec(g3.shape, lambda b: (0, 0, 0)),
                pl.BlockSpec(w3big.shape, lambda b: (0, 0)),
                pl.BlockSpec(g4.shape, lambda b: (0, 0, 0)),
                pl.BlockSpec(w4flat.shape, lambda b: (0, 0)),
                pl.BlockSpec(biases.shape, lambda b: (0, 0)),
            ],
            out_specs=pl.BlockSpec((1, 1, m4s), lambda b: (b, 0, 0)),
            scratch_shapes=[
                pltpu.VMEM((m2s, len(a2) * c1o), BF16),         # layer-2 patch buffer
                pltpu.VMEM((m3s, len(a3) * c2o), BF16),         # layer-3 patch buffer
            ],
        ),
        compiler_params=pltpu.CompilerParams(
            dimension_semantics=("parallel",)),
    )

    @jax.jit
    def forward(x_nchw):
        # TODO(synk): layer-1 im2col stays host-side (fused under jit) because
        # Cin=1 makes an in-kernel gather degenerate on the lane dimension.
        x = jnp.transpose(x_nchw, (0, 2, 3, 1)).astype(F32)      # NCHW -> NHWC
        p1 = _im2col_first_layer(x, K, 2, 1).astype(BF16)        # (n*M1, 16*cin)
        out = kernel(p1, w1m, g2, w2big, g3, w3big, g4, w4flat, biases)
        return out.reshape(n, 1, h4s, w4s)                       # rows are (oh, ow)

    return forward


# ----------------------------------------------------------------------------
# Deterministic parameter init (PyTorch Conv2d defaults; BN stats randomized
# so that the BN folding is actually exercised).
# ----------------------------------------------------------------------------
def init_params(key, in_channels=1):
    def conv_init(k, cout, cin, kh=4, kw=4):
        kw_, kb_ = jax.random.split(k)
        fan_in = cin * kh * kw
        bound = 1.0 / np.sqrt(fan_in)
        w = jax.random.uniform(kw_, (cout, cin, kh, kw), F32, -bound, bound)
        b = jax.random.uniform(kb_, (cout,), F32, -bound, bound)
        return w, b

    def bn_init(k, c):
        kg, kb, km, kv = jax.random.split(k, 4)
        gamma = jax.random.uniform(kg, (c,), F32, 0.5, 1.5)
        beta = 0.1 * jax.random.normal(kb, (c,), F32)
        mean = 0.1 * jax.random.normal(km, (c,), F32)
        var = jax.random.uniform(kv, (c,), F32, 0.5, 1.5)
        return (gamma, beta, mean, var, 1e-5)

    k1, k2, k3, k4, k5, k6 = jax.random.split(key, 6)
    w1, b1 = conv_init(k1, 64, in_channels)
    w2, b2 = conv_init(k2, 128, 64)
    w3, b3 = conv_init(k3, 256, 128)
    w4, b4 = conv_init(k4, 1, 256)
    return dict(w1=w1, b1=b1, w2=w2, b2=b2, bn2=bn_init(k5, 128),
                w3=w3, b3=b3, bn3=bn_init(k6, 256), w4=w4, b4=b4)


# ----------------------------------------------------------------------------
# Pure-JAX reference (lax.conv, f32) for the correctness check.
# ----------------------------------------------------------------------------
def reference_forward(x_nchw, params):
    def conv(x, w, b, stride, pad):
        y = jax.lax.conv_general_dilated(
            x, w, (stride, stride), ((pad, pad), (pad, pad)),
            dimension_numbers=("NCHW", "OIHW", "NCHW"))
        return y + b.reshape(1, -1, 1, 1)

    def bn(x, p):
        gamma, beta, mean, var, eps = p
        s = gamma / jnp.sqrt(var + eps)
        return x * s.reshape(1, -1, 1, 1) + (beta - mean * s).reshape(1, -1, 1, 1)

    lrelu = lambda v: jnp.where(v >= 0.0, v, ALPHA * v)
    x = lrelu(conv(x_nchw, params["w1"], params["b1"], 2, 1))
    x = lrelu(bn(conv(x, params["w2"], params["b2"], 2, 1), params["bn2"]))
    x = lrelu(bn(conv(x, params["w3"], params["b3"], 2, 1), params["bn3"]))
    return conv(x, params["w4"], params["b4"], 1, 1)


if __name__ == "__main__":
    key = jax.random.PRNGKey(0)
    pkey, xkey = jax.random.split(key)
    params = init_params(pkey, in_channels=1)

    # Small deterministic input consistent with the module: (N=2, C=1, 16, 16)
    x = jax.random.normal(xkey, (2, 1, 16, 16), F32)

    forward = make_discriminator(params, x.shape)
    out = jax.block_until_ready(forward(x))
    assert out.shape == (2, 1, 1, 1), out.shape

    ref = jax.block_until_ready(reference_forward(x, params))
    # Tolerance reflects bf16 weights/activations on the MXU (f32 accumulation).
    np.testing.assert_allclose(np.asarray(out), np.asarray(ref),
                               rtol=5e-2, atol=2e-2)
    print("KERNEL_OK")
</pallas_src>

<mosaic_0001>
module attributes {stable_mosaic.version = 11 : i64} {
  func.func @_disc_fused_kernel(%arg0: i32, %arg1: memref<64x16xbf16, #tpu.memory_space<vmem>>, %arg2: memref<16x64xbf16, #tpu.memory_space<vmem>>, %arg3: memref<16x16x64xbf16, #tpu.memory_space<vmem>>, %arg4: memref<1024x128xbf16, #tpu.memory_space<vmem>>, %arg5: memref<16x4x16xbf16, #tpu.memory_space<vmem>>, %arg6: memref<2048x256xbf16, #tpu.memory_space<vmem>>, %arg7: memref<4x1x4xbf16, #tpu.memory_space<vmem>>, %arg8: memref<1x1024xf32, #tpu.memory_space<vmem>>, %arg9: memref<4x256xf32, #tpu.memory_space<vmem>>, %arg10: memref<1x1x1xf32, #tpu.memory_space<vmem>>, %arg11: memref<16x1024xbf16, #tpu.memory_space<vmem>>, %arg12: memref<4x2048xbf16, #tpu.memory_space<vmem>>) attributes {dimension_semantics = [#tpu.dimension_semantics<parallel>], iteration_bounds = array<i64: 2>, scalar_prefetch = 0 : i64, scratch_operands = 2 : i64, tpu.core_type = #tpu.core_type<tc>, window_params = [{transform_indices = @transform_0, window_bounds = array<i64: 64, 16>}, {pipeline_mode = #tpu.pipeline_mode<synchronous>, transform_indices = @transform_1, window_bounds = array<i64: 16, 64>}, {pipeline_mode = #tpu.pipeline_mode<synchronous>, transform_indices = @transform_2, window_bounds = array<i64: 16, 16, 64>}, {pipeline_mode = #tpu.pipeline_mode<synchronous>, transform_indices = @transform_3, window_bounds = array<i64: 1024, 128>}, {pipeline_mode = #tpu.pipeline_mode<synchronous>, transform_indices = @transform_4, window_bounds = array<i64: 16, 4, 16>}, {pipeline_mode = #tpu.pipeline_mode<synchronous>, transform_indices = @transform_5, window_bounds = array<i64: 2048, 256>}, {pipeline_mode = #tpu.pipeline_mode<synchronous>, transform_indices = @transform_6, window_bounds = array<i64: 4, 1, 4>}, {pipeline_mode = #tpu.pipeline_mode<synchronous>, transform_indices = @transform_7, window_bounds = array<i64: 1, 1024>}, {pipeline_mode = #tpu.pipeline_mode<synchronous>, transform_indices = @transform_8, window_bounds = array<i64: 4, 256>}, {transform_indices = @transform_9, window_bounds = array<i64: 1, 1, 1>}]} {
    %c0 = arith.constant 0 : index
    %c0_0 = arith.constant 0 : index
    %0 = vector.load %arg1[%c0, %c0_0] : memref<64x16xbf16, #tpu.memory_space<vmem>>, vector<64x16xbf16>
    %c0_1 = arith.constant 0 : index
    %c0_2 = arith.constant 0 : index
    %1 = vector.load %arg2[%c0_1, %c0_2] : memref<16x64xbf16, #tpu.memory_space<vmem>>, vector<16x64xbf16>
    %cst = arith.constant dense<0.000000e+00> : vector<64x64xf32>
    %2 = tpu.matmul %0, %1, %cst {dimension_numbers = #tpu.dot_dimension_numbers<[1], [0], [0], [1], [0, 0, 1, 1], [], []>} : vector<64x16xbf16>, vector<16x64xbf16>, vector<64x64xf32> -> vector<64x64xf32>
    %c0_3 = arith.constant 0 : index
    %c0_4 = arith.constant 0 : index
    %3 = vector.load %arg9[%c0_3, %c0_4] : memref<4x256xf32, #tpu.memory_space<vmem>>, vector<1x64xf32>
    %4 = vector.broadcast %3 : vector<1x64xf32> to vector<64x64xf32>
    %5 = arith.addf %2, %4 : vector<64x64xf32>
    %cst_5 = arith.constant 0.000000e+00 : f32
    %6 = vector.broadcast %cst_5 : f32 to vector<64x64xf32>
    %7 = arith.cmpf oge, %5, %6 : vector<64x64xf32>
    %cst_6 = arith.constant 2.000000e-01 : f32
    %8 = vector.broadcast %cst_6 : f32 to vector<64x64xf32>
    %9 = arith.mulf %8, %5 : vector<64x64xf32>
    %10 = arith.select %7, %5, %9 : vector<64x64xi1>, vector<64x64xf32>
    %11 = arith.truncf %10 : vector<64x64xf32> to vector<64x64xbf16>
    %c0_7 = arith.constant 0 : index
    %c0_8 = arith.constant 0 : index
    %c0_9 = arith.constant 0 : index
    %12 = vector.load %arg3[%c0_7, %c0_8, %c0_9] : memref<16x16x64xbf16, #tpu.memory_space<vmem>>, vector<1x16x64xbf16>
    %13 = vector.shape_cast %12 : vector<1x16x64xbf16> to vector<16x64xbf16>
    %cst_10 = arith.constant dense<0.000000e+00> : vector<16x64xf32>
    %14 = tpu.matmul %13, %11, %cst_10 {dimension_numbers = #tpu.dot_dimension_numbers<[1], [0], [0], [1], [0, 0, 1, 1], [], []>} : vector<16x64xbf16>, vector<64x64xbf16>, vector<16x64xf32> -> vector<16x64xf32>
    %15 = arith.truncf %14 : vector<16x64xf32> to vector<16x64xbf16>
    %c1 = arith.constant 1 : index
    %c0_11 = arith.constant 0 : index
    %c0_12 = arith.constant 0 : index
    %16 = vector.load %arg3[%c1, %c0_11, %c0_12] : memref<16x16x64xbf16, #tpu.memory_space<vmem>>, vector<1x16x64xbf16>
    %17 = vector.shape_cast %16 : vector<1x16x64xbf16> to vector<16x64xbf16>
    %cst_13 = arith.constant dense<0.000000e+00> : vector<16x64xf32>
    %18 = tpu.matmul %17, %11, %cst_13 {dimension_numbers = #tpu.dot_dimension_numbers<[1], [0], [0], [1], [0, 0, 1, 1], [], []>} : vector<16x64xbf16>, vector<64x64xbf16>, vector<16x64xf32> -> vector<16x64xf32>
    %19 = arith.truncf %18 : vector<16x64xf32> to vector<16x64xbf16>
    %20 = tpu.concatenate %15, %19 in 1 : vector<16x64xbf16>, vector<16x64xbf16> -> vector<16x128xbf16>
    %c0_14 = arith.constant 0 : index
    %c0_15 = arith.constant 0 : index
    %21 = vector.load %arg11[%c0_14, %c0_15] : memref<16x1024xbf16, #tpu.memory_space<vmem>>, vector<16x128xbf16>
    tpu.vector_store %arg11[%c0_14, %c0_15], %20 {strides = array<i32>} : memref<16x1024xbf16, #tpu.memory_space<vmem>>, vector<16x128xbf16>,
    %c2 = arith.constant 2 : index
    %c0_16 = arith.constant 0 : index
    %c0_17 = arith.constant 0 : index
    %22 = vector.load %arg3[%c2, %c0_16, %c0_17] : memref<16x16x64xbf16, #tpu.memory_space<vmem>>, vector<1x16x64xbf16>
    %23 = vector.shape_cast %22 : vector<1x16x64xbf16> to vector<16x64xbf16>
    %cst_18 = arith.constant dense<0.000000e+00> : vector<16x64xf32>
    %24 = tpu.matmul %23, %11, %cst_18 {dimension_numbers = #tpu.dot_dimension_numbers<[1], [0], [0], [1], [0, 0, 1, 1], [], []>} : vector<16x64xbf16>, vector<64x64xbf16>, vector<16x64xf32> -> vector<16x64xf32>
    %25 = arith.truncf %24 : vector<16x64xf32> to vector<16x64xbf16>
    %c3 = arith.constant 3 : index
    %c0_19 = arith.constant 0 : index
    %c0_20 = arith.constant 0 : index
    %26 = vector.load %arg3[%c3, %c0_19, %c0_20] : memref<16x16x64xbf16, #tpu.memory_space<vmem>>, vector<1x16x64xbf16>
    %27 = vector.shape_cast %26 : vector<1x16x64xbf16> to vector<16x64xbf16>
    %cst_21 = arith.constant dense<0.000000e+00> : vector<16x64xf32>
    %28 = tpu.matmul %27, %11, %cst_21 {dimension_numbers = #tpu.dot_dimension_numbers<[1], [0], [0], [1], [0, 0, 1, 1], [], []>} : vector<16x64xbf16>, vector<64x64xbf16>, vector<16x64xf32> -> vector<16x64xf32>
    %29 = arith.truncf %28 : vector<16x64xf32> to vector<16x64xbf16>
    %30 = tpu.concatenate %25, %29 in 1 : vector<16x64xbf16>, vector<16x64xbf16> -> vector<16x128xbf16>
    %c0_22 = arith.constant 0 : index
    %c128 = arith.constant 128 : index
    %31 = vector.load %arg11[%c0_22, %c128] : memref<16x1024xbf16, #tpu.memory_space<vmem>>, vector<16x128xbf16>
    tpu.vector_store %arg11[%c0_22, %c128], %30 {strides = array<i32>} : memref<16x1024xbf16, #tpu.memory_space<vmem>>, vector<16x128xbf16>,
    %c4 = arith.constant 4 : index
    %c0_23 = arith.constant 0 : index
    %c0_24 = arith.constant 0 : index
    %32 = vector.load %arg3[%c4, %c0_23, %c0_24] : memref<16x16x64xbf16, #tpu.memory_space<vmem>>, vector<1x16x64xbf16>
    %33 = vector.shape_cast %32 : vector<1x16x64xbf16> to vector<16x64xbf16>
    %cst_25 = arith.constant dense<0.000000e+00> : vector<16x64xf32>
    %34 = tpu.matmul %33, %11, %cst_25 {dimension_numbers = #tpu.dot_dimension_numbers<[1], [0], [0], [1], [0, 0, 1, 1], [], []>} : vector<16x64xbf16>, vector<64x64xbf16>, vector<16x64xf32> -> vector<16x64xf32>
    %35 = arith.truncf %34 : vector<16x64xf32> to vector<16x64xbf16>
    %c5 = arith.constant 5 : index
    %c0_26 = arith.constant 0 : index
    %c0_27 = arith.constant 0 : index
    %36 = vector.load %arg3[%c5, %c0_26, %c0_27] : memref<16x16x64xbf16, #tpu.memory_space<vmem>>, vector<1x16x64xbf16>
    %37 = vector.shape_cast %36 : vector<1x16x64xbf16> to vector<16x64xbf16>
    %cst_28 = arith.constant dense<0.000000e+00> : vector<16x64xf32>
    %38 = tpu.matmul %37, %11, %cst_28 {dimension_numbers = #tpu.dot_dimension_numbers<[1], [0], [0], [1], [0, 0, 1, 1], [], []>} : vector<16x64xbf16>, vector<64x64xbf16>, vector<16x64xf32> -> vector<16x64xf32>
    %39 = arith.truncf %38 : vector<16x64xf32> to vector<16x64xbf16>
    %40 = tpu.concatenate %35, %39 in 1 : vector<16x64xbf16>, vector<16x64xbf16> -> vector<16x128xbf16>
    %c0_29 = arith.constant 0 : index
    %c256 = arith.constant 256 : index
    %41 = vector.load %arg11[%c0_29, %c256] : memref<16x1024xbf16, #tpu.memory_space<vmem>>, vector<16x128xbf16>
    tpu.vector_store %arg11[%c0_29, %c256], %40 {strides = array<i32>} : memref<16x1024xbf16, #tpu.memory_space<vmem>>, vector<16x128xbf16>,
    %c6 = arith.constant 6 : index
    %c0_30 = arith.constant 0 : index
    %c0_31 = arith.constant 0 : index
    %42 = vector.load %arg3[%c6, %c0_30, %c0_31] : memref<16x16x64xbf16, #tpu.memory_space<vmem>>, vector<1x16x64xbf16>
    %43 = vector.shape_cast %42 : vector<1x16x64xbf16> to vector<16x64xbf16>
    %cst_32 = arith.constant dense<0.000000e+00> : vector<16x64xf32>
    %44 = tpu.matmul %43, %11, %cst_32 {dimension_numbers = #tpu.dot_dimension_numbers<[1], [0], [0], [1], [0, 0, 1, 1], [], []>} : vector<16x64xbf16>, vector<64x64xbf16>, vector<16x64xf32> -> vector<16x64xf32>
    %45 = arith.truncf %44 : vector<16x64xf32> to vector<16x64xbf16>
    %c7 = arith.constant 7 : index
    %c0_33 = arith.constant 0 : index
    %c0_34 = arith.constant 0 : index
    %46 = vector.load %arg3[%c7, %c0_33, %c0_34] : memref<16x16x64xbf16, #tpu.memory_space<vmem>>, vector<1x16x64xbf16>
    %47 = vector.shape_cast %46 : vector<1x16x64xbf16> to vector<16x64xbf16>
    %cst_35 = arith.constant dense<0.000000e+00> : vector<16x64xf32>
    %48 = tpu.matmul %47, %11, %cst_35 {dimension_numbers = #tpu.dot_dimension_numbers<[1], [0], [0], [1], [0, 0, 1, 1], [], []>} : vector<16x64xbf16>, vector<64x64xbf16>, vector<16x64xf32> -> vector<16x64xf32>
    %49 = arith.truncf %48 : vector<16x64xf32> to vector<16x64xbf16>
    %50 = tpu.concatenate %45, %49 in 1 : vector<16x64xbf16>, vector<16x64xbf16> -> vector<16x128xbf16>
    %c0_36 = arith.constant 0 : index
    %c384 = arith.constant 384 : index
    %51 = vector.load %arg11[%c0_36, %c384] : memref<16x1024xbf16, #tpu.memory_space<vmem>>, vector<16x128xbf16>
    tpu.vector_store %arg11[%c0_36, %c384], %50 {strides = array<i32>} : memref<16x1024xbf16, #tpu.memory_space<vmem>>, vector<16x128xbf16>,
    %c8 = arith.constant 8 : index
    %c0_37 = arith.constant 0 : index
    %c0_38 = arith.constant 0 : index
    %52 = vector.load %arg3[%c8, %c0_37, %c0_38] : memref<16x16x64xbf16, #tpu.memory_space<vmem>>, vector<1x16x64xbf16>
    %53 = vector.shape_cast %52 : vector<1x16x64xbf16> to vector<16x64xbf16>
    %cst_39 = arith.constant dense<0.000000e+00> : vector<16x64xf32>
    %54 = tpu.matmul %53, %11, %cst_39 {dimension_numbers = #tpu.dot_dimension_numbers<[1], [0], [0], [1], [0, 0, 1, 1], [], []>} : vector<16x64xbf16>, vector<64x64xbf16>, vector<16x64xf32> -> vector<16x64xf32>
    %55 = arith.truncf %54 : vector<16x64xf32> to vector<16x64xbf16>
    %c9 = arith.constant 9 : index
    %c0_40 = arith.constant 0 : index
    %c0_41 = arith.constant 0 : index
    %56 = vector.load %arg3[%c9, %c0_40, %c0_41] : memref<16x16x64xbf16, #tpu.memory_space<vmem>>, vector<1x16x64xbf16>
    %57 = vector.shape_cast %56 : vector<1x16x64xbf16> to vector<16x64xbf16>
    %cst_42 = arith.constant dense<0.000000e+00> : vector<16x64xf32>
    %58 = tpu.matmul %57, %11, %cst_42 {dimension_numbers = #tpu.dot_dimension_numbers<[1], [0], [0], [1], [0, 0, 1, 1], [], []>} : vector<16x64xbf16>, vector<64x64xbf16>, vector<16x64xf32> -> vector<16x64xf32>
    %59 = arith.truncf %58 : vector<16x64xf32> to vector<16x64xbf16>
    %60 = tpu.concatenate %55, %59 in 1 : vector<16x64xbf16>, vector<16x64xbf16> -> vector<16x128xbf16>
    %c0_43 = arith.constant 0 : index
    %c512 = arith.constant 512 : index
    %61 = vector.load %arg11[%c0_43, %c512] : memref<16x1024xbf16, #tpu.memory_space<vmem>>, vector<16x128xbf16>
    tpu.vector_store %arg11[%c0_43, %c512], %60 {strides = array<i32>} : memref<16x1024xbf16, #tpu.memory_space<vmem>>, vector<16x128xbf16>,
    %c10 = arith.constant 10 : index
    %c0_44 = arith.constant 0 : index
    %c0_45 = arith.constant 0 : index
    %62 = vector.load %arg3[%c10, %c0_44, %c0_45] : memref<16x16x64xbf16, #tpu.memory_space<vmem>>, vector<1x16x64xbf16>
    %63 = vector.shape_cast %62 : vector<1x16x64xbf16> to vector<16x64xbf16>
    %cst_46 = arith.constant dense<0.000000e+00> : vector<16x64xf32>
    %64 = tpu.matmul %63, %11, %cst_46 {dimension_numbers = #tpu.dot_dimension_numbers<[1], [0], [0], [1], [0, 0, 1, 1], [], []>} : vector<16x64xbf16>, vector<64x64xbf16>, vector<16x64xf32> -> vector<16x64xf32>
    %65 = arith.truncf %64 : vector<16x64xf32> to vector<16x64xbf16>
    %c11 = arith.constant 11 : index
    %c0_47 = arith.constant 0 : index
    %c0_48 = arith.constant 0 : index
    %66 = vector.load %arg3[%c11, %c0_47, %c0_48] : memref<16x16x64xbf16, #tpu.memory_space<vmem>>, vector<1x16x64xbf16>
    %67 = vector.shape_cast %66 : vector<1x16x64xbf16> to vector<16x64xbf16>
    %cst_49 = arith.constant dense<0.000000e+00> : vector<16x64xf32>
    %68 = tpu.matmul %67, %11, %cst_49 {dimension_numbers = #tpu.dot_dimension_numbers<[1], [0], [0], [1], [0, 0, 1, 1], [], []>} : vector<16x64xbf16>, vector<64x64xbf16>, vector<16x64xf32> -> vector<16x64xf32>
    %69 = arith.truncf %68 : vector<16x64xf32> to vector<16x64xbf16>
    %70 = tpu.concatenate %65, %69 in 1 : vector<16x64xbf16>, vector<16x64xbf16> -> vector<16x128xbf16>
    %c0_50 = arith.constant 0 : index
    %c640 = arith.constant 640 : index
    %71 = vector.load %arg11[%c0_50, %c640] : memref<16x1024xbf16, #tpu.memory_space<vmem>>, vector<16x128xbf16>
    tpu.vector_store %arg11[%c0_50, %c640], %70 {strides = array<i32>} : memref<16x1024xbf16, #tpu.memory_space<vmem>>, vector<16x128xbf16>,
    %c12 = arith.constant 12 : index
    %c0_51 = arith.constant 0 : index
    %c0_52 = arith.constant 0 : index
    %72 = vector.load %arg3[%c12, %c0_51, %c0_52] : memref<16x16x64xbf16, #tpu.memory_space<vmem>>, vector<1x16x64xbf16>
    %73 = vector.shape_cast %72 : vector<1x16x64xbf16> to vector<16x64xbf16>
    %cst_53 = arith.constant dense<0.000000e+00> : vector<16x64xf32>
    %74 = tpu.matmul %73, %11, %cst_53 {dimension_numbers = #tpu.dot_dimension_numbers<[1], [0], [0], [1], [0, 0, 1, 1], [], []>} : vector<16x64xbf16>, vector<64x64xbf16>, vector<16x64xf32> -> vector<16x64xf32>
    %75 = arith.truncf %74 : vector<16x64xf32> to vector<16x64xbf16>
    %c13 = arith.constant 13 : index
    %c0_54 = arith.constant 0 : index
    %c0_55 = arith.constant 0 : index
    %76 = vector.load %arg3[%c13, %c0_54, %c0_55] : memref<16x16x64xbf16, #tpu.memory_space<vmem>>, vector<1x16x64xbf16>
    %77 = vector.shape_cast %76 : vector<1x16x64xbf16> to vector<16x64xbf16>
    %cst_56 = arith.constant dense<0.000000e+00> : vector<16x64xf32>
    %78 = tpu.matmul %77, %11, %cst_56 {dimension_numbers = #tpu.dot_dimension_numbers<[1], [0], [0], [1], [0, 0, 1, 1], [], []>} : vector<16x64xbf16>, vector<64x64xbf16>, vector<16x64xf32> -> vector<16x64xf32>
    %79 = arith.truncf %78 : vector<16x64xf32> to vector<16x64xbf16>
    %80 = tpu.concatenate %75, %79 in 1 : vector<16x64xbf16>, vector<16x64xbf16> -> vector<16x128xbf16>
    %c0_57 = arith.constant 0 : index
    %c768 = arith.constant 768 : index
    %81 = vector.load %arg11[%c0_57, %c768] : memref<16x1024xbf16, #tpu.memory_space<vmem>>, vector<16x128xbf16>
    tpu.vector_store %arg11[%c0_57, %c768], %80 {strides = array<i32>} : memref<16x1024xbf16, #tpu.memory_space<vmem>>, vector<16x128xbf16>,
    %c14 = arith.constant 14 : index
    %c0_58 = arith.constant 0 : index
    %c0_59 = arith.constant 0 : index
    %82 = vector.load %arg3[%c14, %c0_58, %c0_59] : memref<16x16x64xbf16, #tpu.memory_space<vmem>>, vector<1x16x64xbf16>
    %83 = vector.shape_cast %82 : vector<1x16x64xbf16> to vector<16x64xbf16>
    %cst_60 = arith.constant dense<0.000000e+00> : vector<16x64xf32>
    %84 = tpu.matmul %83, %11, %cst_60 {dimension_numbers = #tpu.dot_dimension_numbers<[1], [0], [0], [1], [0, 0, 1, 1], [], []>} : vector<16x64xbf16>, vector<64x64xbf16>, vector<16x64xf32> -> vector<16x64xf32>
    %85 = arith.truncf %84 : vector<16x64xf32> to vector<16x64xbf16>
    %c15 = arith.constant 15 : index
    %c0_61 = arith.constant 0 : index
    %c0_62 = arith.constant 0 : index
    %86 = vector.load %arg3[%c15, %c0_61, %c0_62] : memref<16x16x64xbf16, #tpu.memory_space<vmem>>, vector<1x16x64xbf16>
    %87 = vector.shape_cast %86 : vector<1x16x64xbf16> to vector<16x64xbf16>
    %cst_63 = arith.constant dense<0.000000e+00> : vector<16x64xf32>
    %88 = tpu.matmul %87, %11, %cst_63 {dimension_numbers = #tpu.dot_dimension_numbers<[1], [0], [0], [1], [0, 0, 1, 1], [], []>} : vector<16x64xbf16>, vector<64x64xbf16>, vector<16x64xf32> -> vector<16x64xf32>
    %89 = arith.truncf %88 : vector<16x64xf32> to vector<16x64xbf16>
    %90 = tpu.concatenate %85, %89 in 1 : vector<16x64xbf16>, vector<16x64xbf16> -> vector<16x128xbf16>
    %c0_64 = arith.constant 0 : index
    %c896 = arith.constant 896 : index
    %91 = vector.load %arg11[%c0_64, %c896] : memref<16x1024xbf16, #tpu.memory_space<vmem>>, vector<16x128xbf16>
    tpu.vector_store %arg11[%c0_64, %c896], %90 {strides = array<i32>} : memref<16x1024xbf16, #tpu.memory_space<vmem>>, vector<16x128xbf16>,
    %c0_65 = arith.constant 0 : index
    %c0_66 = arith.constant 0 : index
    %92 = vector.load %arg11[%c0_65, %c0_66] : memref<16x1024xbf16, #tpu.memory_space<vmem>>, vector<16x1024xbf16>
    %c0_67 = arith.constant 0 : index
    %c0_68 = arith.constant 0 : index
    %93 = vector.load %arg4[%c0_67, %c0_68] : memref<1024x128xbf16, #tpu.memory_space<vmem>>, vector<1024x128xbf16>
    %cst_69 = arith.constant dense<0.000000e+00> : vector<16x128xf32>
    %94 = tpu.matmul %92, %93, %cst_69 {dimension_numbers = #tpu.dot_dimension_numbers<[1], [0], [0], [1], [0, 0, 1, 1], [], []>} : vector<16x1024xbf16>, vector<1024x128xbf16>, vector<16x128xf32> -> vector<16x128xf32>
    %c1_70 = arith.constant 1 : index
    %c0_71 = arith.constant 0 : index
    %95 = vector.load %arg9[%c1_70, %c0_71] : memref<4x256xf32, #tpu.memory_space<vmem>>, vector<1x128xf32>
    %96 = vector.broadcast %95 : vector<1x128xf32> to vector<16x128xf32>
    %97 = arith.addf %94, %96 : vector<16x128xf32>
    %cst_72 = arith.constant 0.000000e+00 : f32
    %98 = vector.broadcast %cst_72 : f32 to vector<16x128xf32>
    %99 = arith.cmpf oge, %97, %98 : vector<16x128xf32>
    %cst_73 = arith.constant 2.000000e-01 : f32
    %100 = vector.broadcast %cst_73 : f32 to vector<16x128xf32>
    %101 = arith.mulf %100, %97 : vector<16x128xf32>
    %102 = arith.select %99, %97, %101 : vector<16x128xi1>, vector<16x128xf32>
    %103 = arith.truncf %102 : vector<16x128xf32> to vector<16x128xbf16>
    %c0_74 = arith.constant 0 : index
    %c0_75 = arith.constant 0 : index
    %c0_76 = arith.constant 0 : index
    %104 = vector.load %arg5[%c0_74, %c0_75, %c0_76] : memref<16x4x16xbf16, #tpu.memory_space<vmem>>, vector<1x4x16xbf16>
    %105 = vector.shape_cast %104 : vector<1x4x16xbf16> to vector<4x16xbf16>
    %cst_77 = arith.constant dense<0.000000e+00> : vector<4x128xf32>
    %106 = tpu.matmul %105, %103, %cst_77 {dimension_numbers = #tpu.dot_dimension_numbers<[1], [0], [0], [1], [0, 0, 1, 1], [], []>} : vector<4x16xbf16>, vector<16x128xbf16>, vector<4x128xf32> -> vector<4x128xf32>
    %107 = arith.truncf %106 : vector<4x128xf32> to vector<4x128xbf16>
    %c0_78 = arith.constant 0 : index
    %c0_79 = arith.constant 0 : index
    %108 = vector.load %arg12[%c0_78, %c0_79] : memref<4x2048xbf16, #tpu.memory_space<vmem>>, vector<4x128xbf16>
    tpu.vector_store %arg12[%c0_78, %c0_79], %107 {strides = array<i32>} : memref<4x2048xbf16, #tpu.memory_space<vmem>>, vector<4x128xbf16>,
    %c1_80 = arith.constant 1 : index
    %c0_81 = arith.constant 0 : index
    %c0_82 = arith.constant 0 : index
    %109 = vector.load %arg5[%c1_80, %c0_81, %c0_82] : memref<16x4x16xbf16, #tpu.memory_space<vmem>>, vector<1x4x16xbf16>
    %110 = vector.shape_cast %109 : vector<1x4x16xbf16> to vector<4x16xbf16>
    %cst_83 = arith.constant dense<0.000000e+00> : vector<4x128xf32>
    %111 = tpu.matmul %110, %103, %cst_83 {dimension_numbers = #tpu.dot_dimension_numbers<[1], [0], [0], [1], [0, 0, 1, 1], [], []>} : vector<4x16xbf16>, vector<16x128xbf16>, vector<4x128xf32> -> vector<4x128xf32>
    %112 = arith.truncf %111 : vector<4x128xf32> to vector<4x128xbf16>
    %c0_84 = arith.constant 0 : index
    %c128_85 = arith.constant 128 : index
    %113 = vector.load %arg12[%c0_84, %c128_85] : memref<4x2048xbf16, #tpu.memory_space<vmem>>, vector<4x128xbf16>
    tpu.vector_store %arg12[%c0_84, %c128_85], %112 {strides = array<i32>} : memref<4x2048xbf16, #tpu.memory_space<vmem>>, vector<4x128xbf16>,
    %c2_86 = arith.constant 2 : index
    %c0_87 = arith.constant 0 : index
    %c0_88 = arith.constant 0 : index
    %114 = vector.load %arg5[%c2_86, %c0_87, %c0_88] : memref<16x4x16xbf16, #tpu.memory_space<vmem>>, vector<1x4x16xbf16>
    %115 = vector.shape_cast %114 : vector<1x4x16xbf16> to vector<4x16xbf16>
    %cst_89 = arith.constant dense<0.000000e+00> : vector<4x128xf32>
    %116 = tpu.matmul %115, %103, %cst_89 {dimension_numbers = #tpu.dot_dimension_numbers<[1], [0], [0], [1], [0, 0, 1, 1], [], []>} : vector<4x16xbf16>, vector<16x128xbf16>, vector<4x128xf32> -> vector<4x128xf32>
    %117 = arith.truncf %116 : vector<4x128xf32> to vector<4x128xbf16>
    %c0_90 = arith.constant 0 : index
    %c256_91 = arith.constant 256 : index
    %118 = vector.load %arg12[%c0_90, %c256_91] : memref<4x2048xbf16, #tpu.memory_space<vmem>>, vector<4x128xbf16>
    tpu.vector_store %arg12[%c0_90, %c256_91], %117 {strides = array<i32>} : memref<4x2048xbf16, #tpu.memory_space<vmem>>, vector<4x128xbf16>,
    %c3_92 = arith.constant 3 : index
    %c0_93 = arith.constant 0 : index
    %c0_94 = arith.constant 0 : index
    %119 = vector.load %arg5[%c3_92, %c0_93, %c0_94] : memref<16x4x16xbf16, #tpu.memory_space<vmem>>, vector<1x4x16xbf16>
    %120 = vector.shape_cast %119 : vector<1x4x16xbf16> to vector<4x16xbf16>
    %cst_95 = arith.constant dense<0.000000e+00> : vector<4x128xf32>
    %121 = tpu.matmul %120, %103, %cst_95 {dimension_numbers = #tpu.dot_dimension_numbers<[1], [0], [0], [1], [0, 0, 1, 1], [], []>} : vector<4x16xbf16>, vector<16x128xbf16>, vector<4x128xf32> -> vector<4x128xf32>
    %122 = arith.truncf %121 : vector<4x128xf32> to vector<4x128xbf16>
    %c0_96 = arith.constant 0 : index
    %c384_97 = arith.constant 384 : index
    %123 = vector.load %arg12[%c0_96, %c384_97] : memref<4x2048xbf16, #tpu.memory_space<vmem>>, vector<4x128xbf16>
    tpu.vector_store %arg12[%c0_96, %c384_97], %122 {strides = array<i32>} : memref<4x2048xbf16, #tpu.memory_space<vmem>>, vector<4x128xbf16>,
    %c4_98 = arith.constant 4 : index
    %c0_99 = arith.constant 0 : index
    %c0_100 = arith.constant 0 : index
    %124 = vector.load %arg5[%c4_98, %c0_99, %c0_100] : memref<16x4x16xbf16, #tpu.memory_space<vmem>>, vector<1x4x16xbf16>
    %125 = vector.shape_cast %124 : vector<1x4x16xbf16> to vector<4x16xbf16>
    %cst_101 = arith.constant dense<0.000000e+00> : vector<4x128xf32>
    %126 = tpu.matmul %125, %103, %cst_101 {dimension_numbers = #tpu.dot_dimension_numbers<[1], [0], [0], [1], [0, 0, 1, 1], [], []>} : vector<4x16xbf16>, vector<16x128xbf16>, vector<4x128xf32> -> vector<4x128xf32>
    %127 = arith.truncf %126 : vector<4x128xf32> to vector<4x128xbf16>
    %c0_102 = arith.constant 0 : index
    %c512_103 = arith.constant 512 : index
    %128 = vector.load %arg12[%c0_102, %c512_103] : memref<4x2048xbf16, #tpu.memory_space<vmem>>, vector<4x128xbf16>
    tpu.vector_store %arg12[%c0_102, %c512_103], %127 {strides = array<i32>} : memref<4x2048xbf16, #tpu.memory_space<vmem>>, vector<4x128xbf16>,
    %c5_104 = arith.constant 5 : index
    %c0_105 = arith.constant 0 : index
    %c0_106 = arith.constant 0 : index
    %129 = vector.load %arg5[%c5_104, %c0_105, %c0_106] : memref<16x4x16xbf16, #tpu.memory_space<vmem>>, vector<1x4x16xbf16>
    %130 = vector.shape_cast %129 : vector<1x4x16xbf16> to vector<4x16xbf16>
    %cst_107 = arith.constant dense<0.000000e+00> : vector<4x128xf32>
    %131 = tpu.matmul %130, %103, %cst_107 {dimension_numbers = #tpu.dot_dimension_numbers<[1], [0], [0], [1], [0, 0, 1, 1], [], []>} : vector<4x16xbf16>, vector<16x128xbf16>, vector<4x128xf32> -> vector<4x128xf32>
    %132 = arith.truncf %131 : vector<4x128xf32> to vector<4x128xbf16>
    %c0_108 = arith.constant 0 : index
    %c640_109 = arith.constant 640 : index
    %133 = vector.load %arg12[%c0_108, %c640_109] : memref<4x2048xbf16, #tpu.memory_space<vmem>>, vector<4x128xbf16>
    tpu.vector_store %arg12[%c0_108, %c640_109], %132 {strides = array<i32>} : memref<4x2048xbf16, #tpu.memory_space<vmem>>, vector<4x128xbf16>,
    %c6_110 = arith.constant 6 : index
    %c0_111 = arith.constant 0 : index
    %c0_112 = arith.constant 0 : index
    %134 = vector.load %arg5[%c6_110, %c0_111, %c0_112] : memref<16x4x16xbf16, #tpu.memory_space<vmem>>, vector<1x4x16xbf16>
    %135 = vector.shape_cast %134 : vector<1x4x16xbf16> to vector<4x16xbf16>
    %cst_113 = arith.constant dense<0.000000e+00> : vector<4x128xf32>
    %136 = tpu.matmul %135, %103, %cst_113 {dimension_numbers = #tpu.dot_dimension_numbers<[1], [0], [0], [1], [0, 0, 1, 1], [], []>} : vector<4x16xbf16>, vector<16x128xbf16>, vector<4x128xf32> -> vector<4x128xf32>
    %137 = arith.truncf %136 : vector<4x128xf32> to vector<4x128xbf16>
    %c0_114 = arith.constant 0 : index
    %c768_115 = arith.constant 768 : index
    %138 = vector.load %arg12[%c0_114, %c768_115] : memref<4x2048xbf16, #tpu.memory_space<vmem>>, vector<4x128xbf16>
    tpu.vector_store %arg12[%c0_114, %c768_115], %137 {strides = array<i32>} : memref<4x2048xbf16, #tpu.memory_space<vmem>>, vector<4x128xbf16>,
    %c7_116 = arith.constant 7 : index
    %c0_117 = arith.constant 0 : index
    %c0_118 = arith.constant 0 : index
    %139 = vector.load %arg5[%c7_116, %c0_117, %c0_118] : memref<16x4x16xbf16, #tpu.memory_space<vmem>>, vector<1x4x16xbf16>
    %140 = vector.shape_cast %139 : vector<1x4x16xbf16> to vector<4x16xbf16>
    %cst_119 = arith.constant dense<0.000000e+00> : vector<4x128xf32>
    %141 = tpu.matmul %140, %103, %cst_119 {dimension_numbers = #tpu.dot_dimension_numbers<[1], [0], [0], [1], [0, 0, 1, 1], [], []>} : vector<4x16xbf16>, vector<16x128xbf16>, vector<4x128xf32> -> vector<4x128xf32>
    %142 = arith.truncf %141 : vector<4x128xf32> to vector<4x128xbf16>
    %c0_120 = arith.constant 0 : index
    %c896_121 = arith.constant 896 : index
    %143 = vector.load %arg12[%c0_120, %c896_121] : memref<4x2048xbf16, #tpu.memory_space<vmem>>, vector<4x128xbf16>
    tpu.vector_store %arg12[%c0_120, %c896_121], %142 {strides = array<i32>} : memref<4x2048xbf16, #tpu.memory_space<vmem>>, vector<4x128xbf16>,
    %c8_122 = arith.constant 8 : index
    %c0_123 = arith.constant 0 : index
    %c0_124 = arith.constant 0 : index
    %144 = vector.load %arg5[%c8_122, %c0_123, %c0_124] : memref<16x4x16xbf16, #tpu.memory_space<vmem>>, vector<1x4x16xbf16>
    %145 = vector.shape_cast %144 : vector<1x4x16xbf16> to vector<4x16xbf16>
    %cst_125 = arith.constant dense<0.000000e+00> : vector<4x128xf32>
    %146 = tpu.matmul %145, %103, %cst_125 {dimension_numbers = #tpu.dot_dimension_numbers<[1], [0], [0], [1], [0, 0, 1, 1], [], []>} : vector<4x16xbf16>, vector<16x128xbf16>, vector<4x128xf32> -> vector<4x128xf32>
    %147 = arith.truncf %146 : vector<4x128xf32> to vector<4x128xbf16>
    %c0_126 = arith.constant 0 : index
    %c1024 = arith.constant 1024 : index
    %148 = vector.load %arg12[%c0_126, %c1024] : memref<4x2048xbf16, #tpu.memory_space<vmem>>, vector<4x128xbf16>
    tpu.vector_store %arg12[%c0_126, %c1024], %147 {strides = array<i32>} : memref<4x2048xbf16, #tpu.memory_space<vmem>>, vector<4x128xbf16>,
    %c9_127 = arith.constant 9 : index
    %c0_128 = arith.constant 0 : index
    %c0_129 = arith.constant 0 : index
    %149 = vector.load %arg5[%c9_127, %c0_128, %c0_129] : memref<16x4x16xbf16, #tpu.memory_space<vmem>>, vector<1x4x16xbf16>
    %150 = vector.shape_cast %149 : vector<1x4x16xbf16> to vector<4x16xbf16>
    %cst_130 = arith.constant dense<0.000000e+00> : vector<4x128xf32>
    %151 = tpu.matmul %150, %103, %cst_130 {dimension_numbers = #tpu.dot_dimension_numbers<[1], [0], [0], [1], [0, 0, 1, 1], [], []>} : vector<4x16xbf16>, vector<16x128xbf16>, vector<4x128xf32> -> vector<4x128xf32>
    %152 = arith.truncf %151 : vector<4x128xf32> to vector<4x128xbf16>
    %c0_131 = arith.constant 0 : index
    %c1152 = arith.constant 1152 : index
    %153 = vector.load %arg12[%c0_131, %c1152] : memref<4x2048xbf16, #tpu.memory_space<vmem>>, vector<4x128xbf16>
    tpu.vector_store %arg12[%c0_131, %c1152], %152 {strides = array<i32>} : memref<4x2048xbf16, #tpu.memory_space<vmem>>, vector<4x128xbf16>,
    %c10_132 = arith.constant 10 : index
    %c0_133 = arith.constant 0 : index
    %c0_134 = arith.constant 0 : index
    %154 = vector.load %arg5[%c10_132, %c0_133, %c0_134] : memref<16x4x16xbf16, #tpu.memory_space<vmem>>, vector<1x4x16xbf16>
    %155 = vector.shape_cast %154 : vector<1x4x16xbf16> to vector<4x16xbf16>
    %cst_135 = arith.constant dense<0.000000e+00> : vector<4x128xf32>
    %156 = tpu.matmul %155, %103, %cst_135 {dimension_numbers = #tpu.dot_dimension_numbers<[1], [0], [0], [1], [0, 0, 1, 1], [], []>} : vector<4x16xbf16>, vector<16x128xbf16>, vector<4x128xf32> -> vector<4x128xf32>
    %157 = arith.truncf %156 : vector<4x128xf32> to vector<4x128xbf16>
    %c0_136 = arith.constant 0 : index
    %c1280 = arith.constant 1280 : index
    %158 = vector.load %arg12[%c0_136, %c1280] : memref<4x2048xbf16, #tpu.memory_space<vmem>>, vector<4x128xbf16>
    tpu.vector_store %arg12[%c0_136, %c1280], %157 {strides = array<i32>} : memref<4x2048xbf16, #tpu.memory_space<vmem>>, vector<4x128xbf16>,
    %c11_137 = arith.constant 11 : index
    %c0_138 = arith.constant 0 : index
    %c0_139 = arith.constant 0 : index
    %159 = vector.load %arg5[%c11_137, %c0_138, %c0_139] : memref<16x4x16xbf16, #tpu.memory_space<vmem>>, vector<1x4x16xbf16>
    %160 = vector.shape_cast %159 : vector<1x4x16xbf16> to vector<4x16xbf16>
    %cst_140 = arith.constant dense<0.000000e+00> : vector<4x128xf32>
    %161 = tpu.matmul %160, %103, %cst_140 {dimension_numbers = #tpu.dot_dimension_numbers<[1], [0], [0], [1], [0, 0, 1, 1], [], []>} : vector<4x16xbf16>, vector<16x128xbf16>, vector<4x128xf32> -> vector<4x128xf32>
    %162 = arith.truncf %161 : vector<4x128xf32> to vector<4x128xbf16>
    %c0_141 = arith.constant 0 : index
    %c1408 = arith.constant 1408 : index
    %163 = vector.load %arg12[%c0_141, %c1408] : memref<4x2048xbf16, #tpu.memory_space<vmem>>, vector<4x128xbf16>
    tpu.vector_store %arg12[%c0_141, %c1408], %162 {strides = array<i32>} : memref<4x2048xbf16, #tpu.memory_space<vmem>>, vector<4x128xbf16>,
    %c12_142 = arith.constant 12 : index
    %c0_143 = arith.constant 0 : index
    %c0_144 = arith.constant 0 : index
    %164 = vector.load %arg5[%c12_142, %c0_143, %c0_144] : memref<16x4x16xbf16, #tpu.memory_space<vmem>>, vector<1x4x16xbf16>
    %165 = vector.shape_cast %164 : vector<1x4x16xbf16> to vector<4x16xbf16>
    %cst_145 = arith.constant dense<0.000000e+00> : vector<4x128xf32>
    %166 = tpu.matmul %165, %103, %cst_145 {dimension_numbers = #tpu.dot_dimension_numbers<[1], [0], [0], [1], [0, 0, 1, 1], [], []>} : vector<4x16xbf16>, vector<16x128xbf16>, vector<4x128xf32> -> vector<4x128xf32>
    %167 = arith.truncf %166 : vector<4x128xf32> to vector<4x128xbf16>
    %c0_146 = arith.constant 0 : index
    %c1536 = arith.constant 1536 : index
    %168 = vector.load %arg12[%c0_146, %c1536] : memref<4x2048xbf16, #tpu.memory_space<vmem>>, vector<4x128xbf16>
    tpu.vector_store %arg12[%c0_146, %c1536], %167 {strides = array<i32>} : memref<4x2048xbf16, #tpu.memory_space<vmem>>, vector<4x128xbf16>,
    %c13_147 = arith.constant 13 : index
    %c0_148 = arith.constant 0 : index
    %c0_149 = arith.constant 0 : index
    %169 = vector.load %arg5[%c13_147, %c0_148, %c0_149] : memref<16x4x16xbf16, #tpu.memory_space<vmem>>, vector<1x4x16xbf16>
    %170 = vector.shape_cast %169 : vector<1x4x16xbf16> to vector<4x16xbf16>
    %cst_150 = arith.constant dense<0.000000e+00> : vector<4x128xf32>
    %171 = tpu.matmul %170, %103, %cst_150 {dimension_numbers = #tpu.dot_dimension_numbers<[1], [0], [0], [1], [0, 0, 1, 1], [], []>} : vector<4x16xbf16>, vector<16x128xbf16>, vector<4x128xf32> -> vector<4x128xf32>
    %172 = arith.truncf %171 : vector<4x128xf32> to vector<4x128xbf16>
    %c0_151 = arith.constant 0 : index
    %c1664 = arith.constant 1664 : index
    %173 = vector.load %arg12[%c0_151, %c1664] : memref<4x2048xbf16, #tpu.memory_space<vmem>>, vector<4x128xbf16>
    tpu.vector_store %arg12[%c0_151, %c1664], %172 {strides = array<i32>} : memref<4x2048xbf16, #tpu.memory_space<vmem>>, vector<4x128xbf16>,
    %c14_152 = arith.constant 14 : index
    %c0_153 = arith.constant 0 : index
    %c0_154 = arith.constant 0 : index
    %174 = vector.load %arg5[%c14_152, %c0_153, %c0_154] : memref<16x4x16xbf16, #tpu.memory_space<vmem>>, vector<1x4x16xbf16>
    %175 = vector.shape_cast %174 : vector<1x4x16xbf16> to vector<4x16xbf16>
    %cst_155 = arith.constant dense<0.000000e+00> : vector<4x128xf32>
    %176 = tpu.matmul %175, %103, %cst_155 {dimension_numbers = #tpu.dot_dimension_numbers<[1], [0], [0], [1], [0, 0, 1, 1], [], []>} : vector<4x16xbf16>, vector<16x128xbf16>, vector<4x128xf32> -> vector<4x128xf32>
    %177 = arith.truncf %176 : vector<4x128xf32> to vector<4x128xbf16>
    %c0_156 = arith.constant 0 : index
    %c1792 = arith.constant 1792 : index
    %178 = vector.load %arg12[%c0_156, %c1792] : memref<4x2048xbf16, #tpu.memory_space<vmem>>, vector<4x128xbf16>
    tpu.vector_store %arg12[%c0_156, %c1792], %177 {strides = array<i32>} : memref<4x2048xbf16, #tpu.memory_space<vmem>>, vector<4x128xbf16>,
    %c15_157 = arith.constant 15 : index
    %c0_158 = arith.constant 0 : index
    %c0_159 = arith.constant 0 : index
    %179 = vector.load %arg5[%c15_157, %c0_158, %c0_159] : memref<16x4x16xbf16, #tpu.memory_space<vmem>>, vector<1x4x16xbf16>
    %180 = vector.shape_cast %179 : vector<1x4x16xbf16> to vector<4x16xbf16>
    %cst_160 = arith.constant dense<0.000000e+00> : vector<4x128xf32>
    %181 = tpu.matmul %180, %103, %cst_160 {dimension_numbers = #tpu.dot_dimension_numbers<[1], [0], [0], [1], [0, 0, 1, 1], [], []>} : vector<4x16xbf16>, vector<16x128xbf16>, vector<4x128xf32> -> vector<4x128xf32>
    %182 = arith.truncf %181 : vector<4x128xf32> to vector<4x128xbf16>
    %c0_161 = arith.constant 0 : index
    %c1920 = arith.constant 1920 : index
    %183 = vector.load %arg12[%c0_161, %c1920] : memref<4x2048xbf16, #tpu.memory_space<vmem>>, vector<4x128xbf16>
    tpu.vector_store %arg12[%c0_161, %c1920], %182 {strides = array<i32>} : memref<4x2048xbf16, #tpu.memory_space<vmem>>, vector<4x128xbf16>,
    %c0_162 = arith.constant 0 : index
    %c0_163 = arith.constant 0 : index
    %184 = vector.load %arg12[%c0_162, %c0_163] : memref<4x2048xbf16, #tpu.memory_space<vmem>>, vector<4x2048xbf16>
    %c0_164 = arith.constant 0 : index
    %c0_165 = arith.constant 0 : index
    %185 = vector.load %arg6[%c0_164, %c0_165] : memref<2048x256xbf16, #tpu.memory_space<vmem>>, vector<2048x256xbf16>
    %cst_166 = arith.constant dense<0.000000e+00> : vector<4x256xf32>
    %186 = tpu.matmul %184, %185, %cst_166 {dimension_numbers = #tpu.dot_dimension_numbers<[1], [0], [0], [1], [0, 0, 1, 1], [], []>} : vector<4x2048xbf16>, vector<2048x256xbf16>, vector<4x256xf32> -> vector<4x256xf32>
    %c2_167 = arith.constant 2 : index
    %c0_168 = arith.constant 0 : index
    %187 = vector.load %arg9[%c2_167, %c0_168] : memref<4x256xf32, #tpu.memory_space<vmem>>, vector<1x256xf32>
    %188 = vector.broadcast %187 : vector<1x256xf32> to vector<4x256xf32>
    %189 = arith.addf %186, %188 : vector<4x256xf32>
    %cst_169 = arith.constant 0.000000e+00 : f32
    %190 = vector.broadcast %cst_169 : f32 to vector<4x256xf32>
    %191 = arith.cmpf oge, %189, %190 : vector<4x256xf32>
    %cst_170 = arith.constant 2.000000e-01 : f32
    %192 = vector.broadcast %cst_170 : f32 to vector<4x256xf32>
    %193 = arith.mulf %192, %189 : vector<4x256xf32>
    %194 = arith.select %191, %189, %193 : vector<4x256xi1>, vector<4x256xf32>
    %195 = arith.truncf %194 : vector<4x256xf32> to vector<4x256xbf16>
    %c0_171 = arith.constant 0 : index
    %c0_172 = arith.constant 0 : index
    %c0_173 = arith.constant 0 : index
    %196 = vector.load %arg7[%c0_171, %c0_172, %c0_173] : memref<4x1x4xbf16, #tpu.memory_space<vmem>>, vector<1x1x4xbf16>
    %197 = vector.shape_cast %196 : vector<1x1x4xbf16> to vector<1x4xbf16>
    %cst_174 = arith.constant dense<0.000000e+00> : vector<1x256xf32>
    %198 = tpu.matmul %197, %195, %cst_174 {dimension_numbers = #tpu.dot_dimension_numbers<[1], [0], [0], [1], [0, 0, 1, 1], [], []>} : vector<1x4xbf16>, vector<4x256xbf16>, vector<1x256xf32> -> vector<1x256xf32>
    %c1_175 = arith.constant 1 : index
    %c0_176 = arith.constant 0 : index
    %c0_177 = arith.constant 0 : index
    %199 = vector.load %arg7[%c1_175, %c0_176, %c0_177] : memref<4x1x4xbf16, #tpu.memory_space<vmem>>, vector<1x1x4xbf16>
    %200 = vector.shape_cast %199 : vector<1x1x4xbf16> to vector<1x4xbf16>
    %cst_178 = arith.constant dense<0.000000e+00> : vector<1x256xf32>
    %201 = tpu.matmul %200, %195, %cst_178 {dimension_numbers = #tpu.dot_dimension_numbers<[1], [0], [0], [1], [0, 0, 1, 1], [], []>} : vector<1x4xbf16>, vector<4x256xbf16>, vector<1x256xf32> -> vector<1x256xf32>
    %c2_179 = arith.constant 2 : index
    %c0_180 = arith.constant 0 : index
    %c0_181 = arith.constant 0 : index
    %202 = vector.load %arg7[%c2_179, %c0_180, %c0_181] : memref<4x1x4xbf16, #tpu.memory_space<vmem>>, vector<1x1x4xbf16>
    %203 = vector.shape_cast %202 : vector<1x1x4xbf16> to vector<1x4xbf16>
    %cst_182 = arith.constant dense<0.000000e+00> : vector<1x256xf32>
    %204 = tpu.matmul %203, %195, %cst_182 {dimension_numbers = #tpu.dot_dimension_numbers<[1], [0], [0], [1], [0, 0, 1, 1], [], []>} : vector<1x4xbf16>, vector<4x256xbf16>, vector<1x256xf32> -> vector<1x256xf32>
    %c3_183 = arith.constant 3 : index
    %c0_184 = arith.constant 0 : index
    %c0_185 = arith.constant 0 : index
    %205 = vector.load %arg7[%c3_183, %c0_184, %c0_185] : memref<4x1x4xbf16, #tpu.memory_space<vmem>>, vector<1x1x4xbf16>
    %206 = vector.shape_cast %205 : vector<1x1x4xbf16> to vector<1x4xbf16>
    %cst_186 = arith.constant dense<0.000000e+00> : vector<1x256xf32>
    %207 = tpu.matmul %206, %195, %cst_186 {dimension_numbers = #tpu.dot_dimension_numbers<[1], [0], [0], [1], [0, 0, 1, 1], [], []>} : vector<1x4xbf16>, vector<4x256xbf16>, vector<1x256xf32> -> vector<1x256xf32>
    %208 = tpu.concatenate %198, %201, %204, %207 in 1 : vector<1x256xf32>, vector<1x256xf32>, vector<1x256xf32>, vector<1x256xf32> -> vector<1x1024xf32>
    %c0_187 = arith.constant 0 : index
    %c0_188 = arith.constant 0 : index
    %209 = vector.load %arg8[%c0_187, %c0_188] : memref<1x1024xf32, #tpu.memory_space<vmem>>, vector<1x1024xf32>
    %210 = arith.mulf %208, %209 : vector<1x1024xf32>
    %cst_189 = arith.constant dense<0.000000e+00> : vector<1xf32>
    %211 = vector.multi_reduction <add>, %210, %cst_189 [1] : vector<1x1024xf32> to vector<1xf32>
    %212 = vector.shape_cast %211 : vector<1xf32> to vector<1x1xf32>
    %c3_190 = arith.constant 3 : index
    %c0_191 = arith.constant 0 : index
    %213 = vector.load %arg9[%c3_190, %c0_191] : memref<4x256xf32, #tpu.memory_space<vmem>>, vector<1x1xf32>
    %214 = arith.addf %212, %213 : vector<1x1xf32>
    %215 = vector.shape_cast %214 : vector<1x1xf32> to vector<1x1x1xf32>
    %c0_192 = arith.constant 0 : index
    %c0_193 = arith.constant 0 : index
    %c0_194 = arith.constant 0 : index
    %216 = vector.load %arg10[%c0_192, %c0_193, %c0_194] : memref<1x1x1xf32, #tpu.memory_space<vmem>>, vector<1x1x1xf32>
    tpu.vector_store %arg10[%c0_192, %c0_193, %c0_194], %215 {strides = array<i32>} : memref<1x1x1xf32, #tpu.memory_space<vmem>>, vector<1x1x1xf32>,
    return
  }
  func.func @transform_0(%arg0: i32) -> (i32, i32) {
    %c0_i32 = arith.constant 0 : i32
    %c0_i32_0 = arith.constant 0 : i32
    return %arg0, %c0_i32 : i32, i32
  }
  func.func @transform_1(%arg0: i32) -> (i32, i32) {
    %c0_i32 = arith.constant 0 : i32
    %c0_i32_0 = arith.constant 0 : i32
    %c0_i32_1 = arith.constant 0 : i32
    return %c0_i32, %c0_i32_0 : i32, i32
  }
  func.func @transform_2(%arg0: i32) -> (i32, i32, i32) {
    %c0_i32 = arith.constant 0 : i32
    %c0_i32_0 = arith.constant 0 : i32
    %c0_i32_1 = arith.constant 0 : i32
    %c0_i32_2 = arith.constant 0 : i32
    return %c0_i32, %c0_i32_0, %c0_i32_1 : i32, i32, i32
  }
  func.func @transform_3(%arg0: i32) -> (i32, i32) {
    %c0_i32 = arith.constant 0 : i32
    %c0_i32_0 = arith.constant 0 : i32
    %c0_i32_1 = arith.constant 0 : i32
    return %c0_i32, %c0_i32_0 : i32, i32
  }
  func.func @transform_4(%arg0: i32) -> (i32, i32, i32) {
    %c0_i32 = arith.constant 0 : i32
    %c0_i32_0 = arith.constant 0 : i32
    %c0_i32_1 = arith.constant 0 : i32
    %c0_i32_2 = arith.constant 0 : i32
    return %c0_i32, %c0_i32_0, %c0_i32_1 : i32, i32, i32
  }
  func.func @transform_5(%arg0: i32) -> (i32, i32) {
    %c0_i32 = arith.constant 0 : i32
    %c0_i32_0 = arith.constant 0 : i32
    %c0_i32_1 = arith.constant 0 : i32
    return %c0_i32, %c0_i32_0 : i32, i32
  }
  func.func @transform_6(%arg0: i32) -> (i32, i32, i32) {
    %c0_i32 = arith.constant 0 : i32
    %c0_i32_0 = arith.constant 0 : i32
    %c0_i32_1 = arith.constant 0 : i32
    %c0_i32_2 = arith.constant 0 : i32
    return %c0_i32, %c0_i32_0, %c0_i32_1 : i32, i32, i32
  }
  func.func @transform_7(%arg0: i32) -> (i32, i32) {
    %c0_i32 = arith.constant 0 : i32
    %c0_i32_0 = arith.constant 0 : i32
    %c0_i32_1 = arith.constant 0 : i32
    return %c0_i32, %c0_i32_0 : i32, i32
  }
  func.func @transform_8(%arg0: i32) -> (i32, i32) {
    %c0_i32 = arith.constant 0 : i32
    %c0_i32_0 = arith.constant 0 : i32
    %c0_i32_1 = arith.constant 0 : i32
    return %c0_i32, %c0_i32_0 : i32, i32
  }
  func.func @transform_9(%arg0: i32) -> (i32, i32, i32) {
    %c0_i32 = arith.constant 0 : i32
    %c0_i32_0 = arith.constant 0 : i32
    %c0_i32_1 = arith.constant 0 : i32
    return %arg0, %c0_i32, %c0_i32_0 : i32, i32, i32
  }
}

</mosaic_0001>

<bundles_post_ra>
// kernel: forward.1
= control target key start
LH: loop header
LB: loop body
LE: loop exit
PB: predicated region body
PF: predicated region fallthrough
CT: control target
= control target key end

     0   :  { %14 = vsyncpa [#allocation5], 0  ;;  %s7088_s0 = inlined_call_operand.vmem [shape: bf16[128,16], index: 0, kind: input, shape index: {}]   ;;  %s7089_s1 = inlined_call_operand.hbm [shape: bf16[16,64], index: 1, kind: input, shape index: {}]   ;;  %s7090_s2 = inlined_call_operand.hbm [shape: bf16[16,16,64], index: 2, kind: input, shape index: {}]   ;;  %s7091_s3 = inlined_call_operand.vmem [shape: bf16[1024,128], index: 3, kind: input, shape index: {}]   ;;  %s7092_s4 = inlined_call_operand.vmem [shape: bf16[16,4,16], index: 4, kind: input, shape index: {}]   ;;  %s7093_s5 = inlined_call_operand.hbm [shape: bf16[2048,256], index: 5, kind: input, shape index: {}]   ;;  %s7094_s6 = inlined_call_operand.vmem [shape: bf16[4,1,4], index: 6, kind: input, shape index: {}]   ;;  %s7095_s7 = inlined_call_operand.hbm [shape: f32[1,1024], index: 7, kind: input, shape index: {}]   ;;  %s7096_s8 = inlined_call_operand.vmem [shape: f32[4,256], index: 8, kind: input, shape index: {}]   ;;  %s7097_s9 = inlined_call_operand.vmem [shape: f32[2,1,1], index: 9, kind: output, shape index: {}]  }
   0x1   :  { %15 = vsyncpa [#allocation7], 0 }
   0x2   :  { %16 = vsyncpa [#allocation10], 0  ;;  %s6496_s30 = smov 0  }
   0x3 LB: > { %s6502_s10 = sadd.s32 4294967295, %s6435_s30   ;;  %p4410_p0 = scmp.ge.s32.totalorder %s6435_s30, 1  ;;  %s6435_s30 = sphi %s6496_s30, %s22_s30  }
   0x4   : > { %p247_p1 = scmp.lt.s32.totalorder %s6435_s30, 3  ;;  %p6262_p2 = scmp.eq.s32.totalorder %s6502_s10, 0 }
   0x5   : > { %s272_s13 = sshll.u32 %s7090_s2, 4  ;;  %s258_s17 = sshll.u32 %s7089_s1, 4  ;;  %s273_s13 = int_to_ptr.hbm [resolvable:$true] %s272_s13  ;;  %s259_s17 = int_to_ptr.hbm [resolvable:$true] %s258_s17 }
   0x6   : > { %p6510_p3 = pnand %p4410_p0, %p247_p1  ;;  %s6437_s18 = smov [#allocation6]  }
   0x7   : > { %s274_s19 = sshll.u32 %s6437_s18, 4  ;;  %s6438_s21 = smov [#allocation4]   ;;  %s275_s19 = int_to_ptr.vmem [resolvable:$true] %s274_s19 }
   0x8   : > { %p6249_p4 = pneg %p6510_p3  ;;  %s260_s22 = sshll.u32 %s6438_s21, 4  ;;  %s261_s22 = int_to_ptr.vmem [resolvable:$true] %s260_s22 }
   0x9   : > { %s292_s25 = sshll.u32 %s7093_s5, 4  ;;  %s6439_s26 = smov 64   ;;  %s293_s25 = int_to_ptr.hbm [resolvable:$true] %s292_s25 }
   0xa   : > { %p6521_p5 = pnand %p6262_p2, %p6249_p4  ;;  %s6440_s27 = smov 4  }
   0xb   : > { %s6441_s28 = smov [#allocation8]   ;;  %s6442_s11 = smov 128  }
   0xc   : > { %6255 = dma.hbm_to_vmem [thread:$0]  (!%p6521_p5), %s273_s13, 2048, %s275_s19, [#allocation7], %s6439_s26, %s6439_s26, %s6440_s27  }
   0xd   : > { %6252 = dma.hbm_to_vmem [thread:$0]  (!%p6521_p5), %s259_s17, 128, %s261_s22, [#allocation5], %s6439_s26, %s6439_s26, %s6440_s27  }
   0xe   : > { %s294_s29 = sshll.u32 %s6441_s28, 4  ;;  %s6443_s12 = smov 8   ;;  %s295_s29 = int_to_ptr.vmem [resolvable:$true] %s294_s29 }
   0xf   : > { %6258 = dma.hbm_to_vmem [thread:$0]  (!%p6521_p5), %s293_s25, 32768, %s295_s29, [#allocation7], %s6442_s11, %s6442_s11, %s6443_s12  }
  0x10   : > { %s310_s18 = sshll.u32 %s7095_s7, 4  ;;  %s6444_s21 = smov [#allocation9]   ;;  %s311_s18 = int_to_ptr.hbm [resolvable:$true] %s310_s18 }
  0x11   : > { %s312_s23 = sshll.u32 %s6444_s21, 4  ;;  %337 = sbr.rel (%p6510_p3) target bundleno = 1497 (0x5d9), region = 56  ;;  %s313_s23 = int_to_ptr.vmem [resolvable:$true] %s312_s23 }
  0x12   : > { %6261 = dma.hbm_to_vmem [thread:$0]  (!%p6521_p5), %s311_s18, 128, %s313_s23, [#allocation10]  }
  0x16   : > { %6422 = dma.done.wait (%p6262_p2), [#allocation5], 128  }
  0x17   : > { %6424 = vsyncadd (%p6262_p2), [#allocation5], 4294967168 }
  0x18   : > { %6426 = dma.done.wait (%p6262_p2), [#allocation7], 34816  }
  0x19   : > { %6428 = vsyncadd (%p6262_p2), [#allocation7], 4294932480 }
  0x1a   : > { %6430 = dma.done.wait (%p6262_p2), [#allocation10], 128  }
  0x1b   : > { %6432 = vsyncadd (%p6262_p2), [#allocation10], 4294967168  ;;  %s4421_s13 = sshll.u32 %s6502_s10, 3  ;;  %v5888_v0 = vld [vmem:[#allocation4] sm:$0xff]  ;;  %vm435_vm0 = vcmask 130048   ;;  %v5889_v42 = vld [vmem:[#allocation6] sm:$0xff] }
  0x1c   : > { %p388_p6 = scmp.lt.s32.totalorder %s4421_s13, 15  ;;  %455 = vmatpush.bf16.msra.mxu0 %v5888_v0  ;;  %v6287_v12 = vld [vmem:[%s7096_s8] ss:$0 sm:$0xff]  ;;  %vm512_vm9 = vcmask 523264   ;;  %v5890_v43 = vld [vmem:[#allocation6 + $0x8] sm:$0xff]  ;;  %v5892_v45 = vld [vmem:[#allocation6 + $0x18] sm:$0xff] }
  0x1d   : > { %v5891_v44 = vld [vmem:[#allocation6 + $0x10] sm:$0xff]  ;;  %v5893_v46 = vld [vmem:[#allocation6 + $0x20] sm:$0xff]  ;;  %v5894_v47 = vld [vmem:[#allocation6 + $0x28] sm:$0xff]  ;;  %s6445_s25 = smov 64   ;;  %vm4146_vm13 = vcmask 1041408   ;;  %vm4142_vm14 = vcmask 31744  }
  0x1e   : > { %s7101_s13 = smov (!%p388_p6, %s4421_s13), 15  ;;  %v5895_v48 = vld [vmem:[#allocation6 + $0x30] sm:$0xff]  ;;  %v5896_v49 = vld [vmem:[#allocation6 + $0x38] sm:$0xff]  ;;  %v5897_v50 = vld [vmem:[#allocation6 + $0x40] sm:$0xff]  ;;  %p393_p7 = scmp.lt.s32.totalorder %s6502_s10, 1 }
  0x1f   : > { %s4422_s14 = sshll.u32 %s7101_s13, 2  ;;  %v5898_v51 = vld [vmem:[#allocation6 + $0x48] sm:$0xff]  ;;  %v5900_v52 = vld [vmem:[#allocation6 + $0x58] sm:$0xff]  ;;  %v5899_v56 = vld [vmem:[#allocation6 + $0x50] sm:$0xff] }
  0x20   : > { %s391_s20 = scalar_lea.vmem %s7088_s0, %s4422_s14  ;;  %v5902_v53 = vld [vmem:[#allocation6 + $0x68] sm:$0xff]  ;;  %v5904_v54 = vld [vmem:[#allocation6 + $0x78] sm:$0xff]  ;;  %v5901_v57 = vld [vmem:[#allocation6 + $0x60] sm:$0xff]  ;;  %s7103_s10 = smov (!%p393_p7, %s6502_s10), 1 }
  0x21   : > { %v5884_v1 = vld [vmem:[%s391_s20] sm:$0xff]  ;;  %v5885_v2 = vld [vmem:[%s391_s20 + $0x8] sm:$0xff]  ;;  %v5886_v3 = vld [vmem:[%s391_s20 + $0x10] sm:$0xff]  ;;  %s395_s15 = scalar_lea.vmem %s7097_s9, %s7103_s10 }
  0x22   : > { %4443 = vmatmul.msk.bf16.vlgmr.msra.gmra.mxu0 %vm435_vm0, %v5884_v1  ;;  %v5887_v4 = vld [vmem:[%s391_s20 + $0x18] sm:$0xff]  ;;  %v5903_v63 = vld [vmem:[#allocation6 + $0x70] sm:$0xff] }
  0x32   : > { %4444 = vmatmul.msk.bf16.gmra.mxu0 %vm435_vm0, %v5885_v2 }
  0x42   : > { %4445 = vmatmul.msk.bf16.gmra.mxu0 %vm435_vm0, %v5886_v3 }
  0x52   : > { %4446 = vmatmul.msk.bf16.gmra.mxu0 %vm435_vm0, %v5887_v4 }
  0x9f   : > { %v457_v5 = vpop.f32.mrf.mxu0 }
  0xa0   : > { %v458_v30 = vadd.f32 %v6287_v12, %v457_v5 }
  0xa2   : > { %v485_v36 = vmul.f32 0.2, %v458_v30  ;;  %vm477_vm8 = vcmp.ge.f32.partialorder %v458_v30, 0.0 }
  0xa4   : > { %v493_v40 = vsel %vm477_vm8, %v458_v30, %v485_v36  ;;  %v5935_v36 = vld [vmem:[%s7091_s3 + $0xb0] sm:$0xff] }
  0xa7   : > { %v459_v6 = vpop.f32.mrf.mxu0 }
  0xa8   : > { %v460_v27 = vadd.f32 %v6287_v12, %v459_v6 }
  0xaa   : > { %v486_v34 = vmul.f32 0.2, %v460_v27  ;;  %vm478_vm7 = vcmp.ge.f32.partialorder %v460_v27, 0.0 }
  0xac   : > { %v494_v39 = vsel %vm478_vm7, %v460_v27, %v486_v34  ;;  %v5920_v34 = vld [vmem:[%s7091_s3 + $0x38] sm:$0xff] }
  0xad   : > { %v6582_v41 = vpack.c.bf16 %v494_v39, %v493_v40  ;;  %v5934_v40 = vld [vmem:[%s7091_s3 + $0xa8] sm:$0xff] }
  0xaf   : > { %v462_v7 = vpop.f32.mrf.mxu0 }
  0xb0   : > { %v463_v22 = vadd.f32 %v6287_v12, %v462_v7 }
  0xb2   : > { %v487_v31 = vmul.f32 0.2, %v463_v22  ;;  %vm479_vm6 = vcmp.ge.f32.partialorder %v463_v22, 0.0 }
  0xb4   : > { %v495_v37 = vsel %vm479_vm6, %v463_v22, %v487_v31 }
  0xb7   : > { %v464_v8 = vpop.f32.mrf.mxu0 }
  0xb8   : > { %v465_v19 = vadd.f32 %v6287_v12, %v464_v8 }
  0xba   : > { %v488_v28 = vmul.f32 0.2, %v465_v19  ;;  %vm480_vm5 = vcmp.ge.f32.partialorder %v465_v19, 0.0 }
  0xbc   : > { %v496_v35 = vsel %vm480_vm5, %v465_v19, %v488_v28 }
  0xbd   : > { %v6576_v38 = vpack.c.bf16 %v496_v35, %v495_v37  ;;  %v5928_v37 = vld [vmem:[%s7091_s3 + $0x78] sm:$0xff] }
  0xbf   : > { %v467_v9 = vpop.f32.mrf.mxu0 }
  0xc0   : > { %v468_v16 = vadd.f32 %v6287_v12, %v467_v9 }
  0xc2   : > { %v489_v23 = vmul.f32 0.2, %v468_v16  ;;  %vm481_vm4 = vcmp.ge.f32.partialorder %v468_v16, 0.0 }
  0xc4   : > { %v497_v32 = vsel %vm481_vm4, %v468_v16, %v489_v23 }
  0xc7   : > { %v469_v10 = vpop.f32.mrf.mxu0 }
  0xc8   : > { %v470_v14 = vadd.f32 %v6287_v12, %v469_v10 }
  0xca   : > { %v490_v20 = vmul.f32 0.2, %v470_v14  ;;  %vm482_vm3 = vcmp.ge.f32.partialorder %v470_v14, 0.0 }
  0xcc   : > { %v498_v29 = vsel %vm482_vm3, %v470_v14, %v490_v20 }
  0xcd   : > { %v6570_v33 = vpack.c.bf16 %v498_v29, %v497_v32 }
  0xcf   : > { %v472_v11 = vpop.f32.mrf.mxu0 }
  0xd0   : > { %v473_v13 = vadd.f32 %v6287_v12, %v472_v11 }
  0xd2   : > { %v491_v17 = vmul.f32 0.2, %v473_v13  ;;  %vm483_vm1 = vcmp.ge.f32.partialorder %v473_v13, 0.0 }
  0xd4   : > { %v499_v24 = vsel %vm483_vm1, %v473_v13, %v491_v17  ;;  %vm4318_vm1 = vcmask 0  }
  0xd7   : > { %v474_v15 = vpop.f32.mrf.mxu0 }
  0xd8   : > { %v475_v18 = vadd.f32 %v6287_v12, %v474_v15 }
  0xda   : > { %vm484_vm2 = vcmp.ge.f32.partialorder %v475_v18, 0.0  ;;  %v492_v21 = vmul.f32 0.2, %v475_v18 }
  0xdc   : > { %v500_v25 = vsel %vm484_vm2, %v475_v18, %v492_v21 }
  0xdd   : > { %v6564_v26 = vpack.c.bf16 %v500_v25, %v499_v24 }
  0xdf   : > { %520 = vmatpush.bf16.msra.mxu1 %v6564_v26  ;;  %547 = vmatpush.bf16.msra.mxu2 %v6564_v26 }
  0xe0   : > { %598 = vmatpush.bf16.msra.mxu3 %v6564_v26  ;;  %988 = vmatpush.bf16.msrb.mxu0 %v6564_v26 }
  0xe3   : > { %521 = vmatpush.bf16.msra.mxu1 %v6570_v33  ;;  %548 = vmatpush.bf16.msra.mxu2 %v6570_v33 }
  0xe4   : > { %599 = vmatpush.bf16.msra.mxu3 %v6570_v33  ;;  %989 = vmatpush.bf16.msrb.mxu0 %v6570_v33 }
  0xe7   : > { %522 = vmatpush.bf16.msra.mxu1 %v6576_v38  ;;  %549 = vmatpush.bf16.msra.mxu2 %v6576_v38 }
  0xe8   : > { %600 = vmatpush.bf16.msra.mxu3 %v6576_v38  ;;  %990 = vmatpush.bf16.msrb.mxu0 %v6576_v38 }
  0xeb   : > { %523 = vmatpush.bf16.msra.mxu1 %v6582_v41  ;;  %550 = vmatpush.bf16.msra.mxu2 %v6582_v41 }
  0xec   : > { %601 = vmatpush.bf16.msra.mxu3 %v6582_v41  ;;  %991 = vmatpush.bf16.msrb.mxu0 %v6582_v41 }
  0xee   : > { %4451 = vmatmul.msk.bf16.vlgmr.msra.gmra.mxu1 %vm512_vm9, %v5889_v42  ;;  %4456 = vmatmul.msk.bf16.vlgmr.msra.gmra.mxu2 %vm512_vm9, %v5890_v43  ;;  %v5918_v42 = vld [vmem:[%s7091_s3 + $0x28] sm:$0xff] }
  0xef   : > { %625 = vmatpush.bf16.msrb.mxu1 %v6564_v26  ;;  %676 = vmatpush.bf16.msrb.mxu2 %v6564_v26 }
  0xf0   : > { %703 = vmatpush.bf16.msrb.mxu3 %v6564_v26  ;;  %4511 = vmatmul.msk.bf16.vlgmr.msrb.gmra.mxu0 %vm512_vm9, %v5901_v57 }
  0xf1   : > { %4461 = vmatmul.msk.bf16.vlgmr.msra.gmra.mxu3 %vm512_vm9, %v5891_v44  ;;  %1691 = vmatpush.bf16.msra.mxu0 %v5920_v34  ;;  %v5951_v34 = vld [vmem:[%s7091_s3 + $0x130] sm:$0xff] }
  0xf3   : > { %626 = vmatpush.bf16.msrb.mxu1 %v6570_v33  ;;  %677 = vmatpush.bf16.msrb.mxu2 %v6570_v33 }
  0xf4   : > { %704 = vmatpush.bf16.msrb.mxu3 %v6570_v33 }
  0xf7   : > { %627 = vmatpush.bf16.msrb.mxu1 %v6576_v38  ;;  %678 = vmatpush.bf16.msrb.mxu2 %v6576_v38 }
  0xf8   : > { %705 = vmatpush.bf16.msrb.mxu3 %v6576_v38 }
  0xfb   : > { %628 = vmatpush.bf16.msrb.mxu1 %v6582_v41  ;;  %679 = vmatpush.bf16.msrb.mxu2 %v6582_v41 }
  0xfc   : > { %706 = vmatpush.bf16.msrb.mxu3 %v6582_v41 }
  0xfe   : > { %4466 = vmatmul.msk.bf16.vlgmr.msrb.gmra.mxu1 %vm512_vm9, %v5892_v45  ;;  %4471 = vmatmul.msk.bf16.vlgmr.msrb.gmra.mxu2 %vm512_vm9, %v5893_v46  ;;  %v5933_v46 = vld [vmem:[%s7091_s3 + $0xa0] sm:$0xff] }
  0xff   : > { %754 = vmatpush.bf16.msra.mxu1 %v6564_v26  ;;  %781 = vmatpush.bf16.msra.mxu2 %v6564_v26 }
 0x100   : > { %832 = vmatpush.bf16.msra.mxu3 %v6564_v26 }
 0x101   : > { %4476 = vmatmul.msk.bf16.vlgmr.msrb.gmra.mxu3 %vm512_vm9, %v5894_v47 }
 0x103   : > { %755 = vmatpush.bf16.msra.mxu1 %v6570_v33  ;;  %782 = vmatpush.bf16.msra.mxu2 %v6570_v33 }
 0x104   : > { %833 = vmatpush.bf16.msra.mxu3 %v6570_v33 }
 0x107   : > { %756 = vmatpush.bf16.msra.mxu1 %v6576_v38  ;;  %783 = vmatpush.bf16.msra.mxu2 %v6576_v38 }
 0x108   : > { %834 = vmatpush.bf16.msra.mxu3 %v6576_v38 }
 0x10b   : > { %757 = vmatpush.bf16.msra.mxu1 %v6582_v41  ;;  %784 = vmatpush.bf16.msra.mxu2 %v6582_v41 }
 0x10c   : > { %835 = vmatpush.bf16.msra.mxu3 %v6582_v41 }
 0x10e   : > { %4481 = vmatmul.msk.bf16.vlgmr.msra.gmra.mxu1 %vm512_vm9, %v5895_v48  ;;  %4486 = vmatmul.msk.bf16.vlgmr.msra.gmra.mxu2 %vm512_vm9, %v5896_v49  ;;  %v5917_v49 = vld [vmem:[%s7091_s3 + $0x20] sm:$0xff] }
 0x10f   : > { %859 = vmatpush.bf16.msrb.mxu1 %v6564_v26  ;;  %910 = vmatpush.bf16.msrb.mxu2 %v6564_v26 }
 0x110   : > { %937 = vmatpush.bf16.msrb.mxu3 %v6564_v26 }
 0x111   : > { %4491 = vmatmul.msk.bf16.vlgmr.msra.gmra.mxu3 %vm512_vm9, %v5897_v50 }
 0x113   : > { %860 = vmatpush.bf16.msrb.mxu1 %v6570_v33  ;;  %911 = vmatpush.bf16.msrb.mxu2 %v6570_v33 }
 0x114   : > { %938 = vmatpush.bf16.msrb.mxu3 %v6570_v33 }
 0x117   : > { %861 = vmatpush.bf16.msrb.mxu1 %v6576_v38  ;;  %912 = vmatpush.bf16.msrb.mxu2 %v6576_v38 }
 0x118   : > { %939 = vmatpush.bf16.msrb.mxu3 %v6576_v38 }
 0x11b   : > { %862 = vmatpush.bf16.msrb.mxu1 %v6582_v41  ;;  %913 = vmatpush.bf16.msrb.mxu2 %v6582_v41 }
 0x11c   : > { %940 = vmatpush.bf16.msrb.mxu3 %v6582_v41 }
 0x11e   : > { %4496 = vmatmul.msk.bf16.vlgmr.msrb.gmra.mxu1 %vm512_vm9, %v5898_v51  ;;  %4501 = vmatmul.msk.bf16.vlgmr.msrb.gmra.mxu2 %vm512_vm9, %v5899_v56 }
 0x11f   : > { %1015 = vmatpush.bf16.msra.mxu1 %v6564_v26  ;;  %1066 = vmatpush.bf16.msra.mxu2 %v6564_v26 }
 0x120   : > { %1093 = vmatpush.bf16.msra.mxu3 %v6564_v26 }
 0x121   : > { %4506 = vmatmul.msk.bf16.vlgmr.msrb.gmra.mxu3 %vm512_vm9, %v5900_v52  ;;  %v5932_v52 = vld [vmem:[%s7091_s3 + $0x98] sm:$0xff] }
 0x123   : > { %1016 = vmatpush.bf16.msra.mxu1 %v6570_v33  ;;  %1067 = vmatpush.bf16.msra.mxu2 %v6570_v33 }
 0x124   : > { %1094 = vmatpush.bf16.msra.mxu3 %v6570_v33  ;;  %v5936_v33 = vld [vmem:[%s7091_s3 + $0xb8] sm:$0xff] }
 0x127   : > { %1017 = vmatpush.bf16.msra.mxu1 %v6576_v38  ;;  %1068 = vmatpush.bf16.msra.mxu2 %v6576_v38 }
 0x128   : > { %1095 = vmatpush.bf16.msra.mxu3 %v6576_v38  ;;  %v5919_v38 = vld [vmem:[%s7091_s3 + $0x30] sm:$0xff] }
 0x129   : > { %1692 = vmatpush.bf16.msra.mxu0 %v5919_v38  ;;  %v5950_v38 = vld [vmem:[%s7091_s3 + $0x128] sm:$0xff] }
 0x12b   : > { %1018 = vmatpush.bf16.msra.mxu1 %v6582_v41  ;;  %1069 = vmatpush.bf16.msra.mxu2 %v6582_v41 }
 0x12c   : > { %1096 = vmatpush.bf16.msra.mxu3 %v6582_v41 }
 0x12d   : > { %1693 = vmatpush.bf16.msra.mxu0 %v5918_v42 }
 0x12e   : > { %4516 = vmatmul.msk.bf16.vlgmr.msra.gmra.mxu1 %vm512_vm9, %v5902_v53  ;;  %4521 = vmatmul.msk.bf16.vlgmr.msra.gmra.mxu2 %vm512_vm9, %v5903_v63  ;;  %v5916_v53 = vld [vmem:[%s7091_s3 + $0x18] sm:$0xff] }
 0x12f   : > { %1719 = vmatpush.bf16.msrb.mxu2 %v5936_v33  ;;  %1705 = vmatpush.bf16.msrb.mxu1 %v5928_v37  ;;  %v5967_v33 = vld [vmem:[%s7091_s3 + $0x1b0] sm:$0xff]  ;;  %v5966_v37 = vld [vmem:[%s7091_s3 + $0x1a8] sm:$0xff] }
 0x131   : > { %4526 = vmatmul.msk.bf16.vlgmr.msra.gmra.mxu3 %vm512_vm9, %v5904_v54  ;;  %1694 = vmatpush.bf16.msra.mxu0 %v5917_v49 }
 0x133   : > { %1720 = vmatpush.bf16.msrb.mxu2 %v5935_v36  ;;  %v5940_v36 = vld [vmem:[%s7091_s3 + $0xd8] sm:$0xff] }
 0x135   : > { %1695 = vmatpush.bf16.msra.mxu0 %v5916_v53  ;;  %v5963_v53 = vld [vmem:[%s7091_s3 + $0x190] sm:$0xff] }
 0x137   : > { %1721 = vmatpush.bf16.msrb.mxu2 %v5934_v40  ;;  %v5939_v40 = vld [vmem:[%s7091_s3 + $0xd0] sm:$0xff] }
 0x13b   : > { %1722 = vmatpush.bf16.msrb.mxu2 %v5933_v46 }
 0x13f   : > { %1723 = vmatpush.bf16.msrb.mxu2 %v5932_v52  ;;  %v5959_v52 = vld [vmem:[%s7091_s3 + $0x170] sm:$0xff] }
 0x16b   : > { %v6649_v55 = vpop.f32.mrf.mxu1 }
 0x16d   : > { %v6798_v46 = vpop.f32.mrf.mxu0 }
 0x171   : > { %v552_v58 = vpop.f32.mrf.mxu2 }
 0x172   : > { %v557_v11 = vpack.c.bf16 %v552_v58, %v552_v58 }
 0x173   : > { %v6655_v60 = vpop.f32.mrf.mxu1 }
 0x174   : > { %v6652_v59 = vpop.f32.mrf.mxu3  ;;  %v566_v16 = vunpack.c.l.b16 %v557_v11 }
 0x179   : > { %v554_v61 = vpop.f32.mrf.mxu2 }
 0x17a   : > { %v558_v12 = vpack.c.bf16 %v554_v61, %v554_v61 }
 0x17b   : > { %v630_v0 = vpop.f32.mrf.mxu1 }
 0x17c   : > { %v6657_v62 = vpop.f32.mrf.mxu3  ;;  %v567_v17 = vunpack.c.l.b16 %v558_v12  ;;  %v635_v27 = vpack.c.bf16 %v630_v0, %v630_v0 }
 0x17e   : > { %v568_v20 = vpack.c.b16 %v567_v17, %v566_v16  ;;  %v644_v30 = vunpack.c.l.b16 %v635_v27  ;;  %v5931_v16 = vld [vmem:[%s7091_s3 + $0x90] sm:$0xff]  ;;  %v5944_v17 = vld [vmem:[%s7091_s3 + $0xf8] sm:$0xff]  ;;  %v5942_v27 = vld [vmem:[%s7091_s3 + $0xe8] sm:$0xff] }
 0x17f   : > { %1724 = vmatpush.bf16.msrb.mxu2 %v5931_v16  ;;  %1733 = vmatpush.bf16.msrb.mxu3 %v5944_v17  ;;  %v5961_v16 = vld [vmem:[%s7091_s3 + $0x180] sm:$0xff]  ;;  %v5975_v17 = vld [vmem:[%s7091_s3 + $0x1f0] sm:$0xff] }
 0x181   : > { %v6660_v1 = vpop.f32.mrf.mxu2 }
 0x182   : > { %v686_v42 = vpack.c.bf16 %v6660_v1, %v6660_v1  ;;  %v5938_v1 = vld [vmem:[%s7091_s3 + $0xc8] sm:$0xff] }
 0x183   : > { %v632_v3 = vpop.f32.mrf.mxu1 }
 0x184   : > { %v708_v2 = vpop.f32.mrf.mxu3  ;;  %v636_v28 = vpack.c.bf16 %v632_v3, %v632_v3 }
 0x185   : > { %v713_v4 = vpack.c.bf16 %v708_v2, %v708_v2 }
 0x186   : > { %v645_v31 = vunpack.c.l.b16 %v636_v28  ;;  %v5968_v28 = vld [vmem:[%s7091_s3 + $0x1b8] sm:$0xff] }
 0x187   : > { %v722_v9 = vunpack.c.l.b16 %v713_v4 }
 0x188   : > { %v646_v39 = vpack.c.b16 %v645_v31, %v644_v30  ;;  %v5952_v30 = vld [vmem:[%s7091_s3 + $0x138] sm:$0xff] }
 0x189   : > { %v6662_v5 = vpop.f32.mrf.mxu2  ;;  %v5924_v31 = vld [vmem:[%s7091_s3 + $0x58] sm:$0xff] }
 0x18b   : > { %v6664_v8 = vpop.f32.mrf.mxu1 }
 0x18c   : > { %v710_v6 = vpop.f32.mrf.mxu3 }
 0x18d   : > { %v714_v7 = vpack.c.bf16 %v710_v6, %v710_v6 }
 0x18f   : > { %v723_v10 = vunpack.c.l.b16 %v714_v7 }
 0x191   : > { %v724_v13 = vpack.c.b16 %v723_v10, %v722_v9  ;;  %v786_v14 = vpop.f32.mrf.mxu2 }
 0x192   : > { %v791_v19 = vpack.c.bf16 %v786_v14, %v786_v14  ;;  %v5927_v14 = vld [vmem:[%s7091_s3 + $0x70] sm:$0xff] }
 0x193   : > { %725 = vrot.lane.b32.xlu0 %v724_v13, %s6445_s25  ;;  %v6669_v18 = vpop.f32.mrf.mxu1  ;;  %1706 = vmatpush.bf16.msrb.mxu1 %v5927_v14  ;;  %v5957_v14 = vld [vmem:[%s7091_s3 + $0x160] sm:$0xff] }
 0x194   : > { %v6667_v15 = vpop.f32.mrf.mxu3  ;;  %v800_v22 = vunpack.c.l.b16 %v791_v19  ;;  %v5915_v19 = vld [vmem:[%s7091_s3 + $0x10] sm:$0xff] }
 0x195   : > { %1696 = vmatpush.bf16.msra.mxu0 %v5915_v19 }
 0x199   : > { %v788_v21 = vpop.f32.mrf.mxu2 }
 0x19a   : > { %v792_v23 = vpack.c.bf16 %v788_v21, %v788_v21  ;;  %v5930_v21 = vld [vmem:[%s7091_s3 + $0x88] sm:$0xff] }
 0x19b   : > { %569 = vrot.lane.b32.xlu0 %v568_v20, %s6445_s25  ;;  %v864_v25 = vpop.f32.mrf.mxu1  ;;  %v5926_v20 = vld [vmem:[%s7091_s3 + $0x68] sm:$0xff]  ;;  %1725 = vmatpush.bf16.msrb.mxu2 %v5930_v21  ;;  %v5945_v21 = vld [vmem:[%s7091_s3 + $0x100] sm:$0xff] }
 0x19c   : > { %v6672_v24 = vpop.f32.mrf.mxu3  ;;  %v801_v26 = vunpack.c.l.b16 %v792_v23  ;;  %v869_v63 = vpack.c.bf16 %v864_v25, %v864_v25  ;;  %1707 = vmatpush.bf16.msrb.mxu1 %v5926_v20  ;;  %v5914_v23 = vld [vmem:[%s7091_s3 + $0x8] sm:$0xff]  ;;  %v5929_v25 = vld [vmem:[%s7091_s3 + $0x80] sm:$0xff] }
 0x19d   : > { %1697 = vmatpush.bf16.msra.mxu0 %v5914_v23  ;;  %v5956_v23 = vld [vmem:[%s7091_s3 + $0x158] sm:$0xff] }
 0x19e   : > { %v802_v29 = vpack.c.b16 %v801_v26, %v800_v22  ;;  %v878_v7 = vunpack.c.l.b16 %v869_v63  ;;  %v5943_v22 = vld [vmem:[%s7091_s3 + $0xf0] sm:$0xff]  ;;  %v5925_v26 = vld [vmem:[%s7091_s3 + $0x60] sm:$0xff] }
 0x19f   : > { %1734 = vmatpush.bf16.msrb.mxu3 %v5943_v22  ;;  %1726 = vmatpush.bf16.msrb.mxu2 %v5929_v25  ;;  %v5974_v25 = vld [vmem:[%s7091_s3 + $0x1e8] sm:$0xff] }
 0x1a0   : > { %803 = vrot.lane.b32.xlu1 %v802_v29, %s6445_s25  ;;  %1708 = vmatpush.bf16.msrb.mxu1 %v5925_v26  ;;  %v5913_v29 = vld [vmem:[%s7091_s3] sm:$0xff] }
 0x1a1   : > { %1698 = vmatpush.bf16.msra.mxu0 %v5913_v29  ;;  %v6854_v19 = vpop.f32.mrf.mxu2 }
 0x1a3   : > { %v866_v35 = vpop.f32.mrf.mxu1  ;;  %1735 = vmatpush.bf16.msrb.mxu3 %v5942_v27  ;;  %1775 = vmatpush.bf16.msra.mxu2 %v5968_v28 }
 0x1a4   : > { %v942_v32 = vpop.f32.mrf.mxu3  ;;  %v870_v0 = vpack.c.bf16 %v866_v35, %v866_v35  ;;  %1709 = vmatpush.bf16.msrb.mxu1 %v5924_v31  ;;  %v5923_v35 = vld [vmem:[%s7091_s3 + $0x50] sm:$0xff] }
 0x1a5   : > { %v947_v41 = vpack.c.bf16 %v942_v32, %v942_v32  ;;  %1747 = vmatpush.bf16.msrb.mxu0 %v5952_v30  ;;  %v5941_v32 = vld [vmem:[%s7091_s3 + $0xe0] sm:$0xff] }
 0x1a6   : > { %v879_v9 = vunpack.c.l.b16 %v870_v0  ;;  %v5958_v0 = vld [vmem:[%s7091_s3 + $0x168] sm:$0xff] }
 0x1a7   : > { %v956_v47 = vunpack.c.l.b16 %v947_v41  ;;  %1736 = vmatpush.bf16.msrb.mxu3 %v5941_v32  ;;  %1776 = vmatpush.bf16.msra.mxu2 %v5967_v33  ;;  %v5965_v41 = vld [vmem:[%s7091_s3 + $0x1a0] sm:$0xff]  ;;  %v5955_v33 = vld [vmem:[%s7091_s3 + $0x150] sm:$0xff] }
 0x1a8   : > { %647 = vrot.lane.b32.xlu1 %v646_v39, %s6445_s25  ;;  %v880_v13 = vpack.c.b16 %v879_v9, %v878_v7  ;;  %1710 = vmatpush.bf16.msrb.mxu1 %v5923_v35  ;;  %v5922_v39 = vld [vmem:[%s7091_s3 + $0x48] sm:$0xff]  ;;  %v995_v7 = vpop.f32.mrf.mxu0 }
 0x1a9   : > { %1748 = vmatpush.bf16.msrb.mxu0 %v5951_v34  ;;  %v5946_v9 = vld [vmem:[%s7091_s3 + $0x108] sm:$0xff]  ;;  %v5973_v34 = vld [vmem:[%s7091_s3 + $0x1e0] sm:$0xff] }
 0x1ab   : > { %v1020_v45 = vpop.f32.mrf.mxu1  ;;  %1737 = vmatpush.bf16.msrb.mxu3 %v5940_v36  ;;  %1777 = vmatpush.bf16.msra.mxu2 %v5966_v37 }
 0x1ac   : > { %v944_v43 = vpop.f32.mrf.mxu3  ;;  %v1025_v51 = vpack.c.bf16 %v1020_v45, %v1020_v45  ;;  %1711 = vmatpush.bf16.msrb.mxu1 %v5922_v39  ;;  %v5921_v45 = vld [vmem:[%s7091_s3 + $0x40] sm:$0xff] }
 0x1ad   : > { %v948_v44 = vpack.c.bf16 %v944_v43, %v944_v43  ;;  %1749 = vmatpush.bf16.msrb.mxu0 %v5950_v38  ;;  %v687_v43 = vpack.c.bf16 %v6662_v5, %v6662_v5  ;;  %v5960_v5 = vld [vmem:[%s7091_s3 + $0x178] sm:$0xff]  ;;  %v609_v38 = vpack.c.bf16 %v6657_v62, %v6657_v62 }
 0x1ae   : > { %v1034_v57 = vunpack.c.l.b16 %v1025_v51  ;;  %v5937_v51 = vld [vmem:[%s7091_s3 + $0xc0] sm:$0xff] }
 0x1af   : > { %v957_v48 = vunpack.c.l.b16 %v948_v44  ;;  %1738 = vmatpush.bf16.msrb.mxu3 %v5939_v40  ;;  %1778 = vmatpush.bf16.msra.mxu2 %v5965_v41  ;;  %v5949_v44 = vld [vmem:[%s7091_s3 + $0x120] sm:$0xff]  ;;  %v718_v49 = vunpack.c.l.b16 %v687_v43 }
 0x1b0   : > { %1712 = vmatpush.bf16.msrb.mxu1 %v5921_v45  ;;  %v843_v45 = vpack.c.bf16 %v6672_v24, %v6672_v24 }
 0x1b1   : > { %v958_v50 = vpack.c.b16 %v957_v48, %v956_v47  ;;  %1750 = vmatpush.bf16.msrb.mxu0 %v5949_v44  ;;  %v5964_v47 = vld [vmem:[%s7091_s3 + $0x198] sm:$0xff]  ;;  %v717_v48 = vunpack.c.l.b16 %v686_v42  ;;  %v608_v44 = vpack.c.bf16 %v6652_v59, %v6652_v59  ;;  %v842_v59 = vpack.c.bf16 %v6667_v15, %v6667_v15  ;;  %v5971_v15 = vld [vmem:[%s7091_s3 + $0x1d0] sm:$0xff] }
 0x1b3   : > { %959 = vrot.lane.b32.xlu1 %v958_v50, %s6445_s25  ;;  %v1022_v56 = vpop.f32.mrf.mxu1  ;;  %1739 = vmatpush.bf16.msrb.mxu3 %v5938_v1  ;;  %v5948_v50 = vld [vmem:[%s7091_s3 + $0x118] sm:$0xff]  ;;  %v917_v1 = vpop.f32.mrf.mxu2 }
 0x1b4   : > { %v1098_v54 = vpop.f32.mrf.mxu3  ;;  %v1026_v58 = vpack.c.bf16 %v1022_v56, %v1022_v56  ;;  %1761 = vmatpush.bf16.msra.mxu1 %v5960_v5  ;;  %1779 = vmatpush.bf16.msra.mxu2 %v5964_v47  ;;  %v531_v56 = vpack.c.bf16 %v6655_v60, %v6655_v60  ;;  %v5976_v60 = vld [vmem:[%s7091_s3 + $0x1f8] sm:$0xff] }
 0x1b5   : > { %v1103_v3 = vpack.c.bf16 %v1098_v54, %v1098_v54  ;;  %1751 = vmatpush.bf16.msrb.mxu0 %v5948_v50  ;;  %v530_v54 = vpack.c.bf16 %v6649_v55, %v6649_v55  ;;  %v5962_v55 = vld [vmem:[%s7091_s3 + $0x188] sm:$0xff]  ;;  %v640_v50 = vunpack.c.l.b16 %v609_v38 }
 0x1b6   : > { %v1035_v61 = vunpack.c.l.b16 %v1026_v58  ;;  %v5947_v58 = vld [vmem:[%s7091_s3 + $0x110] sm:$0xff] }
 0x1b7   : > { %v1112_v10 = vunpack.c.l.b16 %v1103_v3  ;;  %1740 = vmatpush.bf16.msrb.mxu3 %v5937_v51 }
 0x1b8   : > { %v1036_v2 = vpack.c.b16 %v1035_v61, %v1034_v57  ;;  %v719_v57 = vpack.c.b16 %v718_v49, %v717_v48  ;;  %1762 = vmatpush.bf16.msra.mxu1 %v5959_v52  ;;  %1780 = vmatpush.bf16.msra.mxu2 %v5963_v53  ;;  %v5954_v48 = vld [vmem:[%s7091_s3 + $0x148] sm:$0xff]  ;;  %v5972_v49 = vld [vmem:[%s7091_s3 + $0x1d8] sm:$0xff] }
 0x1b9   : > { %1752 = vmatpush.bf16.msrb.mxu0 %v5947_v58 }
 0x1ba   : > { %1037 = vrot.lane.b32.xlu2 %v1036_v2, %s6445_s25 }
 0x1bb   : > { %1789 = vmatpush.bf16.msra.mxu3 %v5976_v60  ;;  %v873_v60 = vunpack.c.l.b16 %v842_v59 }
 0x1bc   : > { %v1100_v4 = vpop.f32.mrf.mxu3  ;;  %1763 = vmatpush.bf16.msra.mxu1 %v5958_v0  ;;  %1781 = vmatpush.bf16.msra.mxu2 %v5962_v55  ;;  %v5953_v0 = vld [vmem:[%s7091_s3 + $0x140] sm:$0xff] }
 0x1bd   : > { %v1104_v6 = vpack.c.bf16 %v1100_v4, %v1100_v4  ;;  %v561_v4 = vunpack.c.l.b16 %v530_v54  ;;  %1753 = vmatpush.bf16.msrb.mxu0 %v5946_v9 }
 0x1bf   : > { %v1113_v11 = vunpack.c.l.b16 %v1104_v6  ;;  %v562_v6 = vunpack.c.l.b16 %v531_v56  ;;  %1790 = vmatpush.bf16.msra.mxu3 %v5975_v17  ;;  %v639_v56 = vunpack.c.l.b16 %v608_v44 }
 0x1c0   : > { %1764 = vmatpush.bf16.msra.mxu1 %v5957_v14  ;;  %1782 = vmatpush.bf16.msra.mxu2 %v5961_v16 }
 0x1c1   : > { %v1114_v12 = vpack.c.b16 %v1113_v11, %v1112_v10  ;;  %v563_v20 = vpack.c.b16 %v562_v6, %v561_v4  ;;  %1754 = vmatpush.bf16.msrb.mxu0 %v5945_v21  ;;  %v641_v55 = vpack.c.b16 %v640_v50, %v639_v56 }
 0x1c2   : > { %881 = vrot.lane.b32.xlu2 %v880_v13, %s6445_s25  ;;  %v765_v13 = vpack.c.bf16 %v6669_v18, %v6669_v18  ;;  %v999_v18 = vpack.c.bf16 %v995_v7, %v995_v7 }
 0x1c3   : > { %1115 = vrot.lane.b32.xlu0 %v1114_v12, %s6445_s25  ;;  %v764_v12 = vpack.c.bf16 %v6664_v8, %v6664_v8  ;;  %v998_v8 = vpack.c.bf16 %v6798_v46, %v6798_v46  ;;  %1791 = vmatpush.bf16.msra.mxu3 %v5974_v25 }
 0x1c4   : > { %v796_v27 = vunpack.c.l.b16 %v765_v13  ;;  %v1030_v32 = vunpack.c.l.b16 %v999_v18  ;;  %1765 = vmatpush.bf16.msra.mxu1 %v5956_v23  ;;  %v5969_v23 = vld [vmem:[%s7091_s3 + $0x1c0] sm:$0xff] }
 0x1c5   : > { %v795_v26 = vunpack.c.l.b16 %v764_v12  ;;  %v1029_v31 = vunpack.c.l.b16 %v998_v8 }
 0x1c7   : > { %v797_v39 = vpack.c.b16 %v796_v27, %v795_v26  ;;  %v1031_v41 = vpack.c.b16 %v1030_v32, %v1029_v31  ;;  %1792 = vmatpush.bf16.msra.mxu3 %v5973_v34 }
 0x1c8   : > { %1766 = vmatpush.bf16.msra.mxu1 %v5955_v33 }
 0x1cb   : > { %1793 = vmatpush.bf16.msra.mxu3 %v5972_v49 }
 0x1cc   : > { %1767 = vmatpush.bf16.msra.mxu1 %v5954_v48 }
 0x1cf   : > { %1794 = vmatpush.bf16.msra.mxu3 %v5971_v15 }
 0x1d0   : > { %1768 = vmatpush.bf16.msra.mxu1 %v5953_v0 }
 0x205   : > { %v726_v61 = vpop.permute.xlu0 %725 }
 0x206   : > { %v729_v63 = vsel %vm512_vm9, %v719_v57, %v726_v61  ;;  %v874_v57 = vunpack.c.l.b16 %v843_v45 }
 0x207   : > { %v731_v2 = vunpack.c.l.b16 %v729_v63  ;;  %v732_v3 = vunpack.c.h.b16 %v729_v63 }
 0x208   : > { %v875_v9 = vpack.c.b16 %v874_v57, %v873_v60 }
 0x209   : > { %v733_v10 = vpack.c.b16 %v731_v2, %v731_v2  ;;  %v734_v11 = vpack.c.b16 %v732_v3, %v732_v3  ;;  %v920_v2 = vpack.c.bf16 %v6854_v19, %v6854_v19  ;;  %v921_v3 = vpack.c.bf16 %v917_v1, %v917_v1  ;;  %v1071_v19 = vpop.f32.mrf.mxu2 }
 0x20a   : > { %v1076_v45 = vpack.c.bf16 %v1071_v19, %v1071_v19 }
 0x20b   : > { %737 = vst [vmem:[#allocation2 + $0x8] sm:$0xf] %v733_v10  ;;  %v951_v16 = vunpack.c.l.b16 %v920_v2  ;;  %v952_v17 = vunpack.c.l.b16 %v921_v3 }
 0x20c   : > { %738 = vst [vmem:[#allocation2 + $0x28] sm:$0xf] %v734_v11  ;;  %v5970_v11 = vld [vmem:[%s7091_s3 + $0x1c8] sm:$0xff] }
 0x20d   : > { %v570_v22 = vpop.permute.xlu0 %569  ;;  %1795 = vmatpush.bf16.msra.mxu3 %v5970_v11  ;;  %v953_v31 = vpack.c.b16 %v952_v17, %v951_v16 }
 0x20e   : > { %v573_v28 = vsel %vm512_vm9, %v563_v20, %v570_v22 }
 0x20f   : > { %v575_v29 = vunpack.c.l.b16 %v573_v28  ;;  %v576_v30 = vunpack.c.h.b16 %v573_v28 }
 0x211   : > { %v577_v35 = vpack.c.b16 %v575_v29, %v575_v29  ;;  %v578_v36 = vpack.c.b16 %v576_v30, %v576_v30  ;;  %1796 = vmatpush.bf16.msra.mxu3 %v5969_v23 }
 0x212   : > { %v4537_v37 = vld [vmem:[#allocation2 + $0x8] sm:$0xf]  ;;  %v804_v42 = vpop.permute.xlu1 %803 }
 0x213   : > { %581 = vst [vmem:[#allocation2] sm:$0xf] %v577_v35  ;;  %v5910_v40 = vld [vmem:[#allocation2 + $0x24] sm:$0xf0]  ;;  %v807_v46 = vsel %vm512_vm9, %v797_v39, %v804_v42 }
 0x214   : > { %582 = vst [vmem:[#allocation2 + $0x20] sm:$0xf] %v578_v36  ;;  %v4538_v43 = vor.u32 %v5910_v40, %v4537_v37  ;;  %v809_v5 = vunpack.c.l.b16 %v807_v46  ;;  %v810_v62 = vunpack.c.h.b16 %v807_v46  ;;  %v1038_v47 = vpop.permute.xlu2 %1037  ;;  %v1073_v40 = vpop.f32.mrf.mxu2 }
 0x215   : > { %v1041_v24 = vsel %vm512_vm9, %v1031_v41, %v1038_v47  ;;  %v1077_v46 = vpack.c.bf16 %v1073_v40, %v1073_v40  ;;  %v4818_v40 = vld [vmem:[%s7092_s4 + $0x4] sm:$0x3] }
 0x216   : > { %1727 = vmatmul.bf16.vlgmr.msrb.gmra.mxu2 %v4538_v43  ;;  %v811_v51 = vpack.c.b16 %v809_v5, %v809_v5  ;;  %v812_v52 = vpack.c.b16 %v810_v62, %v810_v62  ;;  %v1043_v53 = vunpack.c.l.b16 %v1041_v24  ;;  %v1044_v54 = vunpack.c.h.b16 %v1041_v24 }
 0x217   : > { %v1107_v62 = vunpack.c.l.b16 %v1076_v45  ;;  %v1108_v47 = vunpack.c.l.b16 %v1077_v46  ;;  %v4828_v45 = vld [vmem:[%s7092_s4 + $0xe] sm:$0x3]  ;;  %v4905_v46 = vld [vmem:[#allocation8 + $0x70] sm:$0xf] }
 0x218   : > { %815 = vst [vmem:[#allocation2 + $0xc] sm:$0xf] %v811_v51  ;;  %v1045_v58 = vpack.c.b16 %v1043_v53, %v1043_v53  ;;  %v1046_v61 = vpack.c.b16 %v1044_v54, %v1044_v54 }
 0x219   : > { %816 = vst [vmem:[#allocation2 + $0x2c] sm:$0xf] %v812_v52  ;;  %v1109_v48 = vpack.c.b16 %v1108_v47, %v1107_v62  ;;  %v6008_v62 = vld [vmem:[#allocation8 + $0xf4] sm:$0xf0]  ;;  %v5033_v47 = vld [vmem:[#allocation8 + $0x170] sm:$0xf] }
 0x21a   : > { %v4529_v63 = vld [vmem:[#allocation2] sm:$0xf]  ;;  %1049 = vst [vmem:[#allocation2 + $0x18] sm:$0xf] %v1045_v58  ;;  %v648_v6 = vpop.permute.xlu1 %647 }
 0x21b   : > { %v5909_v4 = vld [vmem:[#allocation2 + $0x1c] sm:$0xf0]  ;;  %1050 = vst [vmem:[#allocation2 + $0x38] sm:$0xf] %v1046_v61  ;;  %v651_v10 = vsel %vm512_vm9, %v641_v55, %v648_v6  ;;  %v6288_v55 = vld [vmem:[%s7096_s8 + $0x1] ss:$0 sm:$0xff] }
 0x21c   : > { %v4530_v7 = vor.u32 %v5909_v4, %v4529_v63  ;;  %v653_v12 = vunpack.c.l.b16 %v651_v10  ;;  %v654_v13 = vunpack.c.h.b16 %v651_v10  ;;  %v882_v14 = vpop.permute.xlu2 %881 }
 0x21d   : > { %v885_v8 = vsel %vm512_vm9, %v875_v9, %v882_v14 }
 0x21e   : > { %1699 = vmatmul.bf16.vlgmr.msra.gmra.mxu0 %v4530_v7  ;;  %v655_v18 = vpack.c.b16 %v653_v12, %v653_v12  ;;  %v656_v20 = vpack.c.b16 %v654_v13, %v654_v13  ;;  %v887_v21 = vunpack.c.l.b16 %v885_v8  ;;  %v888_v22 = vunpack.c.h.b16 %v885_v8 }
 0x21f   : > { %v5906_v25 = vld [vmem:[#allocation2 + $0xc] sm:$0xf] }
 0x220   : > { %659 = vst [vmem:[#allocation2 + $0x4] sm:$0xf] %v655_v18  ;;  %v889_v26 = vpack.c.b16 %v887_v21, %v887_v21  ;;  %v890_v27 = vpack.c.b16 %v888_v22, %v888_v22  ;;  %v4539_v28 = vld [vmem:[#allocation2 + $0x28] sm:$0xf0] }
 0x221   : > { %660 = vst [vmem:[#allocation2 + $0x24] sm:$0xf] %v656_v20  ;;  %v4542_v29 = vor.u32 %v5906_v25, %v4539_v28  ;;  %v4553_v30 = vld [vmem:[#allocation2 + $0x18] sm:$0xf] }
 0x222   : > { %893 = vst [vmem:[#allocation2 + $0x10] sm:$0xf] %v889_v26  ;;  %v5912_v32 = vld [vmem:[#allocation2 + $0x34] sm:$0xf0] }
 0x223   : > { %894 = vst [vmem:[#allocation2 + $0x30] sm:$0xf] %v890_v27  ;;  %1741 = vmatmul.bf16.vlgmr.msrb.gmra.mxu3 %v4542_v29  ;;  %v4554_v34 = vor.u32 %v5912_v32, %v4553_v30 }
 0x225   : > { %v960_v33 = vpop.permute.xlu1 %959 }
 0x226   : > { %v963_v35 = vsel %vm512_vm9, %v953_v31, %v960_v33  ;;  %1783 = vmatmul.bf16.vlgmr.msra.gmra.mxu2 %v4554_v34 }
 0x227   : > { %v965_v36 = vunpack.c.l.b16 %v963_v35  ;;  %v966_v37 = vunpack.c.h.b16 %v963_v35  ;;  %v5905_v41 = vld [vmem:[#allocation2 + $0x4] sm:$0xf] }
 0x228   : > { %v4531_v42 = vld [vmem:[#allocation2 + $0x20] sm:$0xf0] }
 0x229   : > { %v967_v38 = vpack.c.b16 %v965_v36, %v965_v36  ;;  %v968_v39 = vpack.c.b16 %v966_v37, %v966_v37  ;;  %v4534_v43 = vor.u32 %v5905_v41, %v4531_v42  ;;  %v4545_v44 = vld [vmem:[#allocation2 + $0x10] sm:$0xf]  ;;  %v4820_v41 = vld [vmem:[%s7092_s4 + $0x6] sm:$0x3]  ;;  %v4822_v42 = vld [vmem:[%s7092_s4 + $0x8] sm:$0x3] }
 0x22a   : > { %v5911_v1 = vld [vmem:[#allocation2 + $0x2c] sm:$0xf0] }
 0x22b   : > { %971 = vst [vmem:[#allocation2 + $0x14] sm:$0xf] %v967_v38  ;;  %1713 = vmatmul.bf16.vlgmr.msrb.gmra.mxu1 %v4534_v43  ;;  %v4546_v5 = vor.u32 %v5911_v1, %v4545_v44  ;;  %v1810_v38 = vld [vmem:[%s7092_s4] sm:$0x3]  ;;  %v4824_v43 = vld [vmem:[%s7092_s4 + $0xa] sm:$0x3] }
 0x22c   : > { %972 = vst [vmem:[#allocation2 + $0x34] sm:$0xf] %v968_v39  ;;  %v4816_v39 = vld [vmem:[%s7092_s4 + $0x2] sm:$0x3]  ;;  %v4826_v44 = vld [vmem:[%s7092_s4 + $0xc] sm:$0x3] }
 0x22d   : > { %v5992_v1 = vld [vmem:[#allocation8 + $0x74] sm:$0xf0] }
 0x22e   : > { %1755 = vmatmul.bf16.vlgmr.msrb.gmra.mxu0 %v4546_v5  ;;  %v4969_v5 = vld [vmem:[#allocation8 + $0xf0] sm:$0xf] }
 0x232   : > { %v5907_v51 = vld [vmem:[#allocation2 + $0x14] sm:$0xf] }
 0x233   : > { %v4547_v52 = vld [vmem:[#allocation2 + $0x30] sm:$0xf0] }
 0x234   : > { %v4550_v56 = vor.u32 %v5907_v51, %v4547_v52  ;;  %v4832_v51 = vld [vmem:[%s7092_s4 + $0x12] sm:$0x3]  ;;  %v4836_v52 = vld [vmem:[%s7092_s4 + $0x16] sm:$0x3] }
 0x235   : > { %v1116_v49 = vpop.permute.xlu0 %1115 }
 0x236   : > { %v1119_v50 = vsel %vm512_vm9, %v1109_v48, %v1116_v49  ;;  %v6024_v48 = vld [vmem:[#allocation8 + $0x174] sm:$0xf0]  ;;  %v5097_v49 = vld [vmem:[#allocation8 + $0x1f0] sm:$0xf] }
 0x237   : > { %v1121_v59 = vunpack.c.l.b16 %v1119_v50  ;;  %v1122_v24 = vunpack.c.h.b16 %v1119_v50  ;;  %v6040_v50 = vld [vmem:[#allocation8 + $0x1f4] sm:$0xf0] }
 0x239   : > { %v1123_v53 = vpack.c.b16 %v1121_v59, %v1121_v59  ;;  %v1124_v54 = vpack.c.b16 %v1122_v24, %v1122_v24  ;;  %v4834_v59 = vld [vmem:[%s7092_s4 + $0x14] sm:$0x3]  ;;  %v4830_v24 = vld [vmem:[%s7092_s4 + $0x10] sm:$0x3] }
 0x23b   : > { %1127 = vst [vmem:[#allocation2 + $0x1c] sm:$0xf] %v1123_v53  ;;  %1769 = vmatmul.bf16.vlgmr.msra.gmra.mxu1 %v4550_v56  ;;  %v4906_v53 = vor.u32 %v5992_v1, %v4905_v46  ;;  %v4897_v56 = vld [vmem:[#allocation8 + $0x60] sm:$0xf] }
 0x23c   : > { %1128 = vst [vmem:[#allocation2 + $0x3c] sm:$0xf] %v1124_v54  ;;  %v4970_v54 = vor.u32 %v6008_v62, %v4969_v5  ;;  %v4865_v5 = vld [vmem:[#allocation8 + $0x20] sm:$0xf]  ;;  %v5982_v62 = vld [vmem:[#allocation8 + $0x24] sm:$0xf0] }
 0x242   : > { %v5908_v57 = vld [vmem:[#allocation2 + $0x1c] sm:$0xf] }
 0x243   : > { %v4555_v58 = vld [vmem:[#allocation2 + $0x38] sm:$0xf0] }
 0x244   : > { %v4558_v61 = vor.u32 %v5908_v57, %v4555_v58  ;;  %v5990_v57 = vld [vmem:[#allocation8 + $0x64] sm:$0xf0]  ;;  %v5034_v58 = vor.u32 %v6024_v48, %v5033_v47 }
 0x246   : > { %1797 = vmatmul.bf16.vlgmr.msra.gmra.mxu3 %v4558_v61  ;;  %v5098_v61 = vor.u32 %v6040_v50, %v5097_v49  ;;  %v4929_v49 = vld [vmem:[#allocation8 + $0xa0] sm:$0xf]  ;;  %v5998_v50 = vld [vmem:[#allocation8 + $0xa4] sm:$0xf0] }
 0x299   : > { %v1728_v15 = vpop.f32.mrf.mxu2 }
 0x29b   : > { %v1700_v0 = vpop.f32.mrf.mxu0 }
 0x29c   : > { %v1701_v4 = vadd.f32 %v6288_v55, %v1700_v0  ;;  %v6006_v0 = vld [vmem:[#allocation8 + $0xe4] sm:$0xf0] }
 0x2a1   : > { %v1730_v9 = vpop.f32.mrf.mxu2 }
 0x2a3   : > { %v1702_v2 = vpop.f32.mrf.mxu0 }
 0x2a4   : > { %v1703_v7 = vadd.f32 %v6288_v55, %v1702_v2  ;;  %v6022_v55 = vld [vmem:[#allocation8 + $0x164] sm:$0xf0] }
 0x2a5   : > { %v6038_v2 = vld [vmem:[#allocation8 + $0x1e4] sm:$0xf0] }
 0x2a6   : > { %v1742_v3 = vpop.f32.mrf.mxu3 }
 0x2a8   : > { %v1714_v63 = vpop.f32.mrf.mxu1 }
 0x2a9   : > { %v1715_v6 = vadd.f32 %v1714_v63, %v1701_v4  ;;  %v1784_v19 = vpop.f32.mrf.mxu2  ;;  %v4961_v63 = vld [vmem:[#allocation8 + $0xe0] sm:$0xf] }
 0x2aa   : > { %v4962_v4 = vor.u32 %v6006_v0, %v4961_v63  ;;  %v4921_v63 = vld [vmem:[#allocation8 + $0x90] sm:$0xf]  ;;  %v5996_v0 = vld [vmem:[#allocation8 + $0x94] sm:$0xf0] }
 0x2ab   : > { %v1729_v10 = vadd.f32 %v1728_v15, %v1715_v6  ;;  %v1756_v11 = vpop.f32.mrf.mxu0  ;;  %v5025_v15 = vld [vmem:[#allocation8 + $0x160] sm:$0xf]  ;;  %v4889_v6 = vld [vmem:[#allocation8 + $0x50] sm:$0xf] }
 0x2ad   : > { %v1743_v16 = vadd.f32 %v1742_v3, %v1729_v10  ;;  %v4898_v3 = vor.u32 %v5990_v57, %v4897_v56  ;;  %v4857_v56 = vld [vmem:[#allocation8 + $0x10] sm:$0xf]  ;;  %v5980_v57 = vld [vmem:[#allocation8 + $0x14] sm:$0xf0] }
 0x2ae   : > { %v1744_v14 = vpop.f32.mrf.mxu3 }
 0x2af   : > { %v1757_v8 = vadd.f32 %v1756_v11, %v1743_v16  ;;  %v4953_v11 = vld [vmem:[#allocation8 + $0xd0] sm:$0xf] }
 0x2b0   : > { %v1716_v60 = vpop.f32.mrf.mxu1  ;;  %v5081_v16 = vld [vmem:[#allocation8 + $0x1d0] sm:$0xf] }
 0x2b1   : > { %v1717_v12 = vadd.f32 %v1716_v60, %v1703_v7  ;;  %v1786_v29 = vpop.f32.mrf.mxu2  ;;  %v5089_v60 = vld [vmem:[#allocation8 + $0x1e0] sm:$0xf]  ;;  %v5988_v7 = vld [vmem:[#allocation8 + $0x54] sm:$0xf0] }
 0x2b2   : > { %v5090_v10 = vor.u32 %v6038_v2, %v5089_v60  ;;  %v5049_v60 = vld [vmem:[#allocation8 + $0x190] sm:$0xf]  ;;  %v6028_v2 = vld [vmem:[#allocation8 + $0x194] sm:$0xf0] }
 0x2b3   : > { %v1731_v17 = vadd.f32 %v1730_v9, %v1717_v12  ;;  %v1758_v20 = vpop.f32.mrf.mxu0  ;;  %v5026_v9 = vor.u32 %v6022_v55, %v5025_v15  ;;  %v6004_v12 = vld [vmem:[#allocation8 + $0xd4] sm:$0xf0]  ;;  %v4985_v15 = vld [vmem:[#allocation8 + $0x110] sm:$0xf] }
 0x2b4   : > { %v6012_v55 = vld [vmem:[#allocation8 + $0x114] sm:$0xf0] }
 0x2b5   : > { %v1745_v18 = vadd.f32 %v1744_v14, %v1731_v17  ;;  %v6020_v14 = vld [vmem:[#allocation8 + $0x154] sm:$0xf0] }
 0x2b6   : > { %v6036_v17 = vld [vmem:[#allocation8 + $0x1d4] sm:$0xf0] }
 0x2b7   : > { %v1759_v25 = vadd.f32 %v1758_v20, %v1745_v18  ;;  %v4881_v18 = vld [vmem:[#allocation8 + $0x40] sm:$0xf]  ;;  %v5986_v20 = vld [vmem:[#allocation8 + $0x44] sm:$0xf0] }
 0x2b8   : > { %v1770_v13 = vpop.f32.mrf.mxu1 }
 0x2b9   : > { %v1771_v21 = vadd.f32 %v1770_v13, %v1757_v8  ;;  %v5017_v13 = vld [vmem:[#allocation8 + $0x150] sm:$0xf]  ;;  %v4954_v8 = vor.u32 %v6004_v12, %v4953_v11  ;;  %v4986_v11 = vor.u32 %v6012_v55, %v4985_v15  ;;  %v5050_v12 = vor.u32 %v6028_v2, %v5049_v60  ;;  %v5329_v55 = vld [vmem:[#allocation8 + $0x3c0] sm:$0xf]  ;;  %v6098_v60 = vld [vmem:[#allocation8 + $0x3c4] sm:$0xf0] }
 0x2ba   : > { %v5330_v2 = vor.u32 %v6098_v60, %v5329_v55 }
 0x2bb   : > { %v1785_v27 = vadd.f32 %v1784_v19, %v1771_v21  ;;  %v4890_v19 = vor.u32 %v5988_v7, %v4889_v6  ;;  %v5018_v21 = vor.u32 %v6020_v14, %v5017_v13  ;;  %v4922_v6 = vor.u32 %v5996_v0, %v4921_v63  ;;  %v5978_v7 = vld [vmem:[#allocation8 + $0x4] sm:$0xf0]  ;;  %v4977_v13 = vld [vmem:[#allocation8 + $0x100] sm:$0xf] }
 0x2bc   : > { %v6010_v14 = vld [vmem:[#allocation8 + $0x104] sm:$0xf0] }
 0x2bd   : > { %v6082_v63 = vld [vmem:[#allocation8 + $0x344] sm:$0xf0] }
 0x2c0   : > { %v1772_v22 = vpop.f32.mrf.mxu1 }
 0x2c1   : > { %v1773_v26 = vadd.f32 %v1772_v22, %v1759_v25  ;;  %v5082_v22 = vor.u32 %v6036_v17, %v5081_v16  ;;  %v6002_v25 = vld [vmem:[#allocation8 + $0xc4] sm:$0xf0]  ;;  %v5041_v16 = vld [vmem:[#allocation8 + $0x180] sm:$0xf] }
 0x2c2   : > { %v6026_v17 = vld [vmem:[#allocation8 + $0x184] sm:$0xf0] }
 0x2c3   : > { %v1787_v30 = vadd.f32 %v1786_v29, %v1773_v26  ;;  %v5009_v26 = vld [vmem:[#allocation8 + $0x140] sm:$0xf]  ;;  %v6034_v29 = vld [vmem:[#allocation8 + $0x1c4] sm:$0xf0] }
 0x2c9   : > { %v1798_v23 = vpop.f32.mrf.mxu3 }
 0x2ca   : > { %v1799_v28 = vadd.f32 %v1798_v23, %v1785_v27  ;;  %v4945_v23 = vld [vmem:[#allocation8 + $0xc0] sm:$0xf]  ;;  %v6018_v27 = vld [vmem:[#allocation8 + $0x144] sm:$0xf0] }
 0x2cc   : > { %v1805_v32 = vmul.f32 0.2, %v1799_v28  ;;  %vm1803_vm10 = vcmp.ge.f32.partialorder %v1799_v28, 0.0 }
 0x2ce   : > { %v1807_v35 = vsel %vm1803_vm10, %v1799_v28, %v1805_v32  ;;  %v5073_v28 = vld [vmem:[#allocation8 + $0x1c0] sm:$0xf]  ;;  %v4873_v32 = vld [vmem:[#allocation8 + $0x30] sm:$0xf] }
 0x2d1   : > { %v1800_v31 = vpop.f32.mrf.mxu3 }
 0x2d2   : > { %v1801_v33 = vadd.f32 %v1800_v31, %v1787_v30  ;;  %v4882_v30 = vor.u32 %v5986_v20, %v4881_v18  ;;  %v4946_v31 = vor.u32 %v6002_v25, %v4945_v23  ;;  %v5225_v18 = vld [vmem:[#allocation8 + $0x2f0] sm:$0xf]  ;;  %v6072_v20 = vld [vmem:[#allocation8 + $0x2f4] sm:$0xf0] }
 0x2d3   : > { %v6088_v25 = vld [vmem:[#allocation8 + $0x374] sm:$0xf0] }
 0x2d4   : > { %vm1804_vm11 = vcmp.ge.f32.partialorder %v1801_v33, 0.0  ;;  %v1806_v34 = vmul.f32 0.2, %v1801_v33 }
 0x2d6   : > { %v1808_v36 = vsel %vm1804_vm11, %v1801_v33, %v1806_v34  ;;  %v5984_v33 = vld [vmem:[#allocation8 + $0x34] sm:$0xf0]  ;;  %v5010_v34 = vor.u32 %v6018_v27, %v5009_v26  ;;  %v5353_v26 = vld [vmem:[#allocation8 + $0x3f0] sm:$0xf] }
 0x2d7   : > { %v1809_v37 = vpack.c.bf16 %v1808_v36, %v1807_v35  ;;  %v5074_v35 = vor.u32 %v6034_v29, %v5073_v28  ;;  %v4937_v36 = vld [vmem:[#allocation8 + $0xb0] sm:$0xf]  ;;  %v4874_v46 = vor.u32 %v5984_v33, %v4873_v32  ;;  %v6104_v27 = vld [vmem:[#allocation8 + $0x3f4] sm:$0xf0]  ;;  %v4978_v28 = vor.u32 %v6010_v14, %v4977_v13 }
 0x2d8   : > { %v5042_v29 = vor.u32 %v6026_v17, %v5041_v16  ;;  %v5354_v33 = vor.u32 %v6104_v27, %v5353_v26  ;;  %v5321_v14 = vld [vmem:[#allocation8 + $0x3b0] sm:$0xf]  ;;  %v6096_v16 = vld [vmem:[#allocation8 + $0x3b4] sm:$0xf0]  ;;  %v5313_v27 = vld [vmem:[#allocation8 + $0x3a0] sm:$0xf] }
 0x2d9   : > { %1821 = vmatpush.bf16.msra.mxu0 %v1809_v37  ;;  %1841 = vmatpush.bf16.msrb.mxu1 %v1809_v37  ;;  %v5322_v17 = vor.u32 %v6096_v16, %v5321_v14  ;;  %v5609_v14 = vld [vmem:[#allocation8 + $0x5f0] sm:$0xf] }
 0x2da   : > { %1861 = vmatpush.bf16.msrb.mxu2 %v1809_v37  ;;  %1881 = vmatpush.bf16.msrb.mxu3 %v1809_v37 }
 0x2dc   : > { %4815 = vmatmul.msk.bf16.vlgmr.msra.gmra.mxu0 %vm435_vm0, %v1810_v38  ;;  %4817 = vmatmul.msk.bf16.vlgmr.msrb.gmra.mxu1 %vm435_vm0, %v4816_v39  ;;  %v5001_v38 = vld [vmem:[#allocation8 + $0x130] sm:$0xf]  ;;  %v6016_v39 = vld [vmem:[#allocation8 + $0x134] sm:$0xf0] }
 0x2dd   : > { %1901 = vmatpush.bf16.msrb.mxu0 %v1809_v37  ;;  %1921 = vmatpush.bf16.msra.mxu1 %v1809_v37  ;;  %v5002_v47 = vor.u32 %v6016_v39, %v5001_v38  ;;  %v6070_v38 = vld [vmem:[#allocation8 + $0x2e4] sm:$0xf0]  ;;  %v5281_v39 = vld [vmem:[#allocation8 + $0x360] sm:$0xf] }
 0x2de   : > { %1941 = vmatpush.bf16.msra.mxu2 %v1809_v37  ;;  %1961 = vmatpush.bf16.msra.mxu3 %v1809_v37 }
 0x2df   : > { %4819 = vmatmul.msk.bf16.vlgmr.msrb.gmra.mxu2 %vm435_vm0, %v4818_v40  ;;  %4821 = vmatmul.msk.bf16.vlgmr.msrb.gmra.mxu3 %vm435_vm0, %v4820_v41  ;;  %v5065_v40 = vld [vmem:[#allocation8 + $0x1b0] sm:$0xf]  ;;  %v6032_v41 = vld [vmem:[#allocation8 + $0x1b4] sm:$0xf0] }
 0x2e0   : > { %v5066_v48 = vor.u32 %v6032_v41, %v5065_v40  ;;  %v6086_v40 = vld [vmem:[#allocation8 + $0x364] sm:$0xf0] }
 0x2e1   : > { %1981 = vmatpush.bf16.msra.mxu0 %v1809_v37  ;;  %2001 = vmatpush.bf16.msrb.mxu1 %v1809_v37 }
 0x2e2   : > { %2021 = vmatpush.bf16.msrb.mxu2 %v1809_v37  ;;  %2041 = vmatpush.bf16.msrb.mxu3 %v1809_v37 }
 0x2ec   : > { %4823 = vmatmul.msk.bf16.vlgmr.msrb.gmra.mxu0 %vm435_vm0, %v4822_v42  ;;  %4825 = vmatmul.msk.bf16.vlgmr.msra.gmra.mxu1 %vm435_vm0, %v4824_v43  ;;  %v4842_v42 = vld [vmem:[%s7092_s4 + $0x1c] sm:$0x3]  ;;  %v4838_v43 = vld [vmem:[%s7092_s4 + $0x18] sm:$0x3] }
 0x2ed   : > { %2061 = vmatpush.bf16.msrb.mxu0 %v1809_v37  ;;  %2081 = vmatpush.bf16.msra.mxu1 %v1809_v37 }
 0x2ef   : > { %4827 = vmatmul.msk.bf16.vlgmr.msra.gmra.mxu2 %vm435_vm0, %v4826_v44  ;;  %4829 = vmatmul.msk.bf16.vlgmr.msra.gmra.mxu3 %vm435_vm0, %v4828_v45  ;;  %v4840_v44 = vld [vmem:[%s7092_s4 + $0x1a] sm:$0x3]  ;;  %v4844_v45 = vld [vmem:[%s7092_s4 + $0x1e] sm:$0x3] }
 0x2f0   : > { %2101 = vmatpush.bf16.msra.mxu2 %v1809_v37  ;;  %2121 = vmatpush.bf16.msra.mxu3 %v1809_v37  ;;  %v6000_v37 = vld [vmem:[#allocation8 + $0xb4] sm:$0xf0] }
 0x2f1   : > { %v4938_v1 = vor.u32 %v6000_v37, %v4937_v36  ;;  %v5217_v36 = vld [vmem:[#allocation8 + $0x2e0] sm:$0xf] }
 0x2f2   : > { %v5218_v41 = vor.u32 %v6070_v38, %v5217_v36  ;;  %v6076_v36 = vld [vmem:[#allocation8 + $0x314] sm:$0xf0] }
 0x2fc   : > { %4831 = vmatmul.msk.bf16.vlgmr.msra.gmra.mxu0 %vm435_vm0, %v4830_v24  ;;  %4833 = vmatmul.msk.bf16.vlgmr.msrb.gmra.mxu1 %vm435_vm0, %v4832_v51  ;;  %v6014_v24 = vld [vmem:[#allocation8 + $0x124] sm:$0xf0]  ;;  %v5057_v51 = vld [vmem:[#allocation8 + $0x1a0] sm:$0xf] }
 0x2fd   : > { %3717 = vmatpush.bf16.msra.mxu0 %v4906_v53  ;;  %3730 = vmatpush.bf16.msrb.mxu1 %v4970_v54  ;;  %v4866_v53 = vor.u32 %v5982_v62, %v4865_v5  ;;  %v4930_v54 = vor.u32 %v5998_v50, %v4929_v49  ;;  %v5209_v5 = vld [vmem:[#allocation8 + $0x2d0] sm:$0xf]  ;;  %v6084_v49 = vld [vmem:[#allocation8 + $0x354] sm:$0xf0] }
 0x2ff   : > { %4835 = vmatmul.msk.bf16.vlgmr.msrb.gmra.mxu2 %vm435_vm0, %v4834_v59  ;;  %4837 = vmatmul.msk.bf16.vlgmr.msrb.gmra.mxu3 %vm435_vm0, %v4836_v52  ;;  %v4993_v59 = vld [vmem:[#allocation8 + $0x120] sm:$0xf]  ;;  %v6030_v52 = vld [vmem:[#allocation8 + $0x1a4] sm:$0xf0] }
 0x300   : > { %3743 = vmatpush.bf16.msrb.mxu2 %v5034_v58  ;;  %3756 = vmatpush.bf16.msrb.mxu3 %v5098_v61  ;;  %v4994_v58 = vor.u32 %v6014_v24, %v4993_v59  ;;  %v5058_v61 = vor.u32 %v6030_v52, %v5057_v51  ;;  %v5337_v24 = vld [vmem:[#allocation8 + $0x3d0] sm:$0xf]  ;;  %v6100_v51 = vld [vmem:[#allocation8 + $0x3d4] sm:$0xf0] }
 0x301   : > { %3718 = vmatpush.bf16.msra.mxu0 %v4898_v3  ;;  %3731 = vmatpush.bf16.msrb.mxu1 %v4962_v4  ;;  %v4849_v3 = vld [vmem:[#allocation8] sm:$0xf]  ;;  %v4858_v4 = vor.u32 %v5980_v57, %v4857_v56  ;;  %v5338_v52 = vor.u32 %v6100_v51, %v5337_v24 }
 0x302   : > { %v5201_v56 = vld [vmem:[#allocation8 + $0x2c0] sm:$0xf] }
 0x304   : > { %3744 = vmatpush.bf16.msrb.mxu2 %v5026_v9  ;;  %3757 = vmatpush.bf16.msrb.mxu3 %v5090_v10  ;;  %v4913_v9 = vld [vmem:[#allocation8 + $0x80] sm:$0xf]  ;;  %v5994_v10 = vld [vmem:[#allocation8 + $0x84] sm:$0xf0] }
 0x305   : > { %3719 = vmatpush.bf16.msra.mxu0 %v4890_v19  ;;  %3732 = vmatpush.bf16.msrb.mxu1 %v4954_v8  ;;  %v5161_v19 = vld [vmem:[#allocation8 + $0x270] sm:$0xf]  ;;  %v6056_v8 = vld [vmem:[#allocation8 + $0x274] sm:$0xf0]  ;;  %v4914_v23 = vor.u32 %v5994_v10, %v4913_v9 }
 0x306   : > { %v6064_v9 = vld [vmem:[#allocation8 + $0x2b4] sm:$0xf0]  ;;  %v5257_v10 = vld [vmem:[#allocation8 + $0x330] sm:$0xf] }
 0x308   : > { %3745 = vmatpush.bf16.msrb.mxu2 %v5018_v21  ;;  %3758 = vmatpush.bf16.msrb.mxu3 %v5082_v22  ;;  %v5289_v21 = vld [vmem:[#allocation8 + $0x370] sm:$0xf]  ;;  %v4850_v22 = vor.u32 %v5978_v7, %v4849_v3 }
 0x309   : > { %3720 = vmatpush.bf16.msra.mxu0 %v4882_v30  ;;  %3733 = vmatpush.bf16.msrb.mxu1 %v4946_v31  ;;  %v5162_v30 = vor.u32 %v6056_v8, %v5161_v19  ;;  %v5226_v31 = vor.u32 %v6072_v20, %v5225_v18  ;;  %v5290_v32 = vor.u32 %v6088_v25, %v5289_v21  ;;  %v5129_v3 = vld [vmem:[#allocation8 + $0x230] sm:$0xf]  ;;  %v5121_v19 = vld [vmem:[#allocation8 + $0x220] sm:$0xf]  ;;  %v6046_v8 = vld [vmem:[#allocation8 + $0x224] sm:$0xf0] }
 0x30a   : > { %v5185_v18 = vld [vmem:[#allocation8 + $0x2a0] sm:$0xf]  ;;  %v5122_v20 = vor.u32 %v6046_v8, %v5121_v19  ;;  %v6062_v21 = vld [vmem:[#allocation8 + $0x2a4] sm:$0xf0]  ;;  %v6168_v8 = vld [vmem:[#allocation8 + $0x5f4] sm:$0xf0] }
 0x30b   : > { %v5186_v25 = vor.u32 %v6062_v21, %v5185_v18  ;;  %v5409_v18 = vld [vmem:[#allocation8 + $0x460] sm:$0xf] }
 0x30c   : > { %3746 = vmatpush.bf16.msrb.mxu2 %v5010_v34  ;;  %3759 = vmatpush.bf16.msrb.mxu3 %v5074_v35  ;;  %v5153_v34 = vld [vmem:[#allocation8 + $0x260] sm:$0xf]  ;;  %v6054_v35 = vld [vmem:[#allocation8 + $0x264] sm:$0xf0] }
 0x30d   : > { %4839 = vmatmul.msk.bf16.vlgmr.msrb.gmra.mxu0 %vm435_vm0, %v4838_v43  ;;  %4841 = vmatmul.msk.bf16.vlgmr.msra.gmra.mxu1 %vm435_vm0, %v4840_v44  ;;  %v5154_v37 = vor.u32 %v6054_v35, %v5153_v34  ;;  %v5345_v43 = vld [vmem:[#allocation8 + $0x3e0] sm:$0xf]  ;;  %v6102_v44 = vld [vmem:[#allocation8 + $0x3e4] sm:$0xf0]  ;;  %v6060_v34 = vld [vmem:[#allocation8 + $0x294] sm:$0xf0] }
 0x30e   : > { %3721 = vmatpush.bf16.msra.mxu0 %v4874_v46  ;;  %3734 = vmatpush.bf16.msrb.mxu1 %v4938_v1  ;;  %v5145_v46 = vld [vmem:[#allocation8 + $0x250] sm:$0xf]  ;;  %v6052_v1 = vld [vmem:[#allocation8 + $0x254] sm:$0xf0] }
 0x30f   : > { %4843 = vmatmul.msk.bf16.vlgmr.msra.gmra.mxu2 %vm435_vm0, %v4842_v42  ;;  %4845 = vmatmul.msk.bf16.vlgmr.msra.gmra.mxu3 %vm435_vm0, %v4844_v45  ;;  %v5282_v42 = vor.u32 %v6086_v40, %v5281_v39  ;;  %v5346_v45 = vor.u32 %v6102_v44, %v5345_v43  ;;  %v5146_v62 = vor.u32 %v6052_v1, %v5145_v46  ;;  %v5241_v35 = vld [vmem:[#allocation8 + $0x310] sm:$0xf]  ;;  %v6092_v40 = vld [vmem:[#allocation8 + $0x394] sm:$0xf0]  ;;  %v6042_v43 = vld [vmem:[#allocation8 + $0x204] sm:$0xf0] }
 0x310   : > { %3747 = vmatpush.bf16.msrb.mxu2 %v5002_v47  ;;  %3760 = vmatpush.bf16.msrb.mxu3 %v5066_v48  ;;  %v6068_v47 = vld [vmem:[#allocation8 + $0x2d4] sm:$0xf0]  ;;  %v5273_v48 = vld [vmem:[#allocation8 + $0x350] sm:$0xf]  ;;  %v5242_v38 = vor.u32 %v6076_v36, %v5241_v35  ;;  %v5169_v44 = vld [vmem:[#allocation8 + $0x280] sm:$0xf] }
 0x311   : > { %v5210_v50 = vor.u32 %v6068_v47, %v5209_v5  ;;  %v5274_v59 = vor.u32 %v6084_v49, %v5273_v48  ;;  %v5305_v39 = vld [vmem:[#allocation8 + $0x390] sm:$0xf]  ;;  %v6058_v46 = vld [vmem:[#allocation8 + $0x284] sm:$0xf0]  ;;  %v5233_v1 = vld [vmem:[#allocation8 + $0x300] sm:$0xf] }
 0x312   : > { %3722 = vmatpush.bf16.msra.mxu0 %v4866_v53  ;;  %3735 = vmatpush.bf16.msrb.mxu1 %v4930_v54  ;;  %v5137_v53 = vld [vmem:[#allocation8 + $0x240] sm:$0xf]  ;;  %v6050_v54 = vld [vmem:[#allocation8 + $0x244] sm:$0xf0]  ;;  %vm4298_vm0 = vcmask 1040384  }
 0x313   : > { %v5138_v57 = vor.u32 %v6050_v54, %v5137_v53  ;;  %v6074_v5 = vld [vmem:[#allocation8 + $0x304] sm:$0xf0]  ;;  %v5297_v48 = vld [vmem:[#allocation8 + $0x380] sm:$0xf] }
 0x314   : > { %3748 = vmatpush.bf16.msrb.mxu2 %v4994_v58  ;;  %3761 = vmatpush.bf16.msrb.mxu3 %v5058_v61  ;;  %v6066_v58 = vld [vmem:[#allocation8 + $0x2c4] sm:$0xf0]  ;;  %v5265_v61 = vld [vmem:[#allocation8 + $0x340] sm:$0xf]  ;;  %v5234_v47 = vor.u32 %v6074_v5, %v5233_v1  ;;  %v5529_v1 = vld [vmem:[#allocation8 + $0x550] sm:$0xf] }
 0x315   : > { %v5202_v0 = vor.u32 %v6066_v58, %v5201_v56  ;;  %v5266_v15 = vor.u32 %v6082_v63, %v5265_v61  ;;  %v6090_v49 = vld [vmem:[#allocation8 + $0x384] sm:$0xf0]  ;;  %v6148_v5 = vld [vmem:[#allocation8 + $0x554] sm:$0xf0] }
 0x316   : > { %3723 = vmatpush.bf16.msra.mxu0 %v4858_v4  ;;  %3736 = vmatpush.bf16.msrb.mxu1 %v4922_v6  ;;  %v6048_v4 = vld [vmem:[#allocation8 + $0x234] sm:$0xf0]  ;;  %v5193_v6 = vld [vmem:[#allocation8 + $0x2b0] sm:$0xf] }
 0x317   : > { %v5130_v7 = vor.u32 %v6048_v4, %v5129_v3  ;;  %v5417_v4 = vld [vmem:[#allocation8 + $0x470] sm:$0xf] }
 0x318   : > { %3749 = vmatpush.bf16.msrb.mxu2 %v4986_v11  ;;  %3762 = vmatpush.bf16.msrb.mxu3 %v5050_v12  ;;  %v6080_v11 = vld [vmem:[#allocation8 + $0x334] sm:$0xf0]  ;;  %v5194_v12 = vor.u32 %v6064_v9, %v5193_v6 }
 0x319   : > { %v5258_v13 = vor.u32 %v6080_v11, %v5257_v10  ;;  %v6120_v6 = vld [vmem:[#allocation8 + $0x474] sm:$0xf0] }
 0x31a   : > { %3724 = vmatpush.bf16.msra.mxu0 %v4850_v22  ;;  %3737 = vmatpush.bf16.msrb.mxu1 %v4914_v23  ;;  %v5249_v22 = vld [vmem:[#allocation8 + $0x320] sm:$0xf]  ;;  %v6078_v23 = vld [vmem:[#allocation8 + $0x324] sm:$0xf0]  ;;  %v6136_v9 = vld [vmem:[#allocation8 + $0x4f4] sm:$0xf0]  ;;  %v5418_v19 = vor.u32 %v6120_v6, %v5417_v4 }
 0x31b   : > { %v5250_v26 = vor.u32 %v6078_v23, %v5249_v22  ;;  %v5473_v23 = vld [vmem:[#allocation8 + $0x4e0] sm:$0xf] }
 0x31c   : > { %3750 = vmatpush.bf16.msrb.mxu2 %v4978_v28  ;;  %3763 = vmatpush.bf16.msrb.mxu3 %v5042_v29  ;;  %v6094_v28 = vld [vmem:[#allocation8 + $0x3a4] sm:$0xf0] }
 0x31d   : > { %v5314_v29 = vor.u32 %v6094_v28, %v5313_v27  ;;  %v6150_v27 = vld [vmem:[#allocation8 + $0x564] sm:$0xf0] }
 0x31e   : > { %3769 = vmatpush.bf16.msrb.mxu0 %v5162_v30  ;;  %3782 = vmatpush.bf16.msra.mxu1 %v5226_v31  ;;  %v5113_v30 = vld [vmem:[#allocation8 + $0x210] sm:$0xf]  ;;  %v6044_v31 = vld [vmem:[#allocation8 + $0x214] sm:$0xf0] }
 0x320   : > { %3795 = vmatpush.bf16.msra.mxu2 %v5290_v32  ;;  %3808 = vmatpush.bf16.msra.mxu3 %v5354_v33  ;;  %v5177_v32 = vld [vmem:[#allocation8 + $0x290] sm:$0xf]  ;;  %v5114_v33 = vor.u32 %v6044_v31, %v5113_v30  ;;  %v5601_v31 = vld [vmem:[#allocation8 + $0x5e0] sm:$0xf] }
 0x322   : > { %3770 = vmatpush.bf16.msrb.mxu0 %v5154_v37  ;;  %3783 = vmatpush.bf16.msra.mxu1 %v5218_v41  ;;  %v5178_v37 = vor.u32 %v6060_v34, %v5177_v32  ;;  %v5306_v41 = vor.u32 %v6092_v40, %v5305_v39  ;;  %v6166_v32 = vld [vmem:[#allocation8 + $0x5e4] sm:$0xf0]  ;;  %v5610_v34 = vor.u32 %v6168_v8, %v5609_v14  ;;  %v6116_v39 = vld [vmem:[#allocation8 + $0x454] sm:$0xf0] }
 0x323   : > { %v6144_v14 = vld [vmem:[#allocation8 + $0x534] sm:$0xf0] }
 0x324   : > { %3796 = vmatpush.bf16.msra.mxu2 %v5282_v42  ;;  %3809 = vmatpush.bf16.msra.mxu3 %v5346_v45  ;;  %v5105_v42 = vld [vmem:[#allocation8 + $0x200] sm:$0xf] }
 0x325   : > { %v5106_v45 = vor.u32 %v6042_v43, %v5105_v42  ;;  %v5465_v42 = vld [vmem:[#allocation8 + $0x4d0] sm:$0xf]  ;;  %v5602_v43 = vor.u32 %v6166_v32, %v5601_v31 }
 0x326   : > { %3771 = vmatpush.bf16.msrb.mxu0 %v5146_v62  ;;  %3784 = vmatpush.bf16.msra.mxu1 %v5210_v50  ;;  %v5170_v62 = vor.u32 %v6058_v46, %v5169_v44  ;;  %v5298_v50 = vor.u32 %v6090_v49, %v5297_v48  ;;  %v6132_v46 = vld [vmem:[#allocation8 + $0x4d4] sm:$0xf0] }
 0x327   : > { %v6164_v48 = vld [vmem:[#allocation8 + $0x5d4] sm:$0xf0] }
 0x328   : > { %3797 = vmatpush.bf16.msra.mxu2 %v5274_v59  ;;  %3810 = vmatpush.bf16.msra.mxu3 %v5338_v52 }
 0x32a   : > { %3772 = vmatpush.bf16.msrb.mxu0 %v5138_v57  ;;  %3785 = vmatpush.bf16.msra.mxu1 %v5202_v0 }
 0x32c   : > { %3798 = vmatpush.bf16.msra.mxu2 %v5266_v15  ;;  %3811 = vmatpush.bf16.msra.mxu3 %v5330_v2 }
 0x32e   : > { %3773 = vmatpush.bf16.msrb.mxu0 %v5130_v7  ;;  %3786 = vmatpush.bf16.msra.mxu1 %v5194_v12  ;;  %v5481_v7 = vld [vmem:[#allocation8 + $0x4f0] sm:$0xf] }
 0x32f   : > { %v5545_v12 = vld [vmem:[#allocation8 + $0x570] sm:$0xf] }
 0x330   : > { %3799 = vmatpush.bf16.msra.mxu2 %v5258_v13  ;;  %3812 = vmatpush.bf16.msra.mxu3 %v5322_v17  ;;  %v6152_v13 = vld [vmem:[#allocation8 + $0x574] sm:$0xf0] }
 0x331   : > { %v5546_v30 = vor.u32 %v6152_v13, %v5545_v12  ;;  %v5513_v13 = vld [vmem:[#allocation8 + $0x530] sm:$0xf] }
 0x332   : > { %3774 = vmatpush.bf16.msrb.mxu0 %v5122_v20  ;;  %3787 = vmatpush.bf16.msra.mxu1 %v5186_v25  ;;  %v6118_v20 = vld [vmem:[#allocation8 + $0x464] sm:$0xf0]  ;;  %v5514_v32 = vor.u32 %v6144_v14, %v5513_v13  ;;  %v5801_v13 = vld [vmem:[#allocation8 + $0x770] sm:$0xf]  ;;  %v6216_v14 = vld [vmem:[#allocation8 + $0x774] sm:$0xf0] }
 0x333   : > { %v6134_v25 = vld [vmem:[#allocation8 + $0x4e4] sm:$0xf0] }
 0x334   : > { %3800 = vmatpush.bf16.msra.mxu2 %v5250_v26  ;;  %3813 = vmatpush.bf16.msra.mxu3 %v5314_v29  ;;  %v5537_v26 = vld [vmem:[#allocation8 + $0x560] sm:$0xf]  ;;  %v5482_v29 = vor.u32 %v6136_v9, %v5481_v7  ;;  %v5474_v40 = vor.u32 %v6134_v25, %v5473_v23  ;;  %v5449_v7 = vld [vmem:[#allocation8 + $0x4b0] sm:$0xf]  ;;  %v6128_v9 = vld [vmem:[#allocation8 + $0x4b4] sm:$0xf0] }
 0x335   : > { %v5441_v25 = vld [vmem:[#allocation8 + $0x4a0] sm:$0xf]  ;;  %v5450_v31 = vor.u32 %v6128_v9, %v5449_v7  ;;  %v6184_v7 = vld [vmem:[#allocation8 + $0x674] sm:$0xf0] }
 0x336   : > { %3775 = vmatpush.bf16.msrb.mxu0 %v5114_v33  ;;  %3788 = vmatpush.bf16.msra.mxu1 %v5178_v37  ;;  %v5410_v37 = vor.u32 %v6118_v20, %v5409_v18  ;;  %v6160_v18 = vld [vmem:[#allocation8 + $0x5b4] sm:$0xf0]  ;;  %v5377_v20 = vld [vmem:[#allocation8 + $0x420] sm:$0xf] }
 0x338   : > { %3801 = vmatpush.bf16.msra.mxu2 %v5242_v38  ;;  %3814 = vmatpush.bf16.msra.mxu3 %v5306_v41  ;;  %v5401_v38 = vld [vmem:[#allocation8 + $0x450] sm:$0xf]  ;;  %v5538_v41 = vor.u32 %v6150_v27, %v5537_v26  ;;  %v6126_v26 = vld [vmem:[#allocation8 + $0x4a4] sm:$0xf0]  ;;  %v5505_v27 = vld [vmem:[#allocation8 + $0x520] sm:$0xf] }
 0x33a   : > { %3776 = vmatpush.bf16.msrb.mxu0 %v5106_v45  ;;  %3789 = vmatpush.bf16.msra.mxu1 %v5170_v62  ;;  %v5402_v62 = vor.u32 %v6116_v39, %v5401_v38 }
 0x33c   : > { %3802 = vmatpush.bf16.msra.mxu2 %v5234_v47  ;;  %3815 = vmatpush.bf16.msra.mxu3 %v5298_v50  ;;  %v5593_v47 = vld [vmem:[#allocation8 + $0x5d0] sm:$0xf] }
 0x359   : > { %v1823_v59 = vpop.f32.mrf.mxu0  ;;  %v1843_v24 = vpop.f32.mrf.mxu1 }
 0x35a   : > { %v1827_v51 = vpack.c.bf16 %v1823_v59, %v1823_v59  ;;  %v1847_v52 = vpack.c.bf16 %v1843_v24, %v1843_v24  ;;  %v5393_v59 = vld [vmem:[#allocation8 + $0x440] sm:$0xf]  ;;  %v6114_v24 = vld [vmem:[#allocation8 + $0x444] sm:$0xf0] }
 0x35c   : > { %1828 = vst [vmem:[#allocation3] sm:$0x3] %v1827_v51 }
 0x35d   : > { %1848 = vst [vmem:[#allocation3 + $0x2] sm:$0x3] %v1847_v52 }
 0x361   : > { %v1825_v58 = vpop.f32.mrf.mxu0  ;;  %v1845_v61 = vpop.f32.mrf.mxu1 }
 0x362   : > { %v1863_v53 = vpop.f32.mrf.mxu2  ;;  %v1883_v54 = vpop.f32.mrf.mxu3  ;;  %v6130_v58 = vld [vmem:[#allocation8 + $0x4c4] sm:$0xf0]  ;;  %v5594_v61 = vor.u32 %v6164_v48, %v5593_v47  ;;  %v5497_v47 = vld [vmem:[#allocation8 + $0x510] sm:$0xf]  ;;  %v6140_v48 = vld [vmem:[#allocation8 + $0x514] sm:$0xf0] }
 0x363   : > { %v1867_v56 = vpack.c.bf16 %v1863_v53, %v1863_v53  ;;  %v1887_v57 = vpack.c.bf16 %v1883_v54, %v1883_v54  ;;  %v5466_v54 = vor.u32 %v6132_v46, %v5465_v42  ;;  %v5369_v42 = vld [vmem:[#allocation8 + $0x410] sm:$0xf] }
 0x365   : > { %1868 = vst [vmem:[#allocation3 + $0x4] sm:$0x3] %v1867_v56  ;;  %v5530_v56 = vor.u32 %v6148_v5, %v5529_v1  ;;  %v5433_v1 = vld [vmem:[#allocation8 + $0x490] sm:$0xf]  ;;  %v6124_v5 = vld [vmem:[#allocation8 + $0x494] sm:$0xf0] }
 0x366   : > { %1888 = vst [vmem:[#allocation3 + $0x6] sm:$0x3] %v1887_v57  ;;  %v5457_v57 = vld [vmem:[#allocation8 + $0x4c0] sm:$0xf] }
 0x367   : > { %v5458_v4 = vor.u32 %v6130_v58, %v5457_v57  ;;  %v5425_v57 = vld [vmem:[#allocation8 + $0x480] sm:$0xf]  ;;  %v6122_v58 = vld [vmem:[#allocation8 + $0x484] sm:$0xf0] }
 0x369   : > { %v1903_v15 = vpop.f32.mrf.mxu0  ;;  %v1923_v55 = vpop.f32.mrf.mxu1 }
 0x36a   : > { %v1865_v63 = vpop.f32.mrf.mxu2  ;;  %v1885_v0 = vpop.f32.mrf.mxu3  ;;  %v1907_v60 = vpack.c.bf16 %v1903_v15, %v1903_v15  ;;  %v1927_v2 = vpack.c.bf16 %v1923_v55, %v1923_v55  ;;  %v5394_v15 = vor.u32 %v6114_v24, %v5393_v59  ;;  %v5585_v55 = vld [vmem:[#allocation8 + $0x5c0] sm:$0xf] }
 0x36b   : > { %v5521_v63 = vld [vmem:[#allocation8 + $0x540] sm:$0xf]  ;;  %v6146_v0 = vld [vmem:[#allocation8 + $0x544] sm:$0xf0] }
 0x36c   : > { %1908 = vst [vmem:[#allocation3 + $0x8] sm:$0x3] %v1907_v60  ;;  %v6162_v60 = vld [vmem:[#allocation8 + $0x5c4] sm:$0xf0]  ;;  %v5522_v6 = vor.u32 %v6146_v0, %v5521_v63 }
 0x36d   : > { %v2129_v3 = vld [vmem:[#allocation3] sm:$0xff]  ;;  %1928 = vst [vmem:[#allocation3 + $0xa] sm:$0x3] %v1927_v2  ;;  %v5385_v2 = vld [vmem:[#allocation8 + $0x430] sm:$0xf] }
 0x36e   : > { %2397 = vst [vmem:[#allocation1] ss:$4 sm:$0xff] %v2129_v3  ;;  %v6112_v3 = vld [vmem:[#allocation8 + $0x434] sm:$0xf0]  ;;  %v6138_v63 = vld [vmem:[#allocation8 + $0x504] sm:$0xf0] }
 0x36f   : > { %v5386_v8 = vor.u32 %v6112_v3, %v5385_v2  ;;  %v5498_v2 = vor.u32 %v6140_v48, %v5497_v47  ;;  %v5553_v3 = vld [vmem:[#allocation8 + $0x580] sm:$0xf] }
 0x371   : > { %v1905_v21 = vpop.f32.mrf.mxu0  ;;  %v1925_v22 = vpop.f32.mrf.mxu1 }
 0x372   : > { %v1943_v10 = vpop.f32.mrf.mxu2  ;;  %v1963_v11 = vpop.f32.mrf.mxu3  ;;  %v6110_v21 = vld [vmem:[#allocation8 + $0x424] sm:$0xf0] }
 0x373   : > { %v1947_v16 = vpack.c.bf16 %v1943_v10, %v1943_v10  ;;  %v1967_v17 = vpack.c.bf16 %v1963_v11, %v1963_v11  ;;  %v5586_v10 = vor.u32 %v6162_v60, %v5585_v55  ;;  %v5434_v60 = vor.u32 %v6124_v5, %v5433_v1  ;;  %v6180_v1 = vld [vmem:[#allocation8 + $0x654] sm:$0xf0] }
 0x375   : > { %1948 = vst [vmem:[#allocation3 + $0xc] sm:$0x3] %v1947_v16  ;;  %v6975_v28 = vld.sshfl [vmem:[#allocation1] sm:$0xff pattern:$0x73625140] }
 0x376   : > { %1968 = vst [vmem:[#allocation3 + $0xe] sm:$0x3] %v1967_v17  ;;  %3725 = vmatmul.bf16.vlgmr.msra.gmra.mxu0 %v6975_v28  ;;  %v6978_v33 = vld.sshfl [vmem:[#allocation1 + $0x8] sm:$0xff pattern:$0x73625140] }
 0x377   : > { %3738 = vmatmul.bf16.vlgmr.msrb.gmra.mxu1 %v6978_v33  ;;  %v6981_v35 = vld.sshfl [vmem:[#allocation1 + $0x10] sm:$0xff pattern:$0x73625140]  ;;  %v6983_v36 = vld.sshfl [vmem:[#allocation1 + $0x18] sm:$0xff pattern:$0x73625140]  ;;  %3821 = vmatpush.bf16.msra.mxu0 %v5418_v19 }
 0x378   : > { %3751 = vmatmul.bf16.vlgmr.msrb.gmra.mxu2 %v6981_v35  ;;  %3764 = vmatmul.bf16.vlgmr.msrb.gmra.mxu3 %v6983_v36  ;;  %v5577_v16 = vld [vmem:[#allocation8 + $0x5b0] sm:$0xf] }
 0x379   : > { %3834 = vmatpush.bf16.msrb.mxu1 %v5482_v29  ;;  %3847 = vmatpush.bf16.msrb.mxu2 %v5546_v30  ;;  %v1983_v49 = vpop.f32.mrf.mxu0  ;;  %v2003_v50 = vpop.f32.mrf.mxu1  ;;  %v6142_v29 = vld [vmem:[#allocation8 + $0x524] sm:$0xf0]  ;;  %v5578_v39 = vor.u32 %v6160_v18, %v5577_v16 }
 0x37a   : > { %3860 = vmatpush.bf16.msrb.mxu3 %v5610_v34  ;;  %v1945_v44 = vpop.f32.mrf.mxu2  ;;  %v1965_v45 = vpop.f32.mrf.mxu3  ;;  %v1987_v51 = vpack.c.bf16 %v1983_v49, %v1983_v49  ;;  %v2007_v52 = vpack.c.bf16 %v2003_v50, %v2003_v50  ;;  %v5569_v34 = vld [vmem:[#allocation8 + $0x5a0] sm:$0xf]  ;;  %v5506_v46 = vor.u32 %v6142_v29, %v5505_v27  ;;  %v5561_v49 = vld [vmem:[#allocation8 + $0x590] sm:$0xf] }
 0x37b   : > { %3822 = vmatpush.bf16.msra.mxu0 %v5410_v37  ;;  %v6158_v37 = vld [vmem:[#allocation8 + $0x5a4] sm:$0xf0]  ;;  %v6108_v44 = vld [vmem:[#allocation8 + $0x414] sm:$0xf0]  ;;  %v5442_v45 = vor.u32 %v6126_v26, %v5441_v25  ;;  %v5729_v25 = vld [vmem:[#allocation8 + $0x6e0] sm:$0xf] }
 0x37c   : > { %1988 = vst [vmem:[#allocation3 + $0x10] sm:$0x3] %v1987_v51  ;;  %v5370_v24 = vor.u32 %v6108_v44, %v5369_v42  ;;  %v6156_v51 = vld [vmem:[#allocation8 + $0x594] sm:$0xf0]  ;;  %v6198_v26 = vld [vmem:[#allocation8 + $0x6e4] sm:$0xf0] }
 0x37d   : > { %v2130_v53 = vld [vmem:[#allocation3 + $0x8] sm:$0xff]  ;;  %3835 = vmatpush.bf16.msrb.mxu1 %v5474_v40  ;;  %3848 = vmatpush.bf16.msrb.mxu2 %v5538_v41  ;;  %2008 = vst [vmem:[#allocation3 + $0x12] sm:$0x3] %v2007_v52  ;;  %v5378_v41 = vor.u32 %v6110_v21, %v5377_v20  ;;  %v5562_v9 = vor.u32 %v6156_v51, %v5561_v49  ;;  %v5721_v49 = vld [vmem:[#allocation8 + $0x6d0] sm:$0xf] }
 0x37e   : > { %2400 = vst [vmem:[#allocation1 + $0x20] ss:$4 sm:$0xff] %v2130_v53  ;;  %3861 = vmatpush.bf16.msrb.mxu3 %v5602_v43  ;;  %v5361_v52 = vld [vmem:[#allocation8 + $0x400] sm:$0xf]  ;;  %v6106_v53 = vld [vmem:[#allocation8 + $0x404] sm:$0xf0] }
 0x37f   : > { %3823 = vmatpush.bf16.msra.mxu0 %v5402_v62  ;;  %v5570_v62 = vor.u32 %v6158_v37, %v5569_v34  ;;  %v5665_v20 = vld [vmem:[#allocation8 + $0x660] sm:$0xf]  ;;  %v6214_v37 = vld [vmem:[#allocation8 + $0x764] sm:$0xf0] }
 0x380   : > { %v5793_v34 = vld [vmem:[#allocation8 + $0x760] sm:$0xf] }
 0x381   : > { %3836 = vmatpush.bf16.msrb.mxu1 %v5466_v54  ;;  %3849 = vmatpush.bf16.msrb.mxu2 %v5530_v56  ;;  %v1985_v22 = vpop.f32.mrf.mxu0  ;;  %v2005_v23 = vpop.f32.mrf.mxu1  ;;  %v5794_v51 = vor.u32 %v6214_v37, %v5793_v34  ;;  %v5697_v37 = vld [vmem:[#allocation8 + $0x6a0] sm:$0xf] }
 0x382   : > { %3862 = vmatpush.bf16.msrb.mxu3 %v5594_v61  ;;  %v2023_v11 = vpop.f32.mrf.mxu2  ;;  %v2043_v12 = vpop.f32.mrf.mxu3  ;;  %v5489_v61 = vld [vmem:[#allocation8 + $0x500] sm:$0xf]  ;;  %v6182_v23 = vld [vmem:[#allocation8 + $0x664] sm:$0xf0] }
 0x383   : > { %3824 = vmatpush.bf16.msra.mxu0 %v5394_v15  ;;  %v2027_v17 = vpack.c.bf16 %v2023_v11, %v2023_v11  ;;  %v2047_v19 = vpack.c.bf16 %v2043_v12, %v2043_v12  ;;  %v6200_v11 = vld [vmem:[#allocation8 + $0x6f4] sm:$0xf0]  ;;  %v5362_v12 = vor.u32 %v6106_v53, %v5361_v52  ;;  %v5490_v18 = vor.u32 %v6138_v63, %v5489_v61  ;;  %v5785_v53 = vld [vmem:[#allocation8 + $0x750] sm:$0xf] }
 0x384   : > { %v5666_v48 = vor.u32 %v6182_v23, %v5665_v20  ;;  %v5833_v23 = vld [vmem:[#allocation8 + $0x7b0] sm:$0xf] }
 0x385   : > { %3837 = vmatpush.bf16.msrb.mxu1 %v5458_v4  ;;  %3850 = vmatpush.bf16.msrb.mxu2 %v5522_v6  ;;  %2028 = vst [vmem:[#allocation3 + $0x14] sm:$0x3] %v2027_v17  ;;  %v6987_v30 = vld.sshfl [vmem:[#allocation1 + $0x20] sm:$0xff pattern:$0x73625140] }
 0x386   : > { %3863 = vmatpush.bf16.msrb.mxu3 %v5586_v10  ;;  %2048 = vst [vmem:[#allocation3 + $0x16] sm:$0x3] %v2047_v19  ;;  %3777 = vmatmul.bf16.vlgmr.msrb.gmra.mxu0 %v6987_v30  ;;  %v6990_v38 = vld.sshfl [vmem:[#allocation1 + $0x30] sm:$0xff pattern:$0x73625140] }
 0x387   : > { %3825 = vmatpush.bf16.msra.mxu0 %v5386_v8  ;;  %v6992_v40 = vld.sshfl [vmem:[#allocation1 + $0x28] sm:$0xff pattern:$0x73625140]  ;;  %v6996_v43 = vld.sshfl [vmem:[#allocation1 + $0x38] sm:$0xff pattern:$0x73625140]  ;;  %v5426_v8 = vor.u32 %v6122_v58, %v5425_v57 }
 0x388   : > { %3803 = vmatmul.bf16.vlgmr.msra.gmra.mxu2 %v6990_v38  ;;  %3790 = vmatmul.bf16.vlgmr.msra.gmra.mxu1 %v6992_v40  ;;  %v6154_v4 = vld [vmem:[#allocation8 + $0x584] sm:$0xf0]  ;;  %v5673_v6 = vld [vmem:[#allocation8 + $0x670] sm:$0xf]  ;;  %v6232_v19 = vld [vmem:[#allocation8 + $0x7f4] sm:$0xf0] }
 0x389   : > { %3838 = vmatpush.bf16.msrb.mxu1 %v5450_v31  ;;  %3851 = vmatpush.bf16.msrb.mxu2 %v5514_v32  ;;  %v5737_v10 = vld [vmem:[#allocation8 + $0x6f0] sm:$0xf]  ;;  %v5674_v16 = vor.u32 %v6184_v7, %v5673_v6  ;;  %v5554_v21 = vor.u32 %v6154_v4, %v5553_v3  ;;  %v5802_v31 = vor.u32 %v6216_v14, %v5801_v13  ;;  %v6228_v57 = vld [vmem:[#allocation8 + $0x7d4] sm:$0xf0]  ;;  %v5713_v4 = vld [vmem:[#allocation8 + $0x6c0] sm:$0xf] }
 0x38a   : > { %3864 = vmatpush.bf16.msrb.mxu3 %v5578_v39  ;;  %v2025_v50 = vpop.f32.mrf.mxu2  ;;  %v2045_v59 = vpop.f32.mrf.mxu3  ;;  %v5865_v17 = vld [vmem:[#allocation8 + $0x7f0] sm:$0xf]  ;;  %v5738_v22 = vor.u32 %v6200_v11, %v5737_v10  ;;  %v5857_v39 = vld [vmem:[#allocation8 + $0x7e0] sm:$0xf]  ;;  %v6194_v6 = vld [vmem:[#allocation8 + $0x6c4] sm:$0xf0] }
 0x38b   : > { %3816 = vmatmul.bf16.vlgmr.msra.gmra.mxu3 %v6996_v43  ;;  %3826 = vmatpush.bf16.msra.mxu0 %v5378_v41  ;;  %v2063_v54 = vpop.f32.mrf.mxu0  ;;  %v2083_v56 = vpop.f32.mrf.mxu1  ;;  %v5866_v32 = vor.u32 %v6232_v19, %v5865_v17  ;;  %v5730_v50 = vor.u32 %v6198_v26, %v5729_v25  ;;  %v5777_v7 = vld [vmem:[#allocation8 + $0x740] sm:$0xf]  ;;  %v6226_v11 = vld [vmem:[#allocation8 + $0x7c4] sm:$0xf0]  ;;  %v5641_v13 = vld [vmem:[#allocation8 + $0x630] sm:$0xf]  ;;  %v5714_v14 = vor.u32 %v6194_v6, %v5713_v4 }
 0x38c   : > { %v2067_v0 = vpack.c.bf16 %v2063_v54, %v2063_v54  ;;  %v2087_v15 = vpack.c.bf16 %v2083_v56, %v2083_v56  ;;  %v6212_v54 = vld [vmem:[#allocation8 + $0x754] sm:$0xf0]  ;;  %v5849_v56 = vld [vmem:[#allocation8 + $0x7d0] sm:$0xf]  ;;  %v5841_v10 = vld [vmem:[#allocation8 + $0x7c0] sm:$0xf] }
 0x38d   : > { %v2131_v55 = vld [vmem:[#allocation3 + $0x10] sm:$0xff]  ;;  %3839 = vmatpush.bf16.msrb.mxu1 %v5442_v45  ;;  %3852 = vmatpush.bf16.msrb.mxu2 %v5506_v46  ;;  %v5657_v46 = vld [vmem:[#allocation8 + $0x650] sm:$0xf]  ;;  %v5850_v3 = vor.u32 %v6228_v57, %v5849_v56  ;;  %v6192_v19 = vld [vmem:[#allocation8 + $0x6b4] sm:$0xf0]  ;;  %v5842_v20 = vor.u32 %v6226_v11, %v5841_v10 }
 0x38e   : > { %2410 = vst [vmem:[#allocation1] ss:$4 sm:$0xff] %v2131_v55  ;;  %3865 = vmatpush.bf16.msrb.mxu3 %v5570_v62  ;;  %v6230_v45 = vld [vmem:[#allocation8 + $0x7e4] sm:$0xf0]  ;;  %v5658_v61 = vor.u32 %v6180_v1, %v5657_v46  ;;  %v5705_v17 = vld [vmem:[#allocation8 + $0x6b0] sm:$0xf] }
 0x38f   : > { %3827 = vmatpush.bf16.msra.mxu0 %v5370_v24  ;;  %2068 = vst [vmem:[#allocation3 + $0x18] sm:$0x3] %v2067_v0  ;;  %v6196_v24 = vld [vmem:[#allocation8 + $0x6d4] sm:$0xf0]  ;;  %v5858_v52 = vor.u32 %v6230_v45, %v5857_v39  ;;  %v5649_v0 = vld [vmem:[#allocation8 + $0x640] sm:$0xf] }
 0x390   : > { %2088 = vst [vmem:[#allocation3 + $0x1a] sm:$0x3] %v2087_v15  ;;  %v5722_v63 = vor.u32 %v6196_v24, %v5721_v49  ;;  %v6178_v15 = vld [vmem:[#allocation8 + $0x644] sm:$0xf0]  ;;  %v6224_v25 = vld [vmem:[#allocation8 + $0x7b4] sm:$0xf0] }
 0x391   : > { %3840 = vmatpush.bf16.msrb.mxu1 %v5434_v60  ;;  %3853 = vmatpush.bf16.msrb.mxu2 %v5498_v2  ;;  %v5786_v2 = vor.u32 %v6212_v54, %v5785_v53  ;;  %v5834_v34 = vor.u32 %v6224_v25, %v5833_v23  ;;  %v6190_v39 = vld [vmem:[#allocation8 + $0x6a4] sm:$0xf0]  ;;  %v5689_v49 = vld [vmem:[#allocation8 + $0x690] sm:$0xf]  ;;  %v6204_v24 = vld [vmem:[#allocation8 + $0x714] sm:$0xf0] }
 0x392   : > { %3866 = vmatpush.bf16.msrb.mxu3 %v5562_v9  ;;  %v2103_v27 = vpop.f32.mrf.mxu2  ;;  %v2123_v29 = vpop.f32.mrf.mxu3  ;;  %v6210_v9 = vld [vmem:[#allocation8 + $0x744] sm:$0xf0]  ;;  %v5698_v1 = vor.u32 %v6190_v39, %v5697_v37  ;;  %v5617_v54 = vld [vmem:[#allocation8 + $0x600] sm:$0xf]  ;;  %v6007_v6 = vld [vmem:[#allocation8 + $0xf4] sm:$0xf] }
 0x393   : > { %3828 = vmatpush.bf16.msra.mxu0 %v5362_v12  ;;  %v2107_v41 = vpack.c.bf16 %v2103_v27, %v2103_v27  ;;  %v2065_v42 = vpop.f32.mrf.mxu0  ;;  %v2085_v44 = vpop.f32.mrf.mxu1  ;;  %v2127_v5 = vpack.c.bf16 %v2123_v29, %v2123_v29  ;;  %v5650_v12 = vor.u32 %v6178_v15, %v5649_v0  ;;  %v5706_v27 = vor.u32 %v6192_v19, %v5705_v17  ;;  %v5633_v29 = vld [vmem:[#allocation8 + $0x620] sm:$0xf]  ;;  %v6222_v45 = vld [vmem:[#allocation8 + $0x7a4] sm:$0xf0]  ;;  %v6023_v10 = vld [vmem:[#allocation8 + $0x174] sm:$0xf] }
 0x394   : > { %v6206_v42 = vld [vmem:[#allocation8 + $0x724] sm:$0xf0]  ;;  %v5825_v44 = vld [vmem:[#allocation8 + $0x7a0] sm:$0xf]  ;;  %v5035_v11 = vld [vmem:[#allocation8 + $0x178] sm:$0xf0] }
 0x395   : > { %3841 = vmatpush.bf16.msrb.mxu1 %v5426_v8  ;;  %3854 = vmatpush.bf16.msrb.mxu2 %v5490_v18  ;;  %v2413_v62 = vld.sshfl [vmem:[#allocation1] sm:$0xff pattern:$0x73625140]  ;;  %v2415_v47 = vld.sshfl [vmem:[#allocation1 + $0x10] sm:$0xff pattern:$0x73625140]  ;;  %v5778_v18 = vor.u32 %v6210_v9, %v5777_v7 }
 0x396   : > { %3867 = vmatpush.bf16.msrb.mxu3 %v5554_v21  ;;  %v2414_v59 = vld.sshfl [vmem:[#allocation1 + $0x8] sm:$0xff pattern:$0x73625140]  ;;  %2108 = vst [vmem:[#allocation3 + $0x1c] sm:$0x3] %v2107_v41  ;;  %3829 = vmatmul.bf16.vlgmr.msra.gmra.mxu0 %v2413_v62 }
 0x397   : > { %3873 = vmatpush.bf16.msrb.mxu0 %v5674_v16  ;;  %2128 = vst [vmem:[#allocation3 + $0x1e] sm:$0x3] %v2127_v5  ;;  %v2416_v58 = vld.sshfl [vmem:[#allocation1 + $0x18] sm:$0xff pattern:$0x73625140] }
 0x398   : > { %3855 = vmatmul.bf16.vlgmr.msrb.gmra.mxu2 %v2415_v47  ;;  %3842 = vmatmul.bf16.vlgmr.msrb.gmra.mxu1 %v2414_v59  ;;  %v6176_v16 = vld [vmem:[#allocation8 + $0x634] sm:$0xf0]  ;;  %v5769_v21 = vld [vmem:[#allocation8 + $0x730] sm:$0xf]  ;;  %v5761_v41 = vld [vmem:[#allocation8 + $0x720] sm:$0xf] }
 0x399   : > { %3886 = vmatpush.bf16.msra.mxu1 %v5738_v22  ;;  %3899 = vmatpush.bf16.msra.mxu2 %v5802_v31  ;;  %v6208_v22 = vld [vmem:[#allocation8 + $0x734] sm:$0xf0]  ;;  %v5642_v26 = vor.u32 %v6176_v16, %v5641_v13  ;;  %v6174_v31 = vld [vmem:[#allocation8 + $0x624] sm:$0xf0]  ;;  %v5625_v5 = vld [vmem:[#allocation8 + $0x610] sm:$0xf]  ;;  %v5762_v47 = vor.u32 %v6206_v42, %v5761_v41 }
 0x39a   : > { %3912 = vmatpush.bf16.msra.mxu3 %v5866_v32  ;;  %v2105_v55 = vpop.f32.mrf.mxu2  ;;  %v2125_v60 = vpop.f32.mrf.mxu3  ;;  %v5770_v32 = vor.u32 %v6208_v22, %v5769_v21  ;;  %v5634_v46 = vor.u32 %v6174_v31, %v5633_v29  ;;  %v6172_v62 = vld [vmem:[#allocation8 + $0x614] sm:$0xf0]  ;;  %v5753_v59 = vld [vmem:[#allocation8 + $0x710] sm:$0xf]  ;;  %v6170_v56 = vld [vmem:[#allocation8 + $0x604] sm:$0xf0]  ;;  %v5038_v21 = vor.u32 %v6023_v10, %v5035_v11 }
 0x39b   : > { %3874 = vmatpush.bf16.msrb.mxu0 %v5666_v48  ;;  %3868 = vmatmul.bf16.vlgmr.msrb.gmra.mxu3 %v2416_v58  ;;  %v5826_v48 = vor.u32 %v6222_v45, %v5825_v44  ;;  %v5626_v53 = vor.u32 %v6172_v62, %v5625_v5  ;;  %v5681_v58 = vld [vmem:[#allocation8 + $0x680] sm:$0xf]  ;;  %v5754_v0 = vor.u32 %v6204_v24, %v5753_v59  ;;  %v6202_v55 = vld [vmem:[#allocation8 + $0x704] sm:$0xf0]  ;;  %v5991_v60 = vld [vmem:[#allocation8 + $0x74] sm:$0xf] }
 0x39c   : > { %v6218_v4 = vld [vmem:[#allocation8 + $0x784] sm:$0xf0]  ;;  %v5618_v7 = vor.u32 %v6170_v56, %v5617_v54  ;;  %v4971_v9 = vld [vmem:[#allocation8 + $0xf8] sm:$0xf0]  ;;  %v6005_v22 = vld [vmem:[#allocation8 + $0xe4] sm:$0xf] }
 0x39d   : > { %3887 = vmatpush.bf16.msra.mxu1 %v5730_v50  ;;  %3900 = vmatpush.bf16.msra.mxu2 %v5794_v51  ;;  %v6188_v50 = vld [vmem:[#allocation8 + $0x694] sm:$0xf0]  ;;  %v5817_v51 = vld [vmem:[#allocation8 + $0x790] sm:$0xf]  ;;  %v5099_v16 = vld [vmem:[#allocation8 + $0x1f8] sm:$0xf0] }
 0x39e   : > { %3913 = vmatpush.bf16.msra.mxu3 %v5858_v52  ;;  %v2132_v8 = vld [vmem:[#allocation3 + $0x18] sm:$0xff]  ;;  %v6220_v52 = vld [vmem:[#allocation8 + $0x794] sm:$0xf0]  ;;  %v5690_v57 = vor.u32 %v6188_v50, %v5689_v49  ;;  %v4963_v23 = vld [vmem:[#allocation8 + $0xe8] sm:$0xf0] }
 0x39f   : > { %3875 = vmatpush.bf16.msrb.mxu0 %v5658_v61  ;;  %2412 = vst [vmem:[#allocation1 + $0x20] ss:$4 sm:$0xff] %v2132_v8  ;;  %v6186_v61 = vld [vmem:[#allocation8 + $0x684] sm:$0xf0]  ;;  %v5818_v15 = vor.u32 %v6220_v52, %v5817_v51  ;;  %v5989_v8 = vld [vmem:[#allocation8 + $0x64] sm:$0xf]  ;;  %v4966_v45 = vor.u32 %v6005_v22, %v4963_v23 }
 0x3a0   : > { %v6021_v25 = vld [vmem:[#allocation8 + $0x164] sm:$0xf]  ;;  %v5091_v31 = vld [vmem:[#allocation8 + $0x1e8] sm:$0xf0]  ;;  %v4891_v37 = vld [vmem:[#allocation8 + $0x58] sm:$0xf0] }
 0x3a1   : > { %3888 = vmatpush.bf16.msra.mxu1 %v5722_v63  ;;  %3901 = vmatpush.bf16.msra.mxu2 %v5786_v2  ;;  %v5745_v63 = vld [vmem:[#allocation8 + $0x700] sm:$0xf]  ;;  %v4907_v2 = vld [vmem:[#allocation8 + $0x78] sm:$0xf0]  ;;  %v6037_v29 = vld [vmem:[#allocation8 + $0x1e4] sm:$0xf] }
 0x3a2   : > { %3914 = vmatpush.bf16.msra.mxu3 %v5850_v3  ;;  %v5809_v3 = vld [vmem:[#allocation8 + $0x780] sm:$0xf]  ;;  %v4910_v13 = vor.u32 %v5991_v60, %v4907_v2  ;;  %v5746_v17 = vor.u32 %v6202_v55, %v5745_v63  ;;  %v5094_v5 = vor.u32 %v6037_v29, %v5091_v31  ;;  %v4955_v62 = vld [vmem:[#allocation8 + $0xd8] sm:$0xf0]  ;;  %v6035_v49 = vld [vmem:[#allocation8 + $0x1d4] sm:$0xf] }
 0x3a3   : > { %3876 = vmatpush.bf16.msrb.mxu0 %v5650_v12  ;;  %v5682_v12 = vor.u32 %v6186_v61, %v5681_v58  ;;  %v5810_v19 = vor.u32 %v6218_v4, %v5809_v3  ;;  %v5083_v50 = vld [vmem:[#allocation8 + $0x1d8] sm:$0xf0]  ;;  %v5985_v52 = vld [vmem:[#allocation8 + $0x44] sm:$0xf]  ;;  %v5011_v61 = vld [vmem:[#allocation8 + $0x148] sm:$0xf0] }
 0x3a4   : > { %v6001_v54 = vld [vmem:[#allocation8 + $0xc4] sm:$0xf]  ;;  %v5086_v56 = vor.u32 %v6035_v49, %v5083_v50  ;;  %v5983_v2 = vld [vmem:[#allocation8 + $0x34] sm:$0xf]  ;;  %v4875_v3 = vld [vmem:[#allocation8 + $0x38] sm:$0xf0] }
 0x3a5   : > { %3889 = vmatpush.bf16.msra.mxu1 %v5714_v14  ;;  %3902 = vmatpush.bf16.msra.mxu2 %v5778_v18  ;;  %v6039_v14 = vld [vmem:[#allocation8 + $0x1f4] sm:$0xf]  ;;  %v4899_v18 = vld [vmem:[#allocation8 + $0x68] sm:$0xf0]  ;;  %v6017_v58 = vld [vmem:[#allocation8 + $0x144] sm:$0xf] }
 0x3a6   : > { %3915 = vmatpush.bf16.msra.mxu3 %v5842_v20  ;;  %v4974_v20 = vor.u32 %v6007_v6, %v4971_v9  ;;  %v2419_v39 = vld.sshfl [vmem:[#allocation1 + $0x30] sm:$0xff pattern:$0x73625140]  ;;  %v2418_v41 = vld.sshfl [vmem:[#allocation1 + $0x28] sm:$0xff pattern:$0x73625140]  ;;  %v4902_v42 = vor.u32 %v5989_v8, %v4899_v18  ;;  %v5014_v60 = vor.u32 %v6017_v58, %v5011_v61 }
 0x3a7   : > { %3877 = vmatpush.bf16.msrb.mxu0 %v5642_v26  ;;  %v5102_v26 = vor.u32 %v6039_v14, %v5099_v16  ;;  %v2420_v44 = vld.sshfl [vmem:[#allocation1 + $0x38] sm:$0xff pattern:$0x73625140]  ;;  %v6033_v63 = vld [vmem:[#allocation8 + $0x1c4] sm:$0xf] }
 0x3a8   : > { %v5999_v4 = vld [vmem:[#allocation8 + $0xb4] sm:$0xf]  ;;  %v5003_v10 = vld [vmem:[#allocation8 + $0x138] sm:$0xf0]  ;;  %v5997_v8 = vld [vmem:[#allocation8 + $0xa4] sm:$0xf] }
 0x3a9   : > { %3890 = vmatpush.bf16.msra.mxu1 %v5706_v27  ;;  %3903 = vmatpush.bf16.msra.mxu2 %v5770_v32  ;;  %v5027_v27 = vld [vmem:[#allocation8 + $0x168] sm:$0xf0]  ;;  %v2417_v32 = vld.sshfl [vmem:[#allocation1 + $0x20] sm:$0xff pattern:$0x73625140] }
 0x3aa   : > { %3916 = vmatpush.bf16.msra.mxu3 %v5834_v34  ;;  %v5987_v34 = vld [vmem:[#allocation8 + $0x54] sm:$0xf]  ;;  %v4995_v22 = vld [vmem:[#allocation8 + $0x128] sm:$0xf0]  ;;  %v6029_v23 = vld [vmem:[#allocation8 + $0x1a4] sm:$0xf] }
 0x3ab   : > { %3878 = vmatpush.bf16.msrb.mxu0 %v5634_v46  ;;  %v5030_v46 = vor.u32 %v6021_v25, %v5027_v27  ;;  %v4894_v59 = vor.u32 %v5987_v34, %v4891_v37  ;;  %v6015_v9 = vld [vmem:[#allocation8 + $0x134] sm:$0xf]  ;;  %v5059_v25 = vld [vmem:[#allocation8 + $0x1a8] sm:$0xf0]  ;;  %v6009_v50 = vld [vmem:[#allocation8 + $0x104] sm:$0xf] }
 0x3ac   : > { %v6031_v11 = vld [vmem:[#allocation8 + $0x1b4] sm:$0xf]  ;;  %v5006_v16 = vor.u32 %v6015_v9, %v5003_v10  ;;  %v5062_v37 = vor.u32 %v6029_v23, %v5059_v25  ;;  %v4915_v49 = vld [vmem:[#allocation8 + $0x88] sm:$0xf0]  ;;  %v5227_v58 = vld [vmem:[#allocation8 + $0x2f8] sm:$0xf0] }
 0x3ad   : > { %3891 = vmatpush.bf16.msra.mxu1 %v5698_v1  ;;  %3904 = vmatpush.bf16.msra.mxu2 %v5762_v47  ;;  %v6003_v1 = vld [vmem:[#allocation8 + $0xd4] sm:$0xf]  ;;  %v5155_v9 = vld [vmem:[#allocation8 + $0x268] sm:$0xf0]  ;;  %v6069_v10 = vld [vmem:[#allocation8 + $0x2e4] sm:$0xf] }
 0x3ae   : > { %3917 = vmatpush.bf16.msra.mxu3 %v5826_v48  ;;  %v6019_v47 = vld [vmem:[#allocation8 + $0x154] sm:$0xf]  ;;  %v5019_v48 = vld [vmem:[#allocation8 + $0x158] sm:$0xf0]  ;;  %v4958_v24 = vor.u32 %v6003_v1, %v4955_v62  ;;  %v5977_v1 = vld [vmem:[#allocation8 + $0x4] sm:$0xf] }
 0x3af   : > { %3879 = vmatpush.bf16.msrb.mxu0 %v5626_v53  ;;  %v5022_v51 = vor.u32 %v6019_v47, %v5019_v48  ;;  %v4883_v53 = vld [vmem:[#allocation8 + $0x48] sm:$0xf0]  ;;  %v5979_v31 = vld [vmem:[#allocation8 + $0x14] sm:$0xf]  ;;  %v5993_v48 = vld [vmem:[#allocation8 + $0x84] sm:$0xf] }
 0x3b0   : > { %v5995_v34 = vld [vmem:[#allocation8 + $0x94] sm:$0xf]  ;;  %v5211_v25 = vld [vmem:[#allocation8 + $0x2d8] sm:$0xf0] }
 0x3b1   : > { %3892 = vmatpush.bf16.msra.mxu1 %v5690_v57  ;;  %3905 = vmatpush.bf16.msra.mxu2 %v5754_v0  ;;  %v4947_v57 = vld [vmem:[#allocation8 + $0xc8] sm:$0xf0]  ;;  %v6087_v61 = vld [vmem:[#allocation8 + $0x374] sm:$0xf] }
 0x3b2   : > { %3918 = vmatpush.bf16.msra.mxu3 %v5818_v15  ;;  %v5075_v0 = vld [vmem:[#allocation8 + $0x1c8] sm:$0xf0]  ;;  %v4886_v15 = vor.u32 %v5985_v52, %v4883_v53  ;;  %v4950_v55 = vor.u32 %v6001_v54, %v4947_v57  ;;  %v6055_v53 = vld [vmem:[#allocation8 + $0x274] sm:$0xf]  ;;  %v5163_v54 = vld [vmem:[#allocation8 + $0x278] sm:$0xf0] }
 0x3b3   : > { %3880 = vmatpush.bf16.msrb.mxu0 %v5618_v7  ;;  %v5078_v6 = vor.u32 %v6033_v63, %v5075_v0  ;;  %v4939_v7 = vld [vmem:[#allocation8 + $0xb8] sm:$0xf0]  ;;  %v5043_v52 = vld [vmem:[#allocation8 + $0x188] sm:$0xf0]  ;;  %v4918_v0 = vor.u32 %v5993_v48, %v4915_v49  ;;  %v6063_v48 = vld [vmem:[#allocation8 + $0x2b4] sm:$0xf] }
 0x3b4   : > { %v4942_v14 = vor.u32 %v5999_v4, %v4939_v7  ;;  %v5291_v63 = vld [vmem:[#allocation8 + $0x378] sm:$0xf0]  ;;  %v6053_v7 = vld [vmem:[#allocation8 + $0x264] sm:$0xf] }
 0x3b5   : > { %3893 = vmatpush.bf16.msra.mxu1 %v5682_v12  ;;  %3906 = vmatpush.bf16.msra.mxu2 %v5746_v17  ;;  %v5067_v12 = vld [vmem:[#allocation8 + $0x1b8] sm:$0xf0]  ;;  %v5981_v17 = vld [vmem:[#allocation8 + $0x24] sm:$0xf] }
 0x3b6   : > { %3919 = vmatpush.bf16.msra.mxu3 %v5810_v19  ;;  %3881 = vmatmul.bf16.vlgmr.msrb.gmra.mxu0 %v2417_v32  ;;  %v4867_v19 = vld [vmem:[#allocation8 + $0x28] sm:$0xf0]  ;;  %v5070_v18 = vor.u32 %v6031_v11, %v5067_v12  ;;  %v4859_v32 = vld [vmem:[#allocation8 + $0x18] sm:$0xf0] }
 0x3b7   : > { %3925 = vmatpush.bf16.msra.mxu0 %v4910_v13  ;;  %v4878_v13 = vor.u32 %v5983_v2, %v4875_v3  ;;  %v5166_v3 = vor.u32 %v6055_v53, %v5163_v54  ;;  %v5219_v12 = vld [vmem:[#allocation8 + $0x2e8] sm:$0xf0] }
 0x3b8   : > { %3907 = vmatmul.bf16.vlgmr.msra.gmra.mxu2 %v2419_v39  ;;  %3894 = vmatmul.bf16.vlgmr.msra.gmra.mxu1 %v2418_v41  ;;  %v4923_v39 = vld [vmem:[#allocation8 + $0x98] sm:$0xf0]  ;;  %v6011_v41 = vld [vmem:[#allocation8 + $0x114] sm:$0xf] }
 0x3b9   : > { %3938 = vmatpush.bf16.msrb.mxu1 %v4974_v20  ;;  %3951 = vmatpush.bf16.msrb.mxu2 %v5038_v21  ;;  %v4931_v20 = vld [vmem:[#allocation8 + $0xa8] sm:$0xf0]  ;;  %v6013_v21 = vld [vmem:[#allocation8 + $0x124] sm:$0xf]  ;;  %v4926_v62 = vor.u32 %v5995_v34, %v4923_v39 }
 0x3ba   : > { %3964 = vmatpush.bf16.msrb.mxu3 %v5102_v26  ;;  %v4870_v26 = vor.u32 %v5981_v17, %v4867_v19  ;;  %v4934_v27 = vor.u32 %v5997_v8, %v4931_v20  ;;  %v4998_v29 = vor.u32 %v6013_v21, %v4995_v22  ;;  %v5347_v17 = vld [vmem:[#allocation8 + $0x3e8] sm:$0xf0]  ;;  %v5158_v19 = vor.u32 %v6053_v7, %v5155_v9  ;;  %v6051_v20 = vld [vmem:[#allocation8 + $0x254] sm:$0xf]  ;;  %v5147_v21 = vld [vmem:[#allocation8 + $0x258] sm:$0xf0] }
 0x3bb   : > { %3920 = vmatmul.bf16.vlgmr.msra.gmra.mxu3 %v2420_v44  ;;  %3926 = vmatpush.bf16.msra.mxu0 %v4902_v42  ;;  %v4987_v42 = vld [vmem:[#allocation8 + $0x118] sm:$0xf0]  ;;  %v6027_v44 = vld [vmem:[#allocation8 + $0x194] sm:$0xf]  ;;  %v5222_v8 = vor.u32 %v6069_v10, %v5219_v12  ;;  %v6049_v39 = vld [vmem:[#allocation8 + $0x244] sm:$0xf] }
 0x3bc   : > { %v4990_v47 = vor.u32 %v6011_v41, %v4987_v42  ;;  %v6067_v22 = vld [vmem:[#allocation8 + $0x2d4] sm:$0xf]  ;;  %v6065_v41 = vld [vmem:[#allocation8 + $0x2c4] sm:$0xf]  ;;  %v5115_v9 = vld [vmem:[#allocation8 + $0x218] sm:$0xf0] }
 0x3bd   : > { %3939 = vmatpush.bf16.msrb.mxu1 %v4966_v45  ;;  %3952 = vmatpush.bf16.msrb.mxu2 %v5030_v46  ;;  %v5051_v45 = vld [vmem:[#allocation8 + $0x198] sm:$0xf0]  ;;  %v4862_v46 = vor.u32 %v5979_v31, %v4859_v32  ;;  %v5150_v32 = vor.u32 %v6051_v20, %v5147_v21  ;;  %v5214_v34 = vor.u32 %v6067_v22, %v5211_v25  ;;  %v6043_v7 = vld [vmem:[#allocation8 + $0x214] sm:$0xf]  ;;  %v6057_v22 = vld [vmem:[#allocation8 + $0x284] sm:$0xf] }
 0x3be   : > { %3965 = vmatpush.bf16.msrb.mxu3 %v5094_v5  ;;  %v4851_v5 = vld [vmem:[#allocation8 + $0x8] sm:$0xf0]  ;;  %v5339_v31 = vld [vmem:[#allocation8 + $0x3d8] sm:$0xf0]  ;;  %v6059_v10 = vld [vmem:[#allocation8 + $0x294] sm:$0xf] }
 0x3bf   : > { %3927 = vmatpush.bf16.msra.mxu0 %v4894_v59  ;;  %v5054_v59 = vor.u32 %v6027_v44, %v5051_v45  ;;  %v4854_v57 = vor.u32 %v5977_v1, %v4851_v5  ;;  %v5203_v44 = vld [vmem:[#allocation8 + $0x2c8] sm:$0xf0]  ;;  %v6081_v45 = vld [vmem:[#allocation8 + $0x344] sm:$0xf]  ;;  %v5179_v12 = vld [vmem:[#allocation8 + $0x298] sm:$0xf0] }
 0x3c0   : > { %v5182_v20 = vor.u32 %v6059_v10, %v5179_v12  ;;  %v6073_v25 = vld [vmem:[#allocation8 + $0x304] sm:$0xf]  ;;  %v5395_v10 = vld [vmem:[#allocation8 + $0x448] sm:$0xf0] }
 0x3c1   : > { %3940 = vmatpush.bf16.msrb.mxu1 %v4958_v24  ;;  %3953 = vmatpush.bf16.msrb.mxu2 %v5022_v51  ;;  %v4979_v24 = vld [vmem:[#allocation8 + $0x108] sm:$0xf0]  ;;  %v6025_v51 = vld [vmem:[#allocation8 + $0x184] sm:$0xf] }
 0x3c2   : > { %3966 = vmatpush.bf16.msrb.mxu3 %v5086_v56  ;;  %v6071_v56 = vld [vmem:[#allocation8 + $0x2f4] sm:$0xf]  ;;  %v5046_v2 = vor.u32 %v6025_v51, %v5043_v52  ;;  %v5323_v52 = vld [vmem:[#allocation8 + $0x3b8] sm:$0xf0]  ;;  %v6145_v12 = vld [vmem:[#allocation8 + $0x544] sm:$0xf] }
 0x3c3   : > { %3928 = vmatpush.bf16.msra.mxu0 %v4886_v15  ;;  %v4982_v15 = vor.u32 %v6009_v50, %v4979_v24  ;;  %v5230_v4 = vor.u32 %v6071_v56, %v5227_v58  ;;  %v5195_v50 = vld [vmem:[#allocation8 + $0x2b8] sm:$0xf0]  ;;  %v6095_v51 = vld [vmem:[#allocation8 + $0x3b4] sm:$0xf]  ;;  %v5123_v58 = vld [vmem:[#allocation8 + $0x228] sm:$0xf0] }
 0x3c4   : > { %v5259_v24 = vld [vmem:[#allocation8 + $0x338] sm:$0xf0]  ;;  %v5198_v54 = vor.u32 %v6063_v48, %v5195_v50  ;;  %v6133_v48 = vld [vmem:[#allocation8 + $0x4e4] sm:$0xf]  ;;  %v5475_v50 = vld [vmem:[#allocation8 + $0x4e8] sm:$0xf0] }
 0x3c5   : > { %3941 = vmatpush.bf16.msrb.mxu1 %v4950_v55  ;;  %3954 = vmatpush.bf16.msrb.mxu2 %v5014_v60  ;;  %v6103_v55 = vld [vmem:[#allocation8 + $0x3f4] sm:$0xf]  ;;  %v5355_v60 = vld [vmem:[#allocation8 + $0x3f8] sm:$0xf0] }
 0x3c6   : > { %3967 = vmatpush.bf16.msrb.mxu3 %v5078_v6  ;;  %v5294_v6 = vor.u32 %v6087_v61, %v5291_v63  ;;  %v5358_v11 = vor.u32 %v6103_v55, %v5355_v60  ;;  %v6061_v61 = vld [vmem:[#allocation8 + $0x2a4] sm:$0xf]  ;;  %v5326_v63 = vor.u32 %v6095_v51, %v5323_v52  ;;  %v5251_v55 = vld [vmem:[#allocation8 + $0x328] sm:$0xf0] }
 0x3c7   : > { %3929 = vmatpush.bf16.msra.mxu0 %v4878_v13  ;;  %v6085_v13 = vld [vmem:[#allocation8 + $0x364] sm:$0xf]  ;;  %v5603_v52 = vld [vmem:[#allocation8 + $0x5e8] sm:$0xf0] }
 0x3c8   : > { %v6093_v60 = vld [vmem:[#allocation8 + $0x3a4] sm:$0xf] }
 0x3c9   : > { %3942 = vmatpush.bf16.msrb.mxu1 %v4942_v14  ;;  %3955 = vmatpush.bf16.msrb.mxu2 %v5006_v16  ;;  %v5283_v14 = vld [vmem:[#allocation8 + $0x368] sm:$0xf0]  ;;  %v6101_v16 = vld [vmem:[#allocation8 + $0x3e4] sm:$0xf] }
 0x3ca   : > { %3968 = vmatpush.bf16.msrb.mxu3 %v5070_v18  ;;  %v5286_v18 = vor.u32 %v6085_v13, %v5283_v14  ;;  %v5350_v23 = vor.u32 %v6101_v16, %v5347_v17  ;;  %v6075_v13 = vld [vmem:[#allocation8 + $0x314] sm:$0xf]  ;;  %v5243_v14 = vld [vmem:[#allocation8 + $0x318] sm:$0xf0]  ;;  %v6165_v51 = vld [vmem:[#allocation8 + $0x5e4] sm:$0xf] }
 0x3cb   : > { %3930 = vmatpush.bf16.msra.mxu0 %v4870_v26  ;;  %v6083_v26 = vld [vmem:[#allocation8 + $0x354] sm:$0xf]  ;;  %v5307_v17 = vld [vmem:[#allocation8 + $0x398] sm:$0xf0]  ;;  %v5246_v21 = vor.u32 %v6075_v13, %v5243_v14  ;;  %v5523_v13 = vld [vmem:[#allocation8 + $0x548] sm:$0xf0] }
 0x3cc   : > { %v6091_v16 = vld [vmem:[#allocation8 + $0x394] sm:$0xf]  ;;  %v6161_v14 = vld [vmem:[#allocation8 + $0x5c4] sm:$0xf] }
 0x3cd   : > { %3943 = vmatpush.bf16.msrb.mxu1 %v4934_v27  ;;  %3956 = vmatpush.bf16.msrb.mxu2 %v4998_v29  ;;  %v5275_v27 = vld [vmem:[#allocation8 + $0x358] sm:$0xf0]  ;;  %v6099_v29 = vld [vmem:[#allocation8 + $0x3d4] sm:$0xf] }
 0x3ce   : > { %3969 = vmatpush.bf16.msrb.mxu3 %v5062_v37  ;;  %v5278_v37 = vor.u32 %v6083_v26, %v5275_v27  ;;  %v5342_v42 = vor.u32 %v6099_v29, %v5339_v31  ;;  %v5310_v26 = vor.u32 %v6091_v16, %v5307_v17  ;;  %v5235_v27 = vld [vmem:[#allocation8 + $0x308] sm:$0xf0]  ;;  %v6089_v29 = vld [vmem:[#allocation8 + $0x384] sm:$0xf] }
 0x3cf   : > { %3931 = vmatpush.bf16.msra.mxu0 %v4862_v46  ;;  %v6097_v46 = vld [vmem:[#allocation8 + $0x3c4] sm:$0xf]  ;;  %v5299_v31 = vld [vmem:[#allocation8 + $0x388] sm:$0xf0] }
 0x3d1   : > { %3944 = vmatpush.bf16.msrb.mxu1 %v4926_v62  ;;  %3957 = vmatpush.bf16.msrb.mxu2 %v4990_v47  ;;  %v6047_v62 = vld [vmem:[#allocation8 + $0x234] sm:$0xf]  ;;  %v5131_v47 = vld [vmem:[#allocation8 + $0x238] sm:$0xf0] }
 0x3d2   : > { %3970 = vmatpush.bf16.msrb.mxu3 %v5054_v59  ;;  %v6079_v59 = vld [vmem:[#allocation8 + $0x334] sm:$0xf]  ;;  %v5134_v53 = vor.u32 %v6047_v62, %v5131_v47  ;;  %v6117_v62 = vld [vmem:[#allocation8 + $0x464] sm:$0xf]  ;;  %v5411_v47 = vld [vmem:[#allocation8 + $0x468] sm:$0xf0] }
 0x3d3   : > { %3932 = vmatpush.bf16.msra.mxu0 %v4854_v57  ;;  %v5262_v56 = vor.u32 %v6079_v59, %v5259_v24  ;;  %v6045_v57 = vld [vmem:[#allocation8 + $0x224] sm:$0xf]  ;;  %v5539_v24 = vld [vmem:[#allocation8 + $0x568] sm:$0xf0] }
 0x3d4   : > { %v6149_v59 = vld [vmem:[#allocation8 + $0x564] sm:$0xf] }
 0x3d5   : > { %3945 = vmatpush.bf16.msrb.mxu1 %v4918_v0  ;;  %3958 = vmatpush.bf16.msrb.mxu2 %v4982_v15  ;;  %v5187_v0 = vld [vmem:[#allocation8 + $0x2a8] sm:$0xf0]  ;;  %v6077_v15 = vld [vmem:[#allocation8 + $0x324] sm:$0xf] }
 0x3d6   : > { %3971 = vmatpush.bf16.msrb.mxu3 %v5046_v2  ;;  %3933 = vmatmul.bf16.vlgmr.msra.gmra.mxu0 %v6975_v28  ;;  %v5139_v28 = vld [vmem:[#allocation8 + $0x248] sm:$0xf0] }
 0x3d7   : > { %3977 = vmatpush.bf16.msrb.mxu0 %v5166_v3  ;;  %v5142_v1 = vor.u32 %v6049_v39, %v5139_v28  ;;  %v5315_v2 = vld [vmem:[#allocation8 + $0x3a8] sm:$0xf0]  ;;  %v5126_v3 = vor.u32 %v6045_v57, %v5123_v58  ;;  %v5483_v28 = vld [vmem:[#allocation8 + $0x4f8] sm:$0xf0]  ;;  %v6115_v57 = vld [vmem:[#allocation8 + $0x454] sm:$0xf] }
 0x3d8   : > { %3946 = vmatmul.bf16.vlgmr.msrb.gmra.mxu1 %v6978_v33  ;;  %3959 = vmatmul.bf16.vlgmr.msrb.gmra.mxu2 %v6981_v35  ;;  %v5267_v33 = vld [vmem:[#allocation8 + $0x348] sm:$0xf0]  ;;  %v5403_v58 = vld [vmem:[#allocation8 + $0x458] sm:$0xf0] }
 0x3d9   : > { %3990 = vmatpush.bf16.msra.mxu1 %v5230_v4  ;;  %4003 = vmatpush.bf16.msra.mxu2 %v5294_v6  ;;  %v5331_v35 = vld [vmem:[#allocation8 + $0x3c8] sm:$0xf0]  ;;  %v5270_v5 = vor.u32 %v6081_v45, %v5267_v33  ;;  %v5190_v4 = vor.u32 %v6061_v61, %v5187_v0  ;;  %v5254_v6 = vor.u32 %v6077_v15, %v5251_v55  ;;  %v6167_v33 = vld [vmem:[#allocation8 + $0x5f4] sm:$0xf]  ;;  %v5467_v0 = vld [vmem:[#allocation8 + $0x4d8] sm:$0xf0] }
 0x3da   : > { %4016 = vmatpush.bf16.msra.mxu3 %v5358_v11  ;;  %v5334_v49 = vor.u32 %v6097_v46, %v5331_v35  ;;  %v5318_v11 = vor.u32 %v6093_v60, %v5315_v2  ;;  %v5238_v45 = vor.u32 %v6073_v25, %v5235_v27  ;;  %v5611_v46 = vld [vmem:[#allocation8 + $0x5f8] sm:$0xf0]  ;;  %v5302_v35 = vor.u32 %v6089_v29, %v5299_v31  ;;  %v6131_v61 = vld [vmem:[#allocation8 + $0x4d4] sm:$0xf] }
 0x3db   : > { %3972 = vmatmul.bf16.vlgmr.msrb.gmra.mxu3 %v6983_v36  ;;  %3978 = vmatpush.bf16.msrb.mxu0 %v5158_v19  ;;  %v5206_v36 = vor.u32 %v6065_v41, %v5203_v44  ;;  %v5118_v19 = vor.u32 %v6043_v7, %v5115_v9  ;;  %v6151_v41 = vld [vmem:[#allocation8 + $0x574] sm:$0xf]  ;;  %v5531_v55 = vld [vmem:[#allocation8 + $0x558] sm:$0xf0]  ;;  %v6113_v9 = vld [vmem:[#allocation8 + $0x444] sm:$0xf] }
 0x3dc   : > { %v6147_v15 = vld [vmem:[#allocation8 + $0x554] sm:$0xf]  ;;  %v5595_v2 = vld [vmem:[#allocation8 + $0x5d8] sm:$0xf0]  ;;  %v5398_v16 = vor.u32 %v6113_v9, %v5395_v10  ;;  %v5491_v9 = vld [vmem:[#allocation8 + $0x508] sm:$0xf0] }
 0x3dd   : > { %3991 = vmatpush.bf16.msra.mxu1 %v5222_v8  ;;  %4004 = vmatpush.bf16.msra.mxu2 %v5286_v18  ;;  %v6041_v8 = vld [vmem:[#allocation8 + $0x204] sm:$0xf]  ;;  %v5107_v18 = vld [vmem:[#allocation8 + $0x208] sm:$0xf0]  ;;  %v6163_v60 = vld [vmem:[#allocation8 + $0x5d4] sm:$0xf] }
 0x3de   : > { %4017 = vmatpush.bf16.msra.mxu3 %v5350_v23  ;;  %v5171_v23 = vld [vmem:[#allocation8 + $0x288] sm:$0xf0]  ;;  %v5110_v39 = vor.u32 %v6041_v8, %v5107_v18  ;;  %v6111_v8 = vld [vmem:[#allocation8 + $0x434] sm:$0xf]  ;;  %v5387_v18 = vld [vmem:[#allocation8 + $0x438] sm:$0xf0] }
 0x3df   : > { %3979 = vmatpush.bf16.msrb.mxu0 %v5150_v32  ;;  %v6119_v32 = vld [vmem:[#allocation8 + $0x474] sm:$0xf]  ;;  %v5174_v44 = vor.u32 %v6057_v22, %v5171_v23  ;;  %v5451_v22 = vld [vmem:[#allocation8 + $0x4b8] sm:$0xf0]  ;;  %v6153_v10 = vld [vmem:[#allocation8 + $0x584] sm:$0xf] }
 0x3e0   : > { %v6143_v23 = vld [vmem:[#allocation8 + $0x534] sm:$0xf]  ;;  %v5515_v25 = vld [vmem:[#allocation8 + $0x538] sm:$0xf0] }
 0x3e1   : > { %3992 = vmatpush.bf16.msra.mxu1 %v5214_v34  ;;  %4005 = vmatpush.bf16.msra.mxu2 %v5278_v37  ;;  %v5419_v34 = vld [vmem:[#allocation8 + $0x478] sm:$0xf0]  ;;  %v6135_v37 = vld [vmem:[#allocation8 + $0x4f4] sm:$0xf] }
 0x3e2   : > { %4018 = vmatpush.bf16.msra.mxu3 %v5342_v42  ;;  %v5547_v42 = vld [vmem:[#allocation8 + $0x578] sm:$0xf0] }
 0x3e3   : > { %3980 = vmatpush.bf16.msrb.mxu0 %v5142_v1  ;;  %v5422_v1 = vor.u32 %v6119_v32, %v5419_v34  ;;  %v5579_v27 = vld [vmem:[#allocation8 + $0x5b8] sm:$0xf0]  ;;  %v5390_v32 = vor.u32 %v6111_v8, %v5387_v18  ;;  %v6231_v8 = vld [vmem:[#allocation8 + $0x7f4] sm:$0xf] }
 0x3e4   : > { %v5867_v18 = vld [vmem:[#allocation8 + $0x7f8] sm:$0xf0] }
 0x3e5   : > { %3993 = vmatpush.bf16.msra.mxu1 %v5206_v36  ;;  %4006 = vmatpush.bf16.msra.mxu2 %v5270_v5  ;;  %v5486_v36 = vor.u32 %v6135_v37, %v5483_v28  ;;  %v5550_v5 = vor.u32 %v6151_v41, %v5547_v42  ;;  %v5518_v37 = vor.u32 %v6143_v23, %v5515_v25  ;;  %v6109_v41 = vld [vmem:[#allocation8 + $0x424] sm:$0xf]  ;;  %v5379_v42 = vld [vmem:[#allocation8 + $0x428] sm:$0xf0] }
 0x3e6   : > { %4019 = vmatpush.bf16.msra.mxu3 %v5334_v49  ;;  %v5614_v49 = vor.u32 %v6167_v33, %v5611_v46  ;;  %v5443_v33 = vld [vmem:[#allocation8 + $0x4a8] sm:$0xf0]  ;;  %v6141_v46 = vld [vmem:[#allocation8 + $0x524] sm:$0xf] }
 0x3e7   : > { %3981 = vmatpush.bf16.msrb.mxu0 %v5134_v53  ;;  %v5414_v53 = vor.u32 %v6117_v62, %v5411_v47 }
 0x3e9   : > { %3994 = vmatpush.bf16.msra.mxu1 %v5198_v54  ;;  %4007 = vmatpush.bf16.msra.mxu2 %v5262_v56  ;;  %v5478_v54 = vor.u32 %v6133_v48, %v5475_v50  ;;  %v5542_v56 = vor.u32 %v6149_v59, %v5539_v24  ;;  %v6107_v48 = vld [vmem:[#allocation8 + $0x414] sm:$0xf]  ;;  %v5435_v24 = vld [vmem:[#allocation8 + $0x498] sm:$0xf0] }
 0x3ea   : > { %4020 = vmatpush.bf16.msra.mxu3 %v5326_v63  ;;  %v5606_v63 = vor.u32 %v6165_v51, %v5603_v52  ;;  %v6123_v50 = vld [vmem:[#allocation8 + $0x494] sm:$0xf]  ;;  %v5499_v52 = vld [vmem:[#allocation8 + $0x518] sm:$0xf0] }
 0x3eb   : > { %3982 = vmatpush.bf16.msrb.mxu0 %v5126_v3  ;;  %v5406_v3 = vor.u32 %v6115_v57, %v5403_v58  ;;  %v6139_v51 = vld [vmem:[#allocation8 + $0x514] sm:$0xf] }
 0x3ed   : > { %3995 = vmatpush.bf16.msra.mxu1 %v5190_v4  ;;  %4008 = vmatpush.bf16.msra.mxu2 %v5254_v6  ;;  %v5470_v6 = vor.u32 %v6131_v61, %v5467_v0  ;;  %v6105_v61 = vld [vmem:[#allocation8 + $0x404] sm:$0xf]  ;;  %v5438_v0 = vor.u32 %v6123_v50, %v5435_v24  ;;  %v6211_v24 = vld [vmem:[#allocation8 + $0x754] sm:$0xf] }
 0x3ee   : > { %4021 = vmatpush.bf16.msra.mxu3 %v5318_v11  ;;  %v6129_v11 = vld [vmem:[#allocation8 + $0x4c4] sm:$0xf] }
 0x3ef   : > { %3983 = vmatpush.bf16.msrb.mxu0 %v5118_v19  ;;  %v5526_v19 = vor.u32 %v6145_v12, %v5523_v13  ;;  %v6199_v12 = vld [vmem:[#allocation8 + $0x6f4] sm:$0xf] }
 0x3f1   : > { %3996 = vmatpush.bf16.msra.mxu1 %v5182_v20  ;;  %4009 = vmatpush.bf16.msra.mxu2 %v5246_v21  ;;  %v6127_v20 = vld [vmem:[#allocation8 + $0x4b4] sm:$0xf] }
 0x3f2   : > { %4022 = vmatpush.bf16.msra.mxu3 %v5310_v26  ;;  %v6159_v26 = vld [vmem:[#allocation8 + $0x5b4] sm:$0xf]  ;;  %v5454_v34 = vor.u32 %v6127_v20, %v5451_v22 }
 0x3f3   : > { %3984 = vmatpush.bf16.msrb.mxu0 %v5110_v39  ;;  %v7007_v4 = vpop.f32.mrf.mxu0  ;;  %v7022_v20 = vld [vmem:[%s7096_s8 + $0x2] ss:$4 sm:$0x3] }
 0x3f4   : > { %v7009_v7 = vpop.f32.mrf.mxu1 }
 0x3f5   : > { %3997 = vmatpush.bf16.msra.mxu1 %v5174_v44  ;;  %4010 = vmatpush.bf16.msra.mxu2 %v5238_v45  ;;  %v6125_v44 = vld [vmem:[#allocation8 + $0x4a4] sm:$0xf]  ;;  %v5582_v45 = vor.u32 %v6159_v26, %v5579_v27  ;;  %v5667_v27 = vld [vmem:[#allocation8 + $0x668] sm:$0xf0] }
 0x3f6   : > { %4023 = vmatpush.bf16.msra.mxu3 %v5302_v35  ;;  %3985 = vmatmul.bf16.vlgmr.msrb.gmra.mxu0 %v6987_v30  ;;  %v5534_v30 = vor.u32 %v6147_v15, %v5531_v55  ;;  %v5507_v35 = vld [vmem:[#allocation8 + $0x528] sm:$0xf0]  ;;  %v5446_v62 = vor.u32 %v6125_v44, %v5443_v33  ;;  %v5502_v15 = vor.u32 %v6139_v51, %v5499_v52  ;;  %v6181_v26 = vld [vmem:[#allocation8 + $0x664] sm:$0xf]  ;;  %v5787_v51 = vld [vmem:[#allocation8 + $0x758] sm:$0xf0] }
 0x3f7   : > { %4029 = vmatpush.bf16.msra.mxu0 %v5422_v1  ;;  %v6157_v1 = vld [vmem:[#allocation8 + $0x5a4] sm:$0xf]  ;;  %v5510_v47 = vor.u32 %v6141_v46, %v5507_v35  ;;  %v5859_v33 = vld [vmem:[#allocation8 + $0x7e8] sm:$0xf0]  ;;  %v5670_v46 = vor.u32 %v6181_v26, %v5667_v27  ;;  %v6223_v26 = vld [vmem:[#allocation8 + $0x7b4] sm:$0xf] }
 0x3f8   : > { %3998 = vmatmul.bf16.vlgmr.msra.gmra.mxu1 %v6992_v40  ;;  %4011 = vmatmul.bf16.vlgmr.msra.gmra.mxu2 %v6990_v38  ;;  %v5598_v40 = vor.u32 %v6163_v60, %v5595_v2  ;;  %v5459_v38 = vld [vmem:[#allocation8 + $0x4c8] sm:$0xf0]  ;;  %v6121_v60 = vld [vmem:[#allocation8 + $0x484] sm:$0xf]  ;;  %v5835_v27 = vld [vmem:[#allocation8 + $0x7b8] sm:$0xf0] }
 0x3f9   : > { %4042 = vmatpush.bf16.msrb.mxu1 %v5486_v36  ;;  %4055 = vmatpush.bf16.msrb.mxu2 %v5550_v5  ;;  %v5462_v17 = vor.u32 %v6129_v11, %v5459_v38  ;;  %v5571_v36 = vld [vmem:[#allocation8 + $0x5a8] sm:$0xf0]  ;;  %v5382_v5 = vor.u32 %v6109_v41, %v5379_v42  ;;  %v5675_v38 = vld [vmem:[#allocation8 + $0x678] sm:$0xf0]  ;;  %v2392_v42 = vperm.slane %v7022_v20, 0 }
 0x3fa   : > { %4068 = vmatpush.bf16.msrb.mxu3 %v5614_v49  ;;  %v5371_v49 = vld [vmem:[#allocation8 + $0x418] sm:$0xf0]  ;;  %v5574_v59 = vor.u32 %v6157_v1, %v5571_v36  ;;  %v5427_v2 = vld [vmem:[#allocation8 + $0x488] sm:$0xf0] }
 0x3fb   : > { %4024 = vmatmul.bf16.vlgmr.msra.gmra.mxu3 %v6996_v43  ;;  %4030 = vmatpush.bf16.msra.mxu0 %v5414_v53  ;;  %v5587_v43 = vld [vmem:[#allocation8 + $0x5c8] sm:$0xf0]  ;;  %v7011_v29 = vpop.f32.mrf.mxu2  ;;  %v7013_v31 = vpop.f32.mrf.mxu3  ;;  %v6155_v53 = vld [vmem:[#allocation8 + $0x594] sm:$0xf]  ;;  %v5374_v58 = vor.u32 %v6107_v48, %v5371_v49  ;;  %v3727_v52 = vadd.f32 %v7007_v4, %v2392_v42  ;;  %v6189_v42 = vld [vmem:[#allocation8 + $0x6a4] sm:$0xf] }
 0x3fc   : > { %v5590_v21 = vor.u32 %v6161_v14, %v5587_v43  ;;  %v3728_v39 = vpop.f32.mrf.mxu0  ;;  %v3741_v28 = vpop.f32.mrf.mxu1  ;;  %v5555_v11 = vld [vmem:[#allocation8 + $0x588] sm:$0xf0]  ;;  %v5739_v14 = vld [vmem:[#allocation8 + $0x6f8] sm:$0xf0]  ;;  %v6215_v43 = vld [vmem:[#allocation8 + $0x774] sm:$0xf] }
 0x3fd   : > { %4043 = vmatpush.bf16.msrb.mxu1 %v5478_v54  ;;  %4056 = vmatpush.bf16.msrb.mxu2 %v5542_v56  ;;  %v5563_v54 = vld [vmem:[#allocation8 + $0x598] sm:$0xf0]  ;;  %v5742_v23 = vor.u32 %v6199_v12, %v5739_v14  ;;  %v5731_v39 = vld [vmem:[#allocation8 + $0x6e8] sm:$0xf0]  ;;  %v6213_v28 = vld [vmem:[#allocation8 + $0x764] sm:$0xf] }
 0x3fe   : > { %4069 = vmatpush.bf16.msrb.mxu3 %v5606_v63  ;;  %v5363_v63 = vld [vmem:[#allocation8 + $0x408] sm:$0xf0]  ;;  %v6195_v48 = vld [vmem:[#allocation8 + $0x6d4] sm:$0xf] }
 0x3ff   : > { %4031 = vmatpush.bf16.msra.mxu0 %v5406_v3  ;;  %v6137_v3 = vld [vmem:[#allocation8 + $0x504] sm:$0xf]  ;;  %v5366_v13 = vor.u32 %v6105_v61, %v5363_v63  ;;  %v5795_v41 = vld [vmem:[#allocation8 + $0x768] sm:$0xf0] }
 0x400   : > { %v6289_v49 = vld.sshfl [vmem:[#allocation1] sm:$0xff pattern:$0x73625140] }
 0x401   : > { %4044 = vmatpush.bf16.msrb.mxu1 %v5470_v6  ;;  %4057 = vmatpush.bf16.msrb.mxu2 %v5534_v30  ;;  %v5566_v6 = vor.u32 %v6155_v53, %v5563_v54  ;;  %v6290_v53 = vld.sshfl [vmem:[#allocation1 + $0x8] sm:$0xff pattern:$0x73625140]  ;;  %v6291_v54 = vld.sshfl [vmem:[#allocation1 + $0x10] sm:$0xff pattern:$0x73625140] }
 0x402   : > { %4070 = vmatpush.bf16.msrb.mxu3 %v5598_v40  ;;  %v6183_v40 = vld [vmem:[#allocation8 + $0x674] sm:$0xf] }
 0x403   : > { %4032 = vmatpush.bf16.msra.mxu0 %v5398_v16  ;;  %v3754_v56 = vpop.f32.mrf.mxu2  ;;  %v3767_v57 = vpop.f32.mrf.mxu3  ;;  %v5803_v16 = vld [vmem:[#allocation8 + $0x778] sm:$0xf0]  ;;  %v5678_v22 = vor.u32 %v6183_v40, %v5675_v38  ;;  %v6225_v40 = vld [vmem:[#allocation8 + $0x7c4] sm:$0xf]  ;;  %v5843_v38 = vld [vmem:[#allocation8 + $0x7c8] sm:$0xf0] }
 0x404   : > { %v7015_v55 = vpop.f32.mrf.mxu0  ;;  %v5806_v25 = vor.u32 %v6215_v43, %v5803_v16  ;;  %v6227_v56 = vld [vmem:[#allocation8 + $0x7d4] sm:$0xf]  ;;  %v5851_v57 = vld [vmem:[#allocation8 + $0x7d8] sm:$0xf0] }
 0x405   : > { %4045 = vmatpush.bf16.msrb.mxu1 %v5462_v17  ;;  %4058 = vmatpush.bf16.msrb.mxu2 %v5526_v19  ;;  %v7017_v30 = vpop.f32.mrf.mxu1  ;;  %v5430_v17 = vor.u32 %v6121_v60, %v5427_v2  ;;  %v5494_v19 = vor.u32 %v6137_v3, %v5491_v9  ;;  %v5651_v60 = vld [vmem:[#allocation8 + $0x648] sm:$0xf0]  ;;  %v6193_v2 = vld [vmem:[#allocation8 + $0x6c4] sm:$0xf]  ;;  %v5854_v3 = vor.u32 %v6227_v56, %v5851_v57  ;;  %v6203_v56 = vld [vmem:[#allocation8 + $0x714] sm:$0xf] }
 0x406   : > { %4071 = vmatpush.bf16.msrb.mxu3 %v5590_v21  ;;  %v5558_v21 = vor.u32 %v6153_v10, %v5555_v11  ;;  %v6209_v9 = vld [vmem:[#allocation8 + $0x744] sm:$0xf]  ;;  %v5779_v10 = vld [vmem:[#allocation8 + $0x748] sm:$0xf0]  ;;  %v3740_v11 = vadd.f32 %v7009_v7, %v3727_v52  ;;  %v5846_v7 = vor.u32 %v6225_v40, %v5843_v38  ;;  %v5755_v57 = vld [vmem:[#allocation8 + $0x718] sm:$0xf0] }
 0x407   : > { %4033 = vmatpush.bf16.msra.mxu0 %v5390_v32  ;;  %v6197_v32 = vld [vmem:[#allocation8 + $0x6e4] sm:$0xf]  ;;  %v5811_v38 = vld [vmem:[#allocation8 + $0x788] sm:$0xf0] }
 0x408   : > { %v5734_v36 = vor.u32 %v6197_v32, %v5731_v39  ;;  %v3753_v14 = vadd.f32 %v7011_v29, %v3740_v11  ;;  %v5747_v11 = vld [vmem:[#allocation8 + $0x708] sm:$0xf0] }
 0x409   : > { %4046 = vmatpush.bf16.msrb.mxu1 %v5454_v34  ;;  %4059 = vmatpush.bf16.msrb.mxu2 %v5518_v37  ;;  %v5870_v34 = vor.u32 %v6231_v8, %v5867_v18  ;;  %v6175_v8 = vld [vmem:[#allocation8 + $0x634] sm:$0xf]  ;;  %v5643_v18 = vld [vmem:[#allocation8 + $0x638] sm:$0xf0] }
 0x40a   : > { %4072 = vmatpush.bf16.msrb.mxu3 %v5582_v45  ;;  %v6229_v45 = vld [vmem:[#allocation8 + $0x7e4] sm:$0xf]  ;;  %v5646_v32 = vor.u32 %v6175_v8, %v5643_v18  ;;  %v3766_v29 = vadd.f32 %v7013_v31, %v3753_v14 }
 0x40b   : > { %4034 = vmatpush.bf16.msra.mxu0 %v5382_v5  ;;  %v7024_v37 = vpop.f32.mrf.mxu2  ;;  %v5798_v5 = vor.u32 %v6213_v28, %v5795_v41  ;;  %v5862_v50 = vor.u32 %v6229_v45, %v5859_v33  ;;  %v6173_v28 = vld [vmem:[#allocation8 + $0x624] sm:$0xf]  ;;  %v5635_v41 = vld [vmem:[#allocation8 + $0x628] sm:$0xf0] }
 0x40c   : > { %v3780_v44 = vpop.f32.mrf.mxu0  ;;  %v5699_v33 = vld [vmem:[#allocation8 + $0x6a8] sm:$0xf0]  ;;  %v5638_v31 = vor.u32 %v6173_v28, %v5635_v41 }
 0x40d   : > { %4047 = vmatpush.bf16.msrb.mxu1 %v5446_v62  ;;  %4060 = vmatpush.bf16.msrb.mxu2 %v5510_v47  ;;  %v3793_v35 = vpop.f32.mrf.mxu1  ;;  %v6179_v62 = vld [vmem:[#allocation8 + $0x654] sm:$0xf]  ;;  %v5659_v47 = vld [vmem:[#allocation8 + $0x658] sm:$0xf0]  ;;  %v5838_v44 = vor.u32 %v6223_v26, %v5835_v27 }
 0x40e   : > { %4073 = vmatpush.bf16.msrb.mxu3 %v5574_v59  ;;  %v7027_v1 = vpop.f32.mrf.mxu3  ;;  %v5723_v59 = vld [vmem:[#allocation8 + $0x6d8] sm:$0xf0]  ;;  %v5662_v61 = vor.u32 %v6179_v62, %v5659_v47  ;;  %v5763_v35 = vld [vmem:[#allocation8 + $0x728] sm:$0xf0] }
 0x40f   : > { %4035 = vmatpush.bf16.msra.mxu0 %v5374_v58  ;;  %v6292_v58 = vld.sshfl [vmem:[#allocation1 + $0x18] sm:$0xff pattern:$0x73625140]  ;;  %v5726_v63 = vor.u32 %v6195_v48, %v5723_v59  ;;  %v5702_v48 = vor.u32 %v6189_v42, %v5699_v33  ;;  %v5627_v59 = vld [vmem:[#allocation8 + $0x618] sm:$0xf0] }
 0x410   : > { %v5827_v62 = vld [vmem:[#allocation8 + $0x7a8] sm:$0xf0] }
 0x411   : > { %4048 = vmatpush.bf16.msrb.mxu1 %v5438_v0  ;;  %4061 = vmatpush.bf16.msrb.mxu2 %v5502_v15  ;;  %v5790_v0 = vor.u32 %v6211_v24, %v5787_v51  ;;  %v6177_v15 = vld [vmem:[#allocation8 + $0x644] sm:$0xf]  ;;  %v6187_v24 = vld [vmem:[#allocation8 + $0x694] sm:$0xf] }
 0x412   : > { %4074 = vmatpush.bf16.msrb.mxu3 %v5566_v6  ;;  %v5715_v6 = vld [vmem:[#allocation8 + $0x6c8] sm:$0xf0] }
 0x413   : > { %4036 = vmatpush.bf16.msra.mxu0 %v5366_v13  ;;  %v3806_v4 = vpop.f32.mrf.mxu2  ;;  %v5654_v13 = vor.u32 %v6177_v15, %v5651_v60  ;;  %v5718_v16 = vor.u32 %v6193_v2, %v5715_v6  ;;  %v5758_v60 = vor.u32 %v6203_v56, %v5755_v57  ;;  %v6169_v2 = vld [vmem:[#allocation8 + $0x604] sm:$0xf] }
 0x414   : > { %v7031_v12 = vpop.f32.mrf.mxu0  ;;  %v6185_v4 = vld [vmem:[#allocation8 + $0x684] sm:$0xf] }
 0x415   : > { %4049 = vmatpush.bf16.msrb.mxu1 %v5430_v17  ;;  %4062 = vmatpush.bf16.msrb.mxu2 %v5494_v19  ;;  %v5782_v17 = vor.u32 %v6209_v9, %v5779_v10  ;;  %v7034_v19 = vpop.f32.mrf.mxu1  ;;  %v5683_v9 = vld [vmem:[#allocation8 + $0x688] sm:$0xf0]  ;;  %v6201_v10 = vld [vmem:[#allocation8 + $0x704] sm:$0xf] }
 0x416   : > { %4075 = vmatpush.bf16.msrb.mxu3 %v5558_v21  ;;  %4037 = vmatmul.bf16.vlgmr.msra.gmra.mxu0 %v6289_v49  ;;  %v3819_v43 = vpop.f32.mrf.mxu3  ;;  %v6191_v21 = vld [vmem:[#allocation8 + $0x6b4] sm:$0xf] }
 0x417   : > { %4081 = vmatpush.bf16.msrb.mxu0 %v5678_v22  ;;  %v5707_v22 = vld [vmem:[#allocation8 + $0x6b8] sm:$0xf0]  ;;  %v5750_v43 = vor.u32 %v6201_v10, %v5747_v11  ;;  %v4141_v10 = vld [vmem:[%s7094_s6] sm:$0x1] }
 0x418   : > { %4050 = vmatmul.bf16.vlgmr.msrb.gmra.mxu1 %v6290_v53  ;;  %4063 = vmatmul.bf16.vlgmr.msrb.gmra.mxu2 %v6291_v54  ;;  %v5691_v54 = vld [vmem:[#allocation8 + $0x698] sm:$0xf0] }
 0x419   : > { %4094 = vmatpush.bf16.msra.mxu1 %v5742_v23  ;;  %4107 = vmatpush.bf16.msra.mxu2 %v5806_v25  ;;  %v6207_v23 = vld [vmem:[#allocation8 + $0x734] sm:$0xf]  ;;  %v5771_v25 = vld [vmem:[#allocation8 + $0x738] sm:$0xf0]  ;;  %v5694_v15 = vor.u32 %v6187_v24, %v5691_v54 }
 0x41a   : > { %4120 = vmatpush.bf16.msra.mxu3 %v5870_v34  ;;  %v5710_v34 = vor.u32 %v6191_v21, %v5707_v22  ;;  %v5774_v39 = vor.u32 %v6207_v23, %v5771_v25  ;;  %v6293_v21 = vld.sshfl [vmem:[#allocation1 + $0x20] sm:$0xff pattern:$0x73625140]  ;;  %v6296_v23 = vld.sshfl [vmem:[#allocation1 + $0x38] sm:$0xff pattern:$0x73625140] }
 0x41b   : > { %4076 = vmatmul.bf16.vlgmr.msrb.gmra.mxu3 %v6292_v58  ;;  %4082 = vmatpush.bf16.msrb.mxu0 %v5670_v46  ;;  %v7037_v45 = vpop.f32.mrf.mxu2  ;;  %v6205_v46 = vld [vmem:[#allocation8 + $0x724] sm:$0xf]  ;;  %v6219_v58 = vld [vmem:[#allocation8 + $0x794] sm:$0xf] }
 0x41c   : > { %v3832_v47 = vpop.f32.mrf.mxu0  ;;  %v5766_v49 = vor.u32 %v6205_v46, %v5763_v35 }
 0x41d   : > { %4095 = vmatpush.bf16.msra.mxu1 %v5734_v36  ;;  %4108 = vmatpush.bf16.msra.mxu2 %v5798_v5  ;;  %v3779_v36 = vadd.f32 %v7015_v55, %v3766_v29  ;;  %v6221_v5 = vld [vmem:[#allocation8 + $0x7a4] sm:$0xf]  ;;  %v3845_v51 = vpop.f32.mrf.mxu1 }
 0x41e   : > { %4121 = vmatpush.bf16.msra.mxu3 %v5862_v50  ;;  %v6171_v50 = vld [vmem:[#allocation8 + $0x614] sm:$0xf]  ;;  %v3869_v52 = vpop.f32.mrf.mxu3  ;;  %v5830_v53 = vor.u32 %v6221_v5, %v5827_v62 }
 0x41f   : > { %4083 = vmatpush.bf16.msrb.mxu0 %v5662_v61  ;;  %v3792_v55 = vadd.f32 %v7017_v30, %v3779_v36  ;;  %v5819_v61 = vld [vmem:[#allocation8 + $0x798] sm:$0xf0]  ;;  %v6217_v30 = vld [vmem:[#allocation8 + $0x784] sm:$0xf]  ;;  %v2393_v36 = vperm.slane %v7022_v20, 1 }
 0x420   : > { %v5822_v6 = vor.u32 %v6219_v58, %v5819_v61 }
 0x421   : > { %4096 = vmatpush.bf16.msra.mxu1 %v5726_v63  ;;  %4109 = vmatpush.bf16.msra.mxu2 %v5790_v0  ;;  %v5630_v63 = vor.u32 %v6171_v50, %v5627_v59  ;;  %v3805_v0 = vadd.f32 %v7024_v37, %v3792_v55  ;;  %v5686_v37 = vor.u32 %v6185_v4, %v5683_v9 }
 0x422   : > { %4122 = vmatpush.bf16.msra.mxu3 %v5854_v3  ;;  %v5619_v3 = vld [vmem:[#allocation8 + $0x608] sm:$0xf0] }
 0x423   : > { %4084 = vmatpush.bf16.msrb.mxu0 %v5654_v13  ;;  %v3858_v40 = vpop.f32.mrf.mxu2  ;;  %v5622_v13 = vor.u32 %v6169_v2, %v5619_v3  ;;  %v3818_v14 = vadd.f32 %v7027_v1, %v3805_v0  ;;  %v6295_v1 = vld.sshfl [vmem:[#allocation1 + $0x30] sm:$0xff pattern:$0x73625140] }
 0x425   : > { %4097 = vmatpush.bf16.msra.mxu1 %v5718_v16  ;;  %4110 = vmatpush.bf16.msra.mxu2 %v5782_v17  ;;  %v5814_v16 = vor.u32 %v6217_v30, %v5811_v38  ;;  %v3831_v8 = vadd.f32 %v7031_v12, %v3818_v14 }
 0x426   : > { %4123 = vmatpush.bf16.msra.mxu3 %v5846_v7  ;;  %v3871_v17 = vpop.f32.mrf.mxu3  ;;  %v6294_v7 = vld.sshfl [vmem:[#allocation1 + $0x28] sm:$0xff pattern:$0x73625140] }
 0x427   : > { %4085 = vmatpush.bf16.msrb.mxu0 %v5646_v32  ;;  %v3844_v18 = vadd.f32 %v7034_v19, %v3831_v8 }
 0x429   : > { %4098 = vmatpush.bf16.msra.mxu1 %v5710_v34  ;;  %4111 = vmatpush.bf16.msra.mxu2 %v5774_v39  ;;  %v3857_v22 = vadd.f32 %v7037_v45, %v3844_v18 }
 0x42a   : > { %4124 = vmatpush.bf16.msra.mxu3 %v5838_v44 }
 0x42b   : > { %4086 = vmatpush.bf16.msrb.mxu0 %v5638_v31  ;;  %v3870_v25 = vadd.f32 %v3869_v52, %v3857_v22 }
 0x42d   : > { %4099 = vmatpush.bf16.msra.mxu1 %v5702_v48  ;;  %4112 = vmatpush.bf16.msra.mxu2 %v5766_v49 }
 0x42e   : > { %4125 = vmatpush.bf16.msra.mxu3 %v5830_v53 }
 0x42f   : > { %4087 = vmatpush.bf16.msrb.mxu0 %v5630_v63 }
 0x431   : > { %4100 = vmatpush.bf16.msra.mxu1 %v5694_v15  ;;  %4113 = vmatpush.bf16.msra.mxu2 %v5758_v60 }
 0x432   : > { %4126 = vmatpush.bf16.msra.mxu3 %v5822_v6  ;;  %v5873_v6 = vld [vmem:[%s7094_s6 + $0x1] sm:$0x1] }
 0x433   : > { %4088 = vmatpush.bf16.msrb.mxu0 %v5622_v13  ;;  %v3882_v26 = vpop.f32.mrf.mxu0 }
 0x434   : > { %v3883_v12 = vadd.f32 %v3882_v26, %v3870_v25 }
 0x435   : > { %4101 = vmatpush.bf16.msra.mxu1 %v5686_v37  ;;  %4114 = vmatpush.bf16.msra.mxu2 %v5750_v43  ;;  %v3895_v27 = vpop.f32.mrf.mxu1  ;;  %v5879_v37 = vld [vmem:[%s7094_s6 + $0x3] sm:$0x1] }
 0x436   : > { %4127 = vmatpush.bf16.msra.mxu3 %v5814_v16  ;;  %4089 = vmatmul.bf16.vlgmr.msrb.gmra.mxu0 %v6293_v21  ;;  %v3896_v32 = vadd.f32 %v3895_v27, %v3883_v12  ;;  %v5876_v16 = vld [vmem:[%s7094_s6 + $0x2] sm:$0x1] }
 0x438   : > { %4102 = vmatmul.bf16.vlgmr.msra.gmra.mxu1 %v6294_v7  ;;  %4115 = vmatmul.bf16.vlgmr.msra.gmra.mxu2 %v6295_v1 }
 0x439   : > { %4128 = vmatmul.bf16.vlgmr.msra.gmra.mxu3 %v6296_v23 }
 0x43b   : > { %v3908_v29 = vpop.f32.mrf.mxu2  ;;  %v3884_v28 = vpop.f32.mrf.mxu0 }
 0x43c   : > { %v3909_v34 = vadd.f32 %v3908_v29, %v3896_v32 }
 0x43d   : > { %v3897_v19 = vpop.f32.mrf.mxu1 }
 0x43e   : > { %v3921_v39 = vpop.f32.mrf.mxu3 }
 0x43f   : > { %v3922_v41 = vadd.f32 %v3921_v39, %v3909_v34 }
 0x441   : > { %vm4133_vm12 = vcmp.ge.f32.partialorder %v3922_v41, 0.0  ;;  %v4135_v42 = vmul.f32 0.2, %v3922_v41 }
 0x443   : > { %v4137_v44 = vsel %vm4133_vm12, %v3922_v41, %v4135_v42  ;;  %v3910_v46 = vpop.f32.mrf.mxu2 }
 0x444   : > { %v4139_v33 = vpack.c.bf16 %v4137_v44, %v4137_v44 }
 0x446   : > { %v3923_v45 = vpop.f32.mrf.mxu3  ;;  %v4148_v35 = vsel %vm4146_vm13, %v4139_v33, 0 }
 0x447   : > { %4160 = vmatpush.bf16.msra.mxu0 %v4148_v35  ;;  %4191 = vmatpush.bf16.msrb.mxu2 %v4148_v35 }
 0x44a   : > { %5874 = vmatmul.msk.bf16.vlgmr.msrb.gmra.mxu2 %vm4142_vm14, %v5873_v6  ;;  %5871 = vmatmul.msk.bf16.vlgmr.msra.gmra.mxu0 %vm4142_vm14, %v4141_v10 }
 0x44b   : > { %4222 = vmatpush.bf16.msrb.mxu0 %v4148_v35  ;;  %4253 = vmatpush.bf16.msra.mxu2 %v4148_v35 }
 0x453   : > { %v3934_v5 = vpop.f32.mrf.mxu0 }
 0x454   : > { %v3935_v62 = vadd.f32 %v3934_v5, %v2393_v36  ;;  %v4272_v5 = vld [vmem:[#allocation9] sm:$0xff] }
 0x455   : > { %v3947_v31 = vpop.f32.mrf.mxu1 }
 0x456   : > { %v3948_v47 = vadd.f32 %v3947_v31, %v3935_v62  ;;  %v4274_v62 = vperm.slane %v4272_v5, 0  ;;  %v4275_v31 = vperm.slane %v4272_v5, 1 }
 0x45a   : > { %5880 = vmatmul.msk.bf16.vlgmr.msra.gmra.mxu2 %vm4142_vm14, %v5879_v37  ;;  %5877 = vmatmul.msk.bf16.vlgmr.msrb.gmra.mxu0 %vm4142_vm14, %v5876_v16 }
 0x45b   : > { %v3960_v48 = vpop.f32.mrf.mxu2  ;;  %v3936_v59 = vpop.f32.mrf.mxu0 }
 0x45c   : > { %v3961_v49 = vadd.f32 %v3960_v48, %v3948_v47  ;;  %v4277_v59 = vperm.slane %v4272_v5, 3 }
 0x45d   : > { %v3949_v24 = vpop.f32.mrf.mxu1 }
 0x45e   : > { %v3973_v50 = vpop.f32.mrf.mxu3 }
 0x45f   : > { %v3974_v51 = vadd.f32 %v3973_v50, %v3961_v49  ;;  %v4276_v50 = vperm.slane %v4272_v5, 2 }
 0x463   : > { %v3962_v52 = vpop.f32.mrf.mxu2 }
 0x466   : > { %v3975_v53 = vpop.f32.mrf.mxu3 }
 0x473   : > { %v3986_v54 = vpop.f32.mrf.mxu0 }
 0x474   : > { %v3987_v60 = vadd.f32 %v3986_v54, %v3974_v51 }
 0x475   : > { %v3999_v56 = vpop.f32.mrf.mxu1 }
 0x476   : > { %v4000_v11 = vadd.f32 %v3999_v56, %v3987_v60  ;;  %v4278_v56 = vperm.slane %v4272_v5, 4 }
 0x47b   : > { %v4012_v57 = vpop.f32.mrf.mxu2  ;;  %v3988_v58 = vpop.f32.mrf.mxu0 }
 0x47c   : > { %v4013_v40 = vadd.f32 %v4012_v57, %v4000_v11 }
 0x47d   : > { %v4001_v61 = vpop.f32.mrf.mxu1 }
 0x47e   : > { %v4025_v55 = vpop.f32.mrf.mxu3 }
 0x47f   : > { %v4026_v13 = vadd.f32 %v4025_v55, %v4013_v40  ;;  %v4281_v40 = vperm.slane %v4272_v5, 7 }
 0x483   : > { %v4014_v63 = vpop.f32.mrf.mxu2 }
 0x486   : > { %v4027_v20 = vpop.f32.mrf.mxu3 }
 0x493   : > { %v4038_v0 = vpop.f32.mrf.mxu0 }
 0x494   : > { %v4039_v14 = vadd.f32 %v4038_v0, %v4026_v13  ;;  %v4279_v0 = vperm.slane %v4272_v5, 5 }
 0x495   : > { %v4051_v15 = vpop.f32.mrf.mxu1 }
 0x496   : > { %v4052_v43 = vadd.f32 %v4051_v15, %v4039_v14  ;;  %v4280_v15 = vperm.slane %v4272_v5, 6 }
 0x49b   : > { %v4064_v2 = vpop.f32.mrf.mxu2  ;;  %v4040_v4 = vpop.f32.mrf.mxu0 }
 0x49c   : > { %v4065_v17 = vadd.f32 %v4064_v2, %v4052_v43 }
 0x49d   : > { %v4053_v9 = vpop.f32.mrf.mxu1 }
 0x49e   : > { %v4077_v3 = vpop.f32.mrf.mxu3 }
 0x49f   : > { %v4078_v8 = vadd.f32 %v4077_v3, %v4065_v17 }
 0x4a3   : > { %v4066_v30 = vpop.f32.mrf.mxu2 }
 0x4a6   : > { %v4079_v38 = vpop.f32.mrf.mxu3 }
 0x4b3   : > { %v4090_v18 = vpop.f32.mrf.mxu0 }
 0x4b4   : > { %v4091_v7 = vadd.f32 %v4090_v18, %v4078_v8  ;;  %v4316_v18 = vld [vmem:[%s7096_s8 + $0x3] sm:$0x1] }
 0x4b5   : > { %v4103_v21 = vpop.f32.mrf.mxu1 }
 0x4b6   : > { %v4104_v1 = vadd.f32 %v4103_v21, %v4091_v7 }
 0x4bb   : > { %v4116_v22 = vpop.f32.mrf.mxu2  ;;  %v4092_v26 = vpop.f32.mrf.mxu0 }
 0x4bc   : > { %v4117_v23 = vadd.f32 %v4116_v22, %v4104_v1  ;;  %v4129_v25 = vpop.f32.mrf.mxu3 }
 0x4bd   : > { %v4105_v27 = vpop.f32.mrf.mxu1 }
 0x4be   : > { %v4130_v12 = vadd.f32 %v4129_v25, %v4117_v23 }
 0x4c0   : > { %vm4134_vm15 = vcmp.ge.f32.partialorder %v4130_v12, 0.0  ;;  %v4136_v32 = vmul.f32 0.2, %v4130_v12 }
 0x4c2   : > { %v4138_v29 = vsel %vm4134_vm15, %v4130_v12, %v4136_v32 }
 0x4c3   : > { %v4140_v34 = vpack.c.bf16 %v4138_v29, %v4138_v29  ;;  %v4118_v39 = vpop.f32.mrf.mxu2 }
 0x4c4   : > { %v4131_v28 = vpop.f32.mrf.mxu3 }
 0x4c5   : > { %v4151_v19 = vsel %vm4146_vm13, %v4140_v34, 0 }
 0x4c6   : > { %4173 = vmatpush.bf16.msrb.mxu1 %v4151_v19  ;;  %4204 = vmatpush.bf16.msrb.mxu3 %v4151_v19 }
 0x4c7   : > { %v4162_v41 = vpop.f32.mrf.mxu0 }
 0x4c8   : > { %v4290_v48 = vmul.f32 %v4274_v62, %v4162_v41 }
 0x4c9   : > { %5875 = vmatmul.msk.bf16.vlgmr.msrb.gmra.mxu3 %vm4142_vm14, %v5873_v6  ;;  %5872 = vmatmul.msk.bf16.vlgmr.msrb.gmra.mxu1 %vm4142_vm14, %v4141_v10 }
 0x4ca   : > { %4235 = vmatpush.bf16.msra.mxu1 %v4151_v19  ;;  %4266 = vmatpush.bf16.msra.mxu3 %v4151_v19  ;;  %v4299_v24 = vsel %vm4298_vm0, %v4290_v48, 0.0 }
 0x4cd   : > { %v4193_v42 = vpop.f32.mrf.mxu2 }
 0x4ce   : > { %v4292_v52 = vmul.f32 %v4276_v50, %v4193_v42 }
 0x4cf   : > { %v4164_v44 = vpop.f32.mrf.mxu0 }
 0x4d0   : > { %v4302_v58 = vsel %vm4298_vm0, %v4292_v52, 0.0 }
 0x4d5   : > { %v4195_v33 = vpop.f32.mrf.mxu2 }
 0x4d7   : > { %v4224_v46 = vpop.f32.mrf.mxu0 }
 0x4d8   : > { %v4294_v63 = vmul.f32 %v4278_v56, %v4224_v46 }
 0x4d9   : > { %5881 = vmatmul.msk.bf16.vlgmr.msra.gmra.mxu3 %vm4142_vm14, %v5879_v37  ;;  %5878 = vmatmul.msk.bf16.vlgmr.msra.gmra.mxu1 %vm4142_vm14, %v5876_v16 }
 0x4da   : > { %v4306_v3 = vsel %vm4298_vm0, %v4294_v63, 0.0 }
 0x4dd   : > { %v4255_v45 = vpop.f32.mrf.mxu2 }
 0x4de   : > { %v4296_v9 = vmul.f32 %v4280_v15, %v4255_v45 }
 0x4df   : > { %v4226_v35 = vpop.f32.mrf.mxu0 }
 0x4e0   : > { %v4310_v38 = vsel %vm4298_vm0, %v4296_v9, 0.0 }
 0x4e5   : > { %v4257_v36 = vpop.f32.mrf.mxu2 }
 0x546   : > { %v4175_v47 = vpop.f32.mrf.mxu1 }
 0x547   : > { %v4291_v49 = vmul.f32 %v4275_v31, %v4175_v47 }
 0x549   : > { %v4300_v51 = vsel %vm4298_vm0, %v4291_v49, 0.0 }
 0x54a   : > { %v4301_v57 = vadd.f32 %v4300_v51, %v4299_v24 }
 0x54c   : > { %v4206_v53 = vpop.f32.mrf.mxu3  ;;  %v4303_v20 = vadd.f32 %v4302_v58, %v4301_v57 }
 0x54d   : > { %v4293_v54 = vmul.f32 %v4277_v59, %v4206_v53 }
 0x54e   : > { %v4177_v55 = vpop.f32.mrf.mxu1 }
 0x54f   : > { %v4304_v61 = vsel %vm4298_vm0, %v4293_v54, 0.0 }
 0x550   : > { %v4305_v60 = vadd.f32 %v4304_v61, %v4303_v20 }
 0x552   : > { %v4307_v10 = vadd.f32 %v4306_v3, %v4305_v60 }
 0x554   : > { %v4208_v2 = vpop.f32.mrf.mxu3 }
 0x556   : > { %v4237_v4 = vpop.f32.mrf.mxu1 }
 0x557   : > { %v4295_v6 = vmul.f32 %v4279_v0, %v4237_v4 }
 0x559   : > { %v4308_v11 = vsel %vm4298_vm0, %v4295_v6, 0.0 }
 0x55a   : > { %v4309_v30 = vadd.f32 %v4308_v11, %v4307_v10 }
 0x55c   : > { %v4268_v13 = vpop.f32.mrf.mxu3  ;;  %v4311_v43 = vadd.f32 %v4310_v38, %v4309_v30 }
 0x55d   : > { %v4297_v14 = vmul.f32 %v4281_v40, %v4268_v13 }
 0x55e   : > { %v4239_v37 = vpop.f32.mrf.mxu1 }
 0x55f   : > { %v4312_v16 = vsel %vm4298_vm0, %v4297_v14, 0.0 }
 0x560   : > { %v4313_v17 = vadd.f32 %v4312_v16, %v4311_v43 }
 0x562   : > { %4314 = vadd.xlane.f32.xlu2 %v4313_v17 }
 0x564   : > { %v4270_v8 = vpop.f32.mrf.mxu3 }
 0x5d5   : > { %v4315_v21 = vpop.xlane.xlu2 %4314 }
 0x5d6   : > { %v4317_v7 = vadd.f32 %v4316_v18, %v4315_v21 }
 0x5d8   : > { %4319 = vst.msk [vmem:[%s395_s15] sm:$0x1] %vm4318_vm1, %v4317_v7 }
 0x5d9 PF: > { %s22_s30 = sadd.s32 1, %s6435_s30  }
 0x5da   : > { %p19_p8 = scmp.ge.s32.totalorder %s22_s30, 4  }
 0x5dc   :  { %21 = sbr.rel (!%p19_p8) target bundleno = 3 (0x3), region = 138 }
 0x5e1   :  { %4337 = vsyncpa [#allocation5], 1 }
 0x5e2   :  { %4339 = vsyncpa [#allocation5 + $0x1], 1 }
 0x5e3   :  { %4340 = vsyncpa [#allocation7], 1 }
 0x5e4   :  { %4341 = vsyncpa [#allocation10], 1 }

</bundles_post_ra>
